<compile_context>
chip_gen: v6e
topology: v6e:2x2x1
jax: 0.10.0
libtpu: 0.0.40
codegen_flags: <defaults>
</compile_context>

<pallas_src>
import jax
import jax.numpy as jnp
from jax.experimental import pallas as pl
from jax.experimental.pallas import tpu as pltpu

BN_EPS = 1e-5


def _dfcn_head_kernel(xp_ref, w1_ref, b1_ref, w2_ref, b2_ref, o_ref, acc_ref):
    """One batch element per grid step.

    xp_ref : (1, H+2, W+2, Cin)  bf16  zero-padded NHWC input
    w1_ref : (9, Cin, Cinter)    bf16  3x3 conv weight (BN-folded), tap-major
    b1_ref : (1, Cinter)         f32   BN-folded bias
    w2_ref : (Cout, Cinter)      bf16  1x1 conv weight (output-major)
    b2_ref : (Cout, 1)           f32   1x1 conv bias
    o_ref  : (1, Cout, H*W)      f32   lane-dense, NCHW-native output
    acc_ref: (H*W, Cinter)       f32   VMEM scratch accumulator
    """
    H = xp_ref.shape[1] - 2
    W = xp_ref.shape[2] - 2
    Cin = xp_ref.shape[3]
    Cinter = w1_ref.shape[2]
    HW = H * W

    xp = xp_ref[0]  # (H+2, W+2, Cin) bf16

    # Init accumulator with the BN-folded bias.
    acc_ref[...] = jnp.broadcast_to(b1_ref[...], (HW, Cinter))

    # 3x3 "same" convolution: 9 shifted (HW, Cin) @ (Cin, Cinter) MXU matmuls
    # accumulated in f32 VMEM scratch.
    for ky in range(3):
        for kx in range(3):
            patch = xp[ky:ky + H, kx:kx + W, :].reshape(HW, Cin)
            acc_ref[...] += jnp.dot(patch, w1_ref[ky * 3 + kx],
                                    preferred_element_type=jnp.float32)

    # ReLU in f32 (Dropout2d(0.1) is identity in eval mode), cast for the MXU.
    y = jnp.maximum(acc_ref[...], 0.0).astype(w2_ref.dtype)      # (HW, Cinter)

    # 1x1 conv produced directly channel-major: (Cout,Cinter) x (HW,Cinter)^T
    # -> (Cout, HW), so the store is lane-dense and no output transpose exists.
    out_t = jax.lax.dot_general(
        w2_ref[...], y, (((1,), (1,)), ((), ())),
        preferred_element_type=jnp.float32)                      # (Cout, HW)
    o_ref[0] = (out_t + b2_ref[...]).astype(o_ref.dtype)


def dfcn_head(x_nchw, params):
    """Forward pass of dfcnHead. x_nchw: (N, Cin, H, W) float32 -> (N, Cout, H, W)."""
    w1, gamma, beta, mean, var, w2, b2 = params
    N, Cin, H, W = x_nchw.shape
    Cinter = w1.shape[0]          # torch conv1 weight: (Cinter, Cin, 3, 3)
    Cout = w2.shape[0]            # torch conv2 weight: (Cout, Cinter, 1, 1)
    HW = H * W

    # --- Fold BatchNorm (running stats) into the 3x3 conv, once, in f32. ---
    scale = gamma * jax.lax.rsqrt(var + BN_EPS)                    # (Cinter,)
    w1f = w1 * scale[:, None, None, None]                          # OIHW, scaled per O
    b1 = (beta - mean * scale).reshape(1, Cinter).astype(jnp.float32)

    # Reorganise weights for the kernel (bf16 for the MXU).
    w1_k = jnp.transpose(w1f, (2, 3, 1, 0)).reshape(9, Cin, Cinter).astype(jnp.bfloat16)
    w2_oi = w2.reshape(Cout, Cinter).astype(jnp.bfloat16)          # (Cout, Cinter)
    b2_k = b2.reshape(Cout, 1).astype(jnp.float32)

    # NCHW -> NHWC (bf16) and 1-px zero halo for the SAME 3x3 conv.
    x_nhwc = jnp.transpose(x_nchw, (0, 2, 3, 1)).astype(jnp.bfloat16)
    xp = jnp.pad(x_nhwc, ((0, 0), (1, 1), (1, 1), (0, 0)))

    flops = 2 * N * HW * (9 * Cin * Cinter + Cinter * Cout)
    bytes_accessed = (xp.size * 2 + w1_k.size * 2 + w2_oi.size * 2
                      + b1.size * 4 + b2_k.size * 4 + N * Cout * HW * 4)

    out = pl.pallas_call(
        _dfcn_head_kernel,
        out_shape=jax.ShapeDtypeStruct((N, Cout, HW), jnp.float32),
        grid_spec=pltpu.PrefetchScalarGridSpec(
            num_scalar_prefetch=0,
            grid=(N,),
            in_specs=[
                pl.BlockSpec((1, H + 2, W + 2, Cin), lambda n: (n, 0, 0, 0)),
                pl.BlockSpec((9, Cin, Cinter), lambda n: (0, 0, 0)),
                pl.BlockSpec((1, Cinter), lambda n: (0, 0)),
                pl.BlockSpec((Cout, Cinter), lambda n: (0, 0)),
                pl.BlockSpec((Cout, 1), lambda n: (0, 0)),
            ],
            out_specs=pl.BlockSpec((1, Cout, HW), lambda n: (n, 0, 0)),
            scratch_shapes=[pltpu.VMEM((HW, Cinter), jnp.float32)],
        ),
        compiler_params=pltpu.CompilerParams(
            dimension_semantics=("parallel",)),
        cost_estimate=pl.CostEstimate(
            flops=flops, transcendentals=0, bytes_accessed=bytes_accessed),
    )(xp, w1_k, b1, w2_oi, b2_k)

    # Lane-dense (N, Cout, H*W) -> (N, Cout, H, W) is a free reshape.
    return out.reshape(N, Cout, H, W)


def _reference(x_nchw, params):
    """Pure-JAX f32 reference (inference mode) for a sanity check."""
    w1, gamma, beta, mean, var, w2, b2 = params
    y = jax.lax.conv_general_dilated(
        x_nchw, w1, window_strides=(1, 1), padding="SAME",
        dimension_numbers=("NCHW", "OIHW", "NCHW"))
    inv = jax.lax.rsqrt(var + BN_EPS)
    y = (y - mean[None, :, None, None]) * inv[None, :, None, None] \
        * gamma[None, :, None, None] + beta[None, :, None, None]
    y = jnp.maximum(y, 0.0)
    y = jax.lax.conv_general_dilated(
        y, w2, window_strides=(1, 1), padding="VALID",
        dimension_numbers=("NCHW", "OIHW", "NCHW"))
    return y + b2[None, :, None, None]


def make_params(key, in_channels, out_channels):
    inter = in_channels // 4
    k = jax.random.split(key, 6)
    w1 = jax.random.normal(k[0], (inter, in_channels, 3, 3), jnp.float32) \
        * (2.0 / (in_channels * 9)) ** 0.5
    gamma = 1.0 + 0.1 * jax.random.normal(k[1], (inter,), jnp.float32)
    beta = 0.1 * jax.random.normal(k[2], (inter,), jnp.float32)
    mean = 0.05 * jax.random.normal(k[3], (inter,), jnp.float32)
    var = 1.0 + 0.1 * jax.random.uniform(k[4], (inter,), jnp.float32)
    w2 = jax.random.normal(k[5], (out_channels, inter, 1, 1), jnp.float32) \
        * (2.0 / inter) ** 0.5
    b2 = jnp.linspace(-0.1, 0.1, out_channels, dtype=jnp.float32)
    return (w1, gamma, beta, mean, var, w2, b2)


if __name__ == "__main__":
    N, Cin, H, W = 2, 16, 16, 16   # inter_channels = Cin // 4 = 4
    Cout = 8

    key = jax.random.PRNGKey(0)
    kx, kp = jax.random.split(key)
    x = jax.random.normal(kx, (N, Cin, H, W), jnp.float32)
    params = make_params(kp, Cin, Cout)

    out = jax.block_until_ready(dfcn_head(x, params))
    ref = jax.block_until_ready(_reference(x, params))

    assert out.shape == (N, Cout, H, W), out.shape
    max_err = float(jnp.max(jnp.abs(out - ref)))
    # bf16 MXU inputs with f32 accumulation -> slightly relaxed tolerance vs f32 ref.
    assert jnp.allclose(out, ref, atol=5e-2, rtol=5e-2), max_err

    print("KERNEL_OK")
</pallas_src>

<mosaic_0001>
module attributes {stable_mosaic.version = 11 : i64} {
  func.func @_dfcn_head_kernel(%arg0: i32, %arg1: memref<1x18x18x16xbf16, #tpu.memory_space<vmem>>, %arg2: memref<9x16x4xbf16, #tpu.memory_space<vmem>>, %arg3: memref<1x4xf32, #tpu.memory_space<vmem>>, %arg4: memref<8x4xbf16, #tpu.memory_space<vmem>>, %arg5: memref<8x1xf32, #tpu.memory_space<vmem>>, %arg6: memref<1x8x256xf32, #tpu.memory_space<vmem>>, %arg7: memref<256x4xf32, #tpu.memory_space<vmem>>) attributes {dimension_semantics = [#tpu.dimension_semantics<parallel>], iteration_bounds = array<i64: 2>, scalar_prefetch = 0 : i64, scratch_operands = 1 : i64, tpu.core_type = #tpu.core_type<tc>, window_params = [{transform_indices = @transform_0, window_bounds = array<i64: 1, 18, 18, 16>}, {pipeline_mode = #tpu.pipeline_mode<synchronous>, transform_indices = @transform_1, window_bounds = array<i64: 9, 16, 4>}, {pipeline_mode = #tpu.pipeline_mode<synchronous>, transform_indices = @transform_2, window_bounds = array<i64: 1, 4>}, {pipeline_mode = #tpu.pipeline_mode<synchronous>, transform_indices = @transform_3, window_bounds = array<i64: 8, 4>}, {pipeline_mode = #tpu.pipeline_mode<synchronous>, transform_indices = @transform_4, window_bounds = array<i64: 8, 1>}, {transform_indices = @transform_5, window_bounds = array<i64: 1, 8, 256>}]} {
    %c0 = arith.constant 0 : index
    %c0_0 = arith.constant 0 : index
    %c0_1 = arith.constant 0 : index
    %c0_2 = arith.constant 0 : index
    %0 = vector.load %arg1[%c0, %c0_0, %c0_1, %c0_2] : memref<1x18x18x16xbf16, #tpu.memory_space<vmem>>, vector<1x18x18x16xbf16>
    %1 = vector.shape_cast %0 : vector<1x18x18x16xbf16> to vector<18x18x16xbf16>
    %c0_3 = arith.constant 0 : index
    %c0_4 = arith.constant 0 : index
    %2 = vector.load %arg3[%c0_3, %c0_4] : memref<1x4xf32, #tpu.memory_space<vmem>>, vector<1x4xf32>
    %3 = vector.shape_cast %2 : vector<1x4xf32> to vector<1x4xf32>
    %4 = vector.broadcast %3 : vector<1x4xf32> to vector<256x4xf32>
    %c0_5 = arith.constant 0 : index
    %c0_6 = arith.constant 0 : index
    %5 = vector.load %arg7[%c0_5, %c0_6] : memref<256x4xf32, #tpu.memory_space<vmem>>, vector<256x4xf32>
    tpu.vector_store %arg7[%c0_5, %c0_6], %4 {strides = array<i32>} : memref<256x4xf32, #tpu.memory_space<vmem>>, vector<256x4xf32>,
    %6 = vector.extract_strided_slice %1 {offsets = [0, 0, 0], sizes = [16, 16, 16], strides = [1, 1, 1]} : vector<18x18x16xbf16> to vector<16x16x16xbf16>
    %7 = vector.shape_cast %6 : vector<16x16x16xbf16> to vector<256x16xbf16>
    %c0_7 = arith.constant 0 : index
    %c0_8 = arith.constant 0 : index
    %8 = vector.load %arg7[%c0_7, %c0_8] : memref<256x4xf32, #tpu.memory_space<vmem>>, vector<256x4xf32>
    %c0_9 = arith.constant 0 : index
    %c0_10 = arith.constant 0 : index
    %c0_11 = arith.constant 0 : index
    %9 = vector.load %arg2[%c0_9, %c0_10, %c0_11] : memref<9x16x4xbf16, #tpu.memory_space<vmem>>, vector<1x16x4xbf16>
    %10 = vector.shape_cast %9 : vector<1x16x4xbf16> to vector<16x4xbf16>
    %cst = arith.constant dense<0.000000e+00> : vector<256x4xf32>
    %11 = tpu.matmul %7, %10, %cst {dimension_numbers = #tpu.dot_dimension_numbers<[1], [0], [0], [1], [0, 0, 1, 1], [], []>} : vector<256x16xbf16>, vector<16x4xbf16>, vector<256x4xf32> -> vector<256x4xf32>
    %12 = arith.addf %8, %11 : vector<256x4xf32>
    %c0_12 = arith.constant 0 : index
    %c0_13 = arith.constant 0 : index
    %13 = vector.load %arg7[%c0_12, %c0_13] : memref<256x4xf32, #tpu.memory_space<vmem>>, vector<256x4xf32>
    tpu.vector_store %arg7[%c0_12, %c0_13], %12 {strides = array<i32>} : memref<256x4xf32, #tpu.memory_space<vmem>>, vector<256x4xf32>,
    %14 = vector.extract_strided_slice %1 {offsets = [0, 1, 0], sizes = [16, 16, 16], strides = [1, 1, 1]} : vector<18x18x16xbf16> to vector<16x16x16xbf16>
    %15 = vector.shape_cast %14 : vector<16x16x16xbf16> to vector<256x16xbf16>
    %c0_14 = arith.constant 0 : index
    %c0_15 = arith.constant 0 : index
    %16 = vector.load %arg7[%c0_14, %c0_15] : memref<256x4xf32, #tpu.memory_space<vmem>>, vector<256x4xf32>
    %c1 = arith.constant 1 : index
    %c0_16 = arith.constant 0 : index
    %c0_17 = arith.constant 0 : index
    %17 = vector.load %arg2[%c1, %c0_16, %c0_17] : memref<9x16x4xbf16, #tpu.memory_space<vmem>>, vector<1x16x4xbf16>
    %18 = vector.shape_cast %17 : vector<1x16x4xbf16> to vector<16x4xbf16>
    %cst_18 = arith.constant dense<0.000000e+00> : vector<256x4xf32>
    %19 = tpu.matmul %15, %18, %cst_18 {dimension_numbers = #tpu.dot_dimension_numbers<[1], [0], [0], [1], [0, 0, 1, 1], [], []>} : vector<256x16xbf16>, vector<16x4xbf16>, vector<256x4xf32> -> vector<256x4xf32>
    %20 = arith.addf %16, %19 : vector<256x4xf32>
    %c0_19 = arith.constant 0 : index
    %c0_20 = arith.constant 0 : index
    %21 = vector.load %arg7[%c0_19, %c0_20] : memref<256x4xf32, #tpu.memory_space<vmem>>, vector<256x4xf32>
    tpu.vector_store %arg7[%c0_19, %c0_20], %20 {strides = array<i32>} : memref<256x4xf32, #tpu.memory_space<vmem>>, vector<256x4xf32>,
    %22 = vector.extract_strided_slice %1 {offsets = [0, 2, 0], sizes = [16, 16, 16], strides = [1, 1, 1]} : vector<18x18x16xbf16> to vector<16x16x16xbf16>
    %23 = vector.shape_cast %22 : vector<16x16x16xbf16> to vector<256x16xbf16>
    %c0_21 = arith.constant 0 : index
    %c0_22 = arith.constant 0 : index
    %24 = vector.load %arg7[%c0_21, %c0_22] : memref<256x4xf32, #tpu.memory_space<vmem>>, vector<256x4xf32>
    %c2 = arith.constant 2 : index
    %c0_23 = arith.constant 0 : index
    %c0_24 = arith.constant 0 : index
    %25 = vector.load %arg2[%c2, %c0_23, %c0_24] : memref<9x16x4xbf16, #tpu.memory_space<vmem>>, vector<1x16x4xbf16>
    %26 = vector.shape_cast %25 : vector<1x16x4xbf16> to vector<16x4xbf16>
    %cst_25 = arith.constant dense<0.000000e+00> : vector<256x4xf32>
    %27 = tpu.matmul %23, %26, %cst_25 {dimension_numbers = #tpu.dot_dimension_numbers<[1], [0], [0], [1], [0, 0, 1, 1], [], []>} : vector<256x16xbf16>, vector<16x4xbf16>, vector<256x4xf32> -> vector<256x4xf32>
    %28 = arith.addf %24, %27 : vector<256x4xf32>
    %c0_26 = arith.constant 0 : index
    %c0_27 = arith.constant 0 : index
    %29 = vector.load %arg7[%c0_26, %c0_27] : memref<256x4xf32, #tpu.memory_space<vmem>>, vector<256x4xf32>
    tpu.vector_store %arg7[%c0_26, %c0_27], %28 {strides = array<i32>} : memref<256x4xf32, #tpu.memory_space<vmem>>, vector<256x4xf32>,
    %30 = vector.extract_strided_slice %1 {offsets = [1, 0, 0], sizes = [16, 16, 16], strides = [1, 1, 1]} : vector<18x18x16xbf16> to vector<16x16x16xbf16>
    %31 = vector.shape_cast %30 : vector<16x16x16xbf16> to vector<256x16xbf16>
    %c0_28 = arith.constant 0 : index
    %c0_29 = arith.constant 0 : index
    %32 = vector.load %arg7[%c0_28, %c0_29] : memref<256x4xf32, #tpu.memory_space<vmem>>, vector<256x4xf32>
    %c3 = arith.constant 3 : index
    %c0_30 = arith.constant 0 : index
    %c0_31 = arith.constant 0 : index
    %33 = vector.load %arg2[%c3, %c0_30, %c0_31] : memref<9x16x4xbf16, #tpu.memory_space<vmem>>, vector<1x16x4xbf16>
    %34 = vector.shape_cast %33 : vector<1x16x4xbf16> to vector<16x4xbf16>
    %cst_32 = arith.constant dense<0.000000e+00> : vector<256x4xf32>
    %35 = tpu.matmul %31, %34, %cst_32 {dimension_numbers = #tpu.dot_dimension_numbers<[1], [0], [0], [1], [0, 0, 1, 1], [], []>} : vector<256x16xbf16>, vector<16x4xbf16>, vector<256x4xf32> -> vector<256x4xf32>
    %36 = arith.addf %32, %35 : vector<256x4xf32>
    %c0_33 = arith.constant 0 : index
    %c0_34 = arith.constant 0 : index
    %37 = vector.load %arg7[%c0_33, %c0_34] : memref<256x4xf32, #tpu.memory_space<vmem>>, vector<256x4xf32>
    tpu.vector_store %arg7[%c0_33, %c0_34], %36 {strides = array<i32>} : memref<256x4xf32, #tpu.memory_space<vmem>>, vector<256x4xf32>,
    %38 = vector.extract_strided_slice %1 {offsets = [1, 1, 0], sizes = [16, 16, 16], strides = [1, 1, 1]} : vector<18x18x16xbf16> to vector<16x16x16xbf16>
    %39 = vector.shape_cast %38 : vector<16x16x16xbf16> to vector<256x16xbf16>
    %c0_35 = arith.constant 0 : index
    %c0_36 = arith.constant 0 : index
    %40 = vector.load %arg7[%c0_35, %c0_36] : memref<256x4xf32, #tpu.memory_space<vmem>>, vector<256x4xf32>
    %c4 = arith.constant 4 : index
    %c0_37 = arith.constant 0 : index
    %c0_38 = arith.constant 0 : index
    %41 = vector.load %arg2[%c4, %c0_37, %c0_38] : memref<9x16x4xbf16, #tpu.memory_space<vmem>>, vector<1x16x4xbf16>
    %42 = vector.shape_cast %41 : vector<1x16x4xbf16> to vector<16x4xbf16>
    %cst_39 = arith.constant dense<0.000000e+00> : vector<256x4xf32>
    %43 = tpu.matmul %39, %42, %cst_39 {dimension_numbers = #tpu.dot_dimension_numbers<[1], [0], [0], [1], [0, 0, 1, 1], [], []>} : vector<256x16xbf16>, vector<16x4xbf16>, vector<256x4xf32> -> vector<256x4xf32>
    %44 = arith.addf %40, %43 : vector<256x4xf32>
    %c0_40 = arith.constant 0 : index
    %c0_41 = arith.constant 0 : index
    %45 = vector.load %arg7[%c0_40, %c0_41] : memref<256x4xf32, #tpu.memory_space<vmem>>, vector<256x4xf32>
    tpu.vector_store %arg7[%c0_40, %c0_41], %44 {strides = array<i32>} : memref<256x4xf32, #tpu.memory_space<vmem>>, vector<256x4xf32>,
    %46 = vector.extract_strided_slice %1 {offsets = [1, 2, 0], sizes = [16, 16, 16], strides = [1, 1, 1]} : vector<18x18x16xbf16> to vector<16x16x16xbf16>
    %47 = vector.shape_cast %46 : vector<16x16x16xbf16> to vector<256x16xbf16>
    %c0_42 = arith.constant 0 : index
    %c0_43 = arith.constant 0 : index
    %48 = vector.load %arg7[%c0_42, %c0_43] : memref<256x4xf32, #tpu.memory_space<vmem>>, vector<256x4xf32>
    %c5 = arith.constant 5 : index
    %c0_44 = arith.constant 0 : index
    %c0_45 = arith.constant 0 : index
    %49 = vector.load %arg2[%c5, %c0_44, %c0_45] : memref<9x16x4xbf16, #tpu.memory_space<vmem>>, vector<1x16x4xbf16>
    %50 = vector.shape_cast %49 : vector<1x16x4xbf16> to vector<16x4xbf16>
    %cst_46 = arith.constant dense<0.000000e+00> : vector<256x4xf32>
    %51 = tpu.matmul %47, %50, %cst_46 {dimension_numbers = #tpu.dot_dimension_numbers<[1], [0], [0], [1], [0, 0, 1, 1], [], []>} : vector<256x16xbf16>, vector<16x4xbf16>, vector<256x4xf32> -> vector<256x4xf32>
    %52 = arith.addf %48, %51 : vector<256x4xf32>
    %c0_47 = arith.constant 0 : index
    %c0_48 = arith.constant 0 : index
    %53 = vector.load %arg7[%c0_47, %c0_48] : memref<256x4xf32, #tpu.memory_space<vmem>>, vector<256x4xf32>
    tpu.vector_store %arg7[%c0_47, %c0_48], %52 {strides = array<i32>} : memref<256x4xf32, #tpu.memory_space<vmem>>, vector<256x4xf32>,
    %54 = vector.extract_strided_slice %1 {offsets = [2, 0, 0], sizes = [16, 16, 16], strides = [1, 1, 1]} : vector<18x18x16xbf16> to vector<16x16x16xbf16>
    %55 = vector.shape_cast %54 : vector<16x16x16xbf16> to vector<256x16xbf16>
    %c0_49 = arith.constant 0 : index
    %c0_50 = arith.constant 0 : index
    %56 = vector.load %arg7[%c0_49, %c0_50] : memref<256x4xf32, #tpu.memory_space<vmem>>, vector<256x4xf32>
    %c6 = arith.constant 6 : index
    %c0_51 = arith.constant 0 : index
    %c0_52 = arith.constant 0 : index
    %57 = vector.load %arg2[%c6, %c0_51, %c0_52] : memref<9x16x4xbf16, #tpu.memory_space<vmem>>, vector<1x16x4xbf16>
    %58 = vector.shape_cast %57 : vector<1x16x4xbf16> to vector<16x4xbf16>
    %cst_53 = arith.constant dense<0.000000e+00> : vector<256x4xf32>
    %59 = tpu.matmul %55, %58, %cst_53 {dimension_numbers = #tpu.dot_dimension_numbers<[1], [0], [0], [1], [0, 0, 1, 1], [], []>} : vector<256x16xbf16>, vector<16x4xbf16>, vector<256x4xf32> -> vector<256x4xf32>
    %60 = arith.addf %56, %59 : vector<256x4xf32>
    %c0_54 = arith.constant 0 : index
    %c0_55 = arith.constant 0 : index
    %61 = vector.load %arg7[%c0_54, %c0_55] : memref<256x4xf32, #tpu.memory_space<vmem>>, vector<256x4xf32>
    tpu.vector_store %arg7[%c0_54, %c0_55], %60 {strides = array<i32>} : memref<256x4xf32, #tpu.memory_space<vmem>>, vector<256x4xf32>,
    %62 = vector.extract_strided_slice %1 {offsets = [2, 1, 0], sizes = [16, 16, 16], strides = [1, 1, 1]} : vector<18x18x16xbf16> to vector<16x16x16xbf16>
    %63 = vector.shape_cast %62 : vector<16x16x16xbf16> to vector<256x16xbf16>
    %c0_56 = arith.constant 0 : index
    %c0_57 = arith.constant 0 : index
    %64 = vector.load %arg7[%c0_56, %c0_57] : memref<256x4xf32, #tpu.memory_space<vmem>>, vector<256x4xf32>
    %c7 = arith.constant 7 : index
    %c0_58 = arith.constant 0 : index
    %c0_59 = arith.constant 0 : index
    %65 = vector.load %arg2[%c7, %c0_58, %c0_59] : memref<9x16x4xbf16, #tpu.memory_space<vmem>>, vector<1x16x4xbf16>
    %66 = vector.shape_cast %65 : vector<1x16x4xbf16> to vector<16x4xbf16>
    %cst_60 = arith.constant dense<0.000000e+00> : vector<256x4xf32>
    %67 = tpu.matmul %63, %66, %cst_60 {dimension_numbers = #tpu.dot_dimension_numbers<[1], [0], [0], [1], [0, 0, 1, 1], [], []>} : vector<256x16xbf16>, vector<16x4xbf16>, vector<256x4xf32> -> vector<256x4xf32>
    %68 = arith.addf %64, %67 : vector<256x4xf32>
    %c0_61 = arith.constant 0 : index
    %c0_62 = arith.constant 0 : index
    %69 = vector.load %arg7[%c0_61, %c0_62] : memref<256x4xf32, #tpu.memory_space<vmem>>, vector<256x4xf32>
    tpu.vector_store %arg7[%c0_61, %c0_62], %68 {strides = array<i32>} : memref<256x4xf32, #tpu.memory_space<vmem>>, vector<256x4xf32>,
    %70 = vector.extract_strided_slice %1 {offsets = [2, 2, 0], sizes = [16, 16, 16], strides = [1, 1, 1]} : vector<18x18x16xbf16> to vector<16x16x16xbf16>
    %71 = vector.shape_cast %70 : vector<16x16x16xbf16> to vector<256x16xbf16>
    %c0_63 = arith.constant 0 : index
    %c0_64 = arith.constant 0 : index
    %72 = vector.load %arg7[%c0_63, %c0_64] : memref<256x4xf32, #tpu.memory_space<vmem>>, vector<256x4xf32>
    %c8 = arith.constant 8 : index
    %c0_65 = arith.constant 0 : index
    %c0_66 = arith.constant 0 : index
    %73 = vector.load %arg2[%c8, %c0_65, %c0_66] : memref<9x16x4xbf16, #tpu.memory_space<vmem>>, vector<1x16x4xbf16>
    %74 = vector.shape_cast %73 : vector<1x16x4xbf16> to vector<16x4xbf16>
    %cst_67 = arith.constant dense<0.000000e+00> : vector<256x4xf32>
    %75 = tpu.matmul %71, %74, %cst_67 {dimension_numbers = #tpu.dot_dimension_numbers<[1], [0], [0], [1], [0, 0, 1, 1], [], []>} : vector<256x16xbf16>, vector<16x4xbf16>, vector<256x4xf32> -> vector<256x4xf32>
    %76 = arith.addf %72, %75 : vector<256x4xf32>
    %c0_68 = arith.constant 0 : index
    %c0_69 = arith.constant 0 : index
    %77 = vector.load %arg7[%c0_68, %c0_69] : memref<256x4xf32, #tpu.memory_space<vmem>>, vector<256x4xf32>
    tpu.vector_store %arg7[%c0_68, %c0_69], %76 {strides = array<i32>} : memref<256x4xf32, #tpu.memory_space<vmem>>, vector<256x4xf32>,
    %c0_70 = arith.constant 0 : index
    %c0_71 = arith.constant 0 : index
    %78 = vector.load %arg7[%c0_70, %c0_71] : memref<256x4xf32, #tpu.memory_space<vmem>>, vector<256x4xf32>
    %cst_72 = arith.constant 0.000000e+00 : f32
    %79 = vector.broadcast %cst_72 : f32 to vector<256x4xf32>
    %80 = arith.maximumf %78, %79 : vector<256x4xf32>
    %81 = arith.truncf %80 : vector<256x4xf32> to vector<256x4xbf16>
    %c0_73 = arith.constant 0 : index
    %c0_74 = arith.constant 0 : index
    %82 = vector.load %arg4[%c0_73, %c0_74] : memref<8x4xbf16, #tpu.memory_space<vmem>>, vector<8x4xbf16>
    %cst_75 = arith.constant dense<0.000000e+00> : vector<8x256xf32>
    %83 = tpu.matmul %82, %81, %cst_75 {dimension_numbers = #tpu.dot_dimension_numbers<[1], [1], [0], [0], [0, 0, 1, 0], [], []>} : vector<8x4xbf16>, vector<256x4xbf16>, vector<8x256xf32> -> vector<8x256xf32>
    %c0_76 = arith.constant 0 : index
    %c0_77 = arith.constant 0 : index
    %84 = vector.load %arg5[%c0_76, %c0_77] : memref<8x1xf32, #tpu.memory_space<vmem>>, vector<8x1xf32>
    %85 = vector.broadcast %84 : vector<8x1xf32> to vector<8x256xf32>
    %86 = arith.addf %83, %85 : vector<8x256xf32>
    %c0_78 = arith.constant 0 : index
    %c0_79 = arith.constant 0 : index
    %c0_80 = arith.constant 0 : index
    %87 = vector.load %arg6[%c0_78, %c0_79, %c0_80] : memref<1x8x256xf32, #tpu.memory_space<vmem>>, vector<1x8x256xf32>
    %88 = vector.shape_cast %87 : vector<1x8x256xf32> to vector<8x256xf32>
    %89 = vector.shape_cast %86 : vector<8x256xf32> to vector<1x8x256xf32>
    tpu.vector_store %arg6[%c0_78, %c0_79, %c0_80], %89 {strides = array<i32>} : memref<1x8x256xf32, #tpu.memory_space<vmem>>, vector<1x8x256xf32>,
    return
  }
  func.func @transform_0(%arg0: i32) -> (i32, i32, i32, i32) {
    %c0_i32 = arith.constant 0 : i32
    %c0_i32_0 = arith.constant 0 : i32
    %c0_i32_1 = arith.constant 0 : i32
    %c0_i32_2 = arith.constant 0 : i32
    return %arg0, %c0_i32, %c0_i32_0, %c0_i32_1 : i32, i32, i32, i32
  }
  func.func @transform_1(%arg0: i32) -> (i32, i32, i32) {
    %c0_i32 = arith.constant 0 : i32
    %c0_i32_0 = arith.constant 0 : i32
    %c0_i32_1 = arith.constant 0 : i32
    %c0_i32_2 = arith.constant 0 : i32
    return %c0_i32, %c0_i32_0, %c0_i32_1 : i32, i32, i32
  }
  func.func @transform_2(%arg0: i32) -> (i32, i32) {
    %c0_i32 = arith.constant 0 : i32
    %c0_i32_0 = arith.constant 0 : i32
    %c0_i32_1 = arith.constant 0 : i32
    return %c0_i32, %c0_i32_0 : i32, i32
  }
  func.func @transform_3(%arg0: i32) -> (i32, i32) {
    %c0_i32 = arith.constant 0 : i32
    %c0_i32_0 = arith.constant 0 : i32
    %c0_i32_1 = arith.constant 0 : i32
    return %c0_i32, %c0_i32_0 : i32, i32
  }
  func.func @transform_4(%arg0: i32) -> (i32, i32) {
    %c0_i32 = arith.constant 0 : i32
    %c0_i32_0 = arith.constant 0 : i32
    %c0_i32_1 = arith.constant 0 : i32
    return %c0_i32, %c0_i32_0 : i32, i32
  }
  func.func @transform_5(%arg0: i32) -> (i32, i32, i32) {
    %c0_i32 = arith.constant 0 : i32
    %c0_i32_0 = arith.constant 0 : i32
    %c0_i32_1 = arith.constant 0 : i32
    return %arg0, %c0_i32, %c0_i32_0 : i32, i32, i32
  }
}

</mosaic_0001>

<bundles_post_ra>
// kernel: tpu_custom_call.1
= control target key start
LH: loop header
LB: loop body
LE: loop exit
PB: predicated region body
PF: predicated region fallthrough
CT: control target
= control target key end

     0   :  { %10 = vsyncpa [#allocation4], 0  ;;  %s6348_s0 = inlined_call_operand.vmem [shape: bf16[2,18,18,16], index: 0, kind: input, shape index: {}]   ;;  %s6349_s1 = inlined_call_operand.vmem [shape: bf16[9,16,4], index: 1, kind: input, shape index: {}]   ;;  %s6350_s2 = inlined_call_operand.vmem [shape: f32[1,4], index: 2, kind: input, shape index: {}]   ;;  %s6351_s3 = inlined_call_operand.vmem [shape: bf16[8,4], index: 3, kind: input, shape index: {}]   ;;  %s6352_s4 = inlined_call_operand.vmem [shape: f32[8,1], index: 4, kind: input, shape index: {}]   ;;  %s6353_s5 = inlined_call_operand.hbm [shape: f32[2,8,256], index: 5, kind: output, shape index: {}]  }
   0x1   :  { %12 = vsyncpa [#allocation4 + $0x1], 0  ;;  %s4814_s18 = smov 0   ;;  %s4816_s19 = smov 0  }
   0x2   :  { %s4818_s20 = smov 0   ;;  %s4820_s21 = smov 0  }
   0x3 LB: > { %s4835_s22 = sadd.s32 4294967295, %s4780_s21   ;;  %s3909_s23 = sadd.s32 4294967294, %s4780_s21   ;;  %s4780_s21 = sphi %s4820_s21, %s6484_s21   ;;  %s4776_s20 = sphi %s4818_s20, %s6483_s20   ;;  %s4772_s19 = sphi %s4816_s19, %s6482_s19   ;;  %s4768_s18 = sphi %s4814_s18, %s6481_s18  }
   0x4   : > { %s4839_s24 = sadd.s32 1, %s4780_s21   ;;  %s135_s25 = sadd.s32 1, %s4776_s20 }
   0x5   : > { %s132_s26 = ssub.s32 %s4780_s21, %s4839_s24  ;;  %p145_p0 = scmp.ne.s32.totalorder %s4776_s20, %s4772_s19 }
   0x6   : > { %p133_p1 = scmp.eq.s32.totalorder %s132_s26, 0  ;;  %p146_p2 = scmp.eq.s32.totalorder %s4835_s22, 1 }
   0x7   : > { %p151_p3 = scmp.ne.s32.totalorder %s4772_s19, %s4768_s18  ;;  %p152_p4 = scmp.eq.s32.totalorder %s3909_s23, 1 }
   0x8   : > { %s4850_s27 = scalar_select %p133_p1, %s4776_s20, %s135_s25  }
   0x9   : > { %p4852_p5 = por %p146_p2, %p145_p0  ;;  %p4856_p6 = por %p152_p4, %p151_p3 }
   0xa   : > { %p3912_p7 = scmp.ge.s32.totalorder %s4780_s21, 1  ;;  %p190_p8 = scmp.lt.s32.totalorder %s4780_s21, 3 }
   0xc   : > { %p191_p9 = pnand %p3912_p7, %p190_p8 }
   0xe   : > { %194 = sbr.rel (%p191_p9) target bundleno = 822 (0x336), region = 40 }
  0x13   : > { %v4693_v0 = vld [vmem:[%s6349_s1] sm:$0xff]   ;;  %p218_p10 = scmp.lt.s32.totalorder %s4835_s22, 1  ;;  %v4869_v1 = vld [vmem:[%s6349_s1 + $0x10] sm:$0xff]   ;;  %v4875_v2 = vld [vmem:[%s6349_s1 + $0x8] sm:$0xff]   ;;  %vm438_vm0 = vcmask 130048   ;;  %vm1477_vm3 = vcmask 1042432  }
  0x14   : > { %4335 = vmatprep.subr.bf16.mxu0 %v4693_v0  ;;  %4641 = vmatprep.subr.bf16.mxu1 %v4693_v0  ;;  %vm712_vm1 = vsmask.f32 3328  ;;  %vm713_vm2 = vsmask.f32 7440  ;;  %vm1478_vm4 = vcmask 1046532   ;;  %v4960_v41 = vld [vmem:[%s6349_s1 + $0x20] sm:$0xff]  }
  0x15   : > { %s219_s9 = scalar_select %p218_p10, %s4835_s22, 1  ;;  %4336 = vmatpush3.bf16.msra.mxu0 %v4693_v0  ;;  %4642 = vmatpush3.bf16.msra.mxu1 %v4693_v0  ;;  %v4984_v52 = vld [vmem:[%s6349_s1 + $0x18] sm:$0xff]   ;;  %vm5068_vm5 = vmor %vm712_vm1, %vm713_vm2  ;;  %vm285_vm7 = vcmask 31744  }
  0x16   : > { %4403 = vmatprep.subr.bf16.mxu0 %v4869_v1  ;;  %4369 = vmatprep.subr.bf16.mxu1 %v4875_v2  ;;  %vm5095_vm6 = vmor %vm1477_vm3, %vm1478_vm4  ;;  %s215_s23 = sand.u32 1, %s4772_s19   ;;  %s4163_s26 = sshll.u32 %s4835_s22, 8 }
  0x17   : > { %s4651_s12 = smul.u32 216, %s219_s9  ;;  %s3913_s25 = sshll.u32 %s215_s23, 4 }
  0x18   : > { %s217_s30 = scalar_lea.vmem [#allocation3], %s3913_s25  ;;  %s6307_s9 = scalar_lea.hbm %s6353_s5, %s4163_s26 }
  0x19   : > { %s4882_s15 = scalar_lea.vmem %s6348_s0, %s4651_s12  ;;  %s3850_s6 = sshll.u32 %s217_s30, 4  ;;  %s6309_s6 = int_to_ptr.vmem [resolvable:$true] %s3850_s6 }
  0x1a   : > { %v4885_v3 = vld [vmem:[%s4882_s15] sm:$0xf]  ;;  %v4888_v4 = vld [vmem:[%s4882_s15 + $0x4] sm:$0xf]  ;;  %v4891_v5 = vld [vmem:[%s4882_s15 + $0x78] sm:$0xf] }
  0x1b   : > { %6393 = vst [vmem:[#allocation6_spill] sm:$0xff] %v4891_v5  ;;  %v3916_v6 = vcombine.low %v4885_v3, %v4888_v4  ;;  %v716_v7 = vshrl.u32 %v4885_v3, 16  ;;  %v719_v8 = vshll.u32 %v4885_v3, 16  ;;  %v725_v9 = vshll.u32 %v4888_v4, 16  ;;  %v4899_v10 = vld [vmem:[%s4882_s15 + $0x7c] sm:$0xf] }
  0x1c   : > { %6394 = vst [vmem:[#allocation7_spill] sm:$0xff] %v4899_v10  ;;  %v729_v11 = vshrl.u32 %v4888_v4, 16  ;;  %v3984_v12 = vrot.slane %v4885_v3, 9  ;;  %v1482_v13 = vrot.slane %v4888_v4, 5  ;;  %v4906_v14 = vcombine.low %v4891_v5, %v4899_v10  ;;  %v4909_v15 = vld [vmem:[%s4882_s15 + $0xc] sm:$0xf] }
  0x1d   : > { %4337 = vmatprep.mubr.msk.bf16.mxu0 %vm438_vm0, %v3916_v6  ;;  %v718_v16 = vrot.slane %v716_v7, 4  ;;  %v721_v17 = vrot.slane %v719_v8, 5  ;;  %v4912_v18 = vrot.slane %v725_v9, 5  ;;  %v956_v19 = vshrl.u32 %v4891_v5, 16  ;;  %v4916_v20 = vld [vmem:[%s4882_s15 + $0x10] sm:$0xf] }
  0x1e   : > { %6395 = vst [vmem:[#allocation8_spill] sm:$0xff] %v4906_v14  ;;  %v731_v21 = vrot.slane %v729_v11, 4  ;;  %v4920_v22 = vrot.slane %v1482_v13, 4  ;;  %4357 = vmatprep.mubr.msk.bf16.mxu1 %vm438_vm0, %v4906_v14  ;;  %v959_v23 = vshll.u32 %v4891_v5, 16  ;;  %v965_v24 = vshll.u32 %v4899_v10, 16  ;;  %s3836_s22 = scalar_lea.sflag [#allocation4], %s215_s23 }
  0x1f   : > { %v4927_v25 = vld [vmem:[%s4882_s15 + $0x84] sm:$0xf]  ;;  %v722_v26 = vor.u32 %v721_v17, %v718_v16  ;;  %v4929_v27 = vrot.slane %v956_v19, 4  ;;  %v969_v28 = vshrl.u32 %v4899_v10, 16  ;;  %v4934_v30 = vld [vmem:[%s4882_s15 + $0x88] sm:$0xf]  ;;  %v4951_v38 = vcombine.low %v4909_v15, %v4916_v20 }
  0x20   : > { %v732_v31 = vor.u32 %v731_v21, %v4912_v18  ;;  %v4937_v32 = vrot.slane %v959_v23, 5  ;;  %v4939_v33 = vrot.slane %v965_v24, 5  ;;  %v4943_v35 = vld [vmem:[%s4882_s15 + $0x18] sm:$0xf]  ;;  %v740_v39 = vshrl.u32 %v4909_v15, 16  ;;  %s4720_s10 = scalar_lea.vmem %s6309_s6, 256 }
  0x21   : > { %v4945_v36 = vrot.slane %v722_v26, 4  ;;  %v4947_v37 = vrot.slane %v969_v28, 4  ;;  %6396 = vst [vmem:[#allocation9_spill] sm:$0xff] %v4951_v38  ;;  %v4955_v40 = vld [vmem:[%s4882_s15 + $0x1c] sm:$0xf]  ;;  %v743_v43 = vshll.u32 %v4909_v15, 16  ;;  %4338 = vmatmul.mubr.msk.bf16.vlgmr.msra.gmra.mxu0 %vm438_vm0, %v4951_v38  ;;  %v4976_v50 = vcombine.low %v4927_v25, %v4934_v30  ;;  %p4721_p11 = scmp.ne.s32.totalorder %s6309_s6, %s4720_s10 }
  0x22   : > { %v4962_v42 = vrot.slane %v732_v31, 4  ;;  %v749_v44 = vshll.u32 %v4916_v20, 16  ;;  %v753_v45 = vshrl.u32 %v4916_v20, 16  ;;  %v4968_v46 = vld [vmem:[%s4882_s15 + $0x90] sm:$0xf]  ;;  %v742_v47 = vrot.slane %v740_v39, 4  ;;  %4404 = vmatpush3.bf16.msra.mxu0 %v4869_v1 }
  0x23   : > { %v3985_v48 = vrot.slane %v4909_v15, 9  ;;  %v1489_v49 = vrot.slane %v4916_v20, 5  ;;  %6397 = vst [vmem:[#allocation10_spill] sm:$0xff] %v4976_v50  ;;  %v4979_v51 = vld [vmem:[%s4882_s15 + $0x94] sm:$0xf]  ;;  %v745_v53 = vrot.slane %v743_v43, 5  ;;  %4358 = vmatmul.mubr.msk.bf16.vlgmr.msra.gmra.mxu1 %vm438_vm0, %v4976_v50  ;;  %v5003_v61 = vcombine.low %v4943_v35, %v4955_v40  ;;  %4471 = vmatprep.subr.bf16.mxu0 %v4960_v41  ;;  %p4722_p12 = pnand %p4721_p11, %p4852_p5 }
  0x24   : > { %v4986_v54 = vrot.slane %v749_v44, 5  ;;  %v755_v55 = vrot.slane %v753_v45, 4  ;;  %v4991_v57 = vld [vmem:[%s4882_s15 + $0x24] sm:$0xf]  ;;  %v5006_v62 = vld [vmem:[%s4882_s15 + $0x28] sm:$0xf]  ;;  %4370 = vmatpush3.bf16.msra.mxu1 %v4875_v2  ;;  %v5024_v11 = vcombine.low %v4968_v46, %v4979_v51  ;;  %v728_v34 = vsel %vm5068_vm5, %v4945_v36, %v4912_v18 }
  0x25   : > { %v4995_v58 = vrot.slane %v1489_v49, 4  ;;  %6398 = vst [vmem:[#allocation11_spill] sm:$0xff] %v5003_v61  ;;  %v746_v63 = vor.u32 %v745_v53, %v742_v47  ;;  %v5014_v7 = vld [vmem:[%s4882_s15 + $0x9c] sm:$0xf]  ;;  %v5017_v8 = vld [vmem:[%s4882_s15 + $0xa0] sm:$0xf]  ;;  %4341 = vmatprep.mubr.msk.bf16.mxu0 %vm438_vm0, %v5003_v61  ;;  %4437 = vmatprep.subr.bf16.mxu1 %v4984_v52  ;;  %v5039_v24 = vcombine.low %v4991_v57, %v5006_v62  ;;  %p4723_p13 = pneg %p4722_p12 }
  0x26   : > { %v756_v0 = vor.u32 %v755_v55, %v4986_v54  ;;  %6399 = vst [vmem:[#allocation12_spill] sm:$0xff] %v5024_v11  ;;  %v5029_v19 = vld [vmem:[%s4882_s15 + $0x30] sm:$0xf]  ;;  %v5042_v26 = vld [vmem:[%s4882_s15 + $0x34] sm:$0xf]  ;;  %4361 = vmatprep.mubr.msk.bf16.mxu1 %vm438_vm0, %v5024_v11  ;;  %v5051_v43 = vcombine.low %v5014_v7, %v5017_v8  ;;  %v5147_v39 = vsel %vm5095_vm6, %v3984_v12, %v1482_v13  ;;  %v6416_v11 = vshrl.u32 %v4943_v35, 16 }
  0x27   : > { %v5032_v2 = vrot.slane %v746_v63, 4  ;;  %6400 = vst [vmem:[#allocation13_spill] sm:$0xff] %v5039_v24  ;;  %v5054_v44 = vld [vmem:[%s4882_s15 + $0xa8] sm:$0xf]  ;;  %v5061_v55 = vcombine.low %v5029_v19, %v5042_v26  ;;  %v5064_v63 = vld [vmem:[%s4882_s15 + $0xac] sm:$0xf]  ;;  %v5167_v3 = vsel %vm5095_vm6, %v3985_v48, %v1489_v49 }
  0x28   : > { %v5034_v21 = vrot.slane %v756_v0, 4  ;;  %6401 = vst [vmem:[#allocation14_spill] sm:$0xff] %v5051_v43  ;;  %6403 = vst [vmem:[#allocation16_spill] sm:$0xff] %v5064_v63  ;;  %v5079_v47 = vcombine.low %v5054_v44, %v5064_v63  ;;  %v5082_v45 = vld [vmem:[%s4882_s15 + $0x3c] sm:$0xf]  ;;  %v766_v50 = vrot.slane %v6416_v11, 4 }
  0x29   : > { %6402 = vst [vmem:[#allocation15_spill] sm:$0xff] %v5061_v55  ;;  %4342 = vmatmul.mubr.msk.bf16.gmra.mxu0 %vm438_vm0, %v5039_v24  ;;  %v5090_v60 = vld [vmem:[%s4882_s15 + $0x40] sm:$0xf]  ;;  %v5108_v53 = vld [vmem:[%s4882_s15 + $0xb4] sm:$0xf]  ;;  %v752_v23 = vsel %vm5068_vm5, %v5032_v2, %v4986_v54  ;;  %v6424_v61 = vshll.u32 %v5029_v19, 16 }
  0x2a   : > { %6406 = vst [vmem:[#allocation17_spill] sm:$0xff] %v5079_v47  ;;  %4345 = vmatprep.mubr.msk.bf16.mxu0 %vm438_vm0, %v5061_v55  ;;  %v5103_v17 = vcombine.low %v5082_v45, %v5090_v60  ;;  %6410 = vst [vmem:[#allocation19_spill] sm:$0xff] %v5108_v53  ;;  %v5111_v59 = vld [vmem:[%s4882_s15 + $0xb8] sm:$0xf]  ;;  %v5127_v31 = vld [vmem:[%s4882_s15 + $0x48] sm:$0xf] }
  0x2b   : > { %4362 = vmatmul.mubr.msk.bf16.gmra.mxu1 %vm438_vm0, %v5051_v43  ;;  %6411 = vst [vmem:[#allocation20_spill] sm:$0xff] %v5111_v59  ;;  %v5121_v29 = vcombine.low %v5108_v53, %v5111_v59  ;;  %v5130_v28 = vld [vmem:[%s4882_s15 + $0x4c] sm:$0xf]  ;;  %v5135_v9 = vld [vmem:[%s4882_s15 + $0x8] sm:$0x1]  ;;  %v797_v53 = vshll.u32 %v5006_v62, 16 }
  0x2c   : > { %6409 = vst [vmem:[#allocation18_spill] sm:$0xff] %v5103_v17  ;;  %4365 = vmatprep.mubr.msk.bf16.mxu1 %vm438_vm0, %v5079_v47  ;;  %v5151_v16 = vcombine.low %v5127_v31, %v5130_v28  ;;  %v735_v18 = vshll.u32 %v5135_v9, 16  ;;  %v5156_v6 = vld [vmem:[%s4882_s15 + $0x54] sm:$0xf]  ;;  %v5159_v54 = vld [vmem:[%s4882_s15 + $0x58] sm:$0xf] }
  0x2d   : > { %6412 = vst [vmem:[#allocation21_spill] sm:$0xff] %v5121_v29  ;;  %v5171_v4 = vcombine.low %v5156_v6, %v5159_v54  ;;  %v5177_v36 = vld [vmem:[%s4882_s15 + $0x14] sm:$0x1]  ;;  %v5181_v1 = vld [vmem:[%s4882_s15 + $0x60] sm:$0xf]  ;;  %v799_v5 = vrot.slane %v797_v53, 5 }
  0x2e   : > { %6413 = vst [vmem:[#allocation22_spill] sm:$0xff] %v5151_v16  ;;  %v737_v20 = vrot.slane %v735_v18, 5  ;;  %v759_v15 = vshll.u32 %v5177_v36, 16  ;;  %v5184_v48 = vld [vmem:[%s4882_s15 + $0x64] sm:$0xf]  ;;  %v6417_v18 = vshll.u32 %v4943_v35, 16 }
  0x2f   : > { %6414 = vst [vmem:[#allocation23_spill] sm:$0xff] %v5171_v4  ;;  %v5194_v2 = vcombine.low %v5181_v1, %v5184_v48  ;;  %v5200_v43 = vld [vmem:[%s4882_s15 + $0x20] sm:$0x1]  ;;  %v5212_v13 = vld [vmem:[%s4882_s15 + $0x6c] sm:$0xf]  ;;  %v821_v10 = vshll.u32 %v5042_v26, 16 }
  0x30   : > { %v738_v12 = vsel %vm5068_vm5, %v4962_v42, %v737_v20  ;;  %v761_v49 = vrot.slane %v759_v15, 5  ;;  %v769_v14 = vrot.slane %v6417_v18, 5  ;;  %v783_v42 = vshll.u32 %v5200_v43, 16  ;;  %v5221_v20 = vld [vmem:[%s4882_s15 + $0x70] sm:$0xf]  ;;  %v5262_v63 = vld [vmem:[%s6349_s1 + $0x28] sm:$0xff]  }
  0x31   : > { %4346 = vmatmul.mubr.msk.bf16.gmra.mxu0 %vm438_vm0, %v5103_v17  ;;  %6415 = vst [vmem:[#allocation24_spill] sm:$0xff] %v5194_v2  ;;  %v3951_v47 = vcombine.low %v728_v34, %v738_v12  ;;  %v6418_v17 = vshrl.u32 %v4955_v40, 16  ;;  %v5228_v18 = vcombine.low %v5212_v13, %v5221_v20  ;;  %v5232_v12 = vld [vmem:[%s4882_s15 + $0x2c] sm:$0x1]  ;;  %s4783_s11 = smov [#allocation3]  }
  0x32   : > { %4349 = vmatprep.mubr.msk.bf16.mxu0 %vm438_vm0, %v5151_v16  ;;  %v773_v16 = vshll.u32 %v4955_v40, 16  ;;  %v762_v11 = vsel %vm5068_vm5, %v5034_v21, %v761_v49  ;;  %v770_v15 = vor.u32 %v769_v14, %v766_v50  ;;  %v785_v24 = vrot.slane %v783_v42, 5  ;;  %v5248_v42 = vld [vmem:[%s4882_s15 + $0x38] sm:$0x1]  ;;  %s4724_s12 = sshll.u32 %s4783_s11, 4  ;;  %s4725_s12 = int_to_ptr.vmem [resolvable:$false] %s4724_s12 }
  0x33   : > { %4366 = vmatmul.mubr.msk.bf16.gmra.mxu1 %vm438_vm0, %v5121_v29  ;;  %v779_v55 = vrot.slane %v6418_v17, 4  ;;  %v5235_v17 = vcombine.low %v752_v23, %v762_v11  ;;  %v6420_v50 = vshrl.u32 %v4991_v57, 16  ;;  %v6421_v49 = vshll.u32 %v4991_v57, 16  ;;  %s4726_s13 = scalar_lea.vmem %s4725_s12, 512  ;;  %p4727_p0 = scmp.lt.s32.totalorder %s6309_s6, %s4725_s12 }
  0x34   : > { %4371 = vmatprep.mubr.msk.bf16.mxu1 %vm438_vm0, %v3951_v47  ;;  %v775_v29 = vrot.slane %v773_v16, 5  ;;  %v771_v38 = vrot.slane %v770_v15, 4  ;;  %v6422_v47 = vshrl.u32 %v5006_v62, 16  ;;  %v807_v16 = vshll.u32 %v5232_v12, 16  ;;  %p4728_p1 = scmp.lt.s32.totalorder %s4726_s13, %s4720_s10 }
  0x35   : > { %6419 = vst [vmem:[#allocation25_spill] sm:$0xff] %v5235_v17  ;;  %v790_v21 = vrot.slane %v6420_v50, 4  ;;  %v793_v59 = vrot.slane %v6421_v49, 5  ;;  %v6423_v14 = vshrl.u32 %v5029_v19, 16  ;;  %v817_v49 = vrot.slane %v6424_v61, 5 }
  0x36   : > { %v780_v34 = vor.u32 %v779_v55, %v775_v29  ;;  %v803_v23 = vrot.slane %v6422_v47, 4  ;;  %v776_v11 = vsel %vm5068_vm5, %v771_v38, %v775_v29  ;;  %v809_v47 = vrot.slane %v807_v16, 5  ;;  %p4729_p2 = por %p4728_p1, %p4727_p0 }
  0x37   : > { %v794_v15 = vor.u32 %v793_v59, %v790_v21  ;;  %v814_v50 = vrot.slane %v6423_v14, 4  ;;  %v6425_v59 = vshrl.u32 %v5042_v26, 16  ;;  %v823_v21 = vrot.slane %v821_v10, 5 }
  0x38   : > { %v781_v55 = vrot.slane %v780_v34, 4  ;;  %v831_v34 = vshll.u32 %v5248_v42, 16  ;;  %v804_v14 = vor.u32 %v803_v23, %v799_v5  ;;  %v1485_v16 = vrot.slane %v5135_v9, 5  ;;  %p4730_p3 = pnand %p4729_p2, %p4723_p13 }
  0x39   : > { %4350 = vmatmul.mubr.msk.bf16.gmra.mxu0 %vm438_vm0, %v5171_v4  ;;  %v795_v29 = vrot.slane %v794_v15, 4  ;;  %v818_v38 = vor.u32 %v817_v49, %v814_v50  ;;  %v827_v61 = vrot.slane %v6425_v59, 4  ;;  %v5280_v59 = vld [vmem:[%s4882_s15 + $0x44] sm:$0x1]  ;;  %v6426_v9 = vshrl.u32 %v5082_v45, 16 }
  0x3a   : > { %4353 = vmatprep.mubr.msk.bf16.mxu0 %vm438_vm0, %v5194_v2  ;;  %v786_v53 = vsel %vm5068_vm5, %v781_v55, %v785_v24  ;;  %v833_v49 = vrot.slane %v831_v34, 5  ;;  %v805_v2 = vrot.slane %v804_v14, 4  ;;  %v1486_v10 = vsel %vm5095_vm6, %v4920_v22, %v1485_v16 }
  0x3b   : > { %4372 = vmatmul.mubr.msk.bf16.vlgmr.msra.gmra.mxu1 %vm438_vm0, %v5235_v17  ;;  %v5274_v4 = vcombine.low %v776_v11, %v786_v53  ;;  %v800_v15 = vsel %vm5068_vm5, %v795_v29, %v799_v5  ;;  %v819_v50 = vrot.slane %v818_v38, 4  ;;  %v828_v17 = vor.u32 %v827_v61, %v823_v21  ;;  %v5302_v53 = vld [vmem:[%s4882_s15 + $0x50] sm:$0x1] }
  0x3c   : > { %4438 = vmatpush3.bf16.msra.mxu1 %v4984_v52  ;;  %v838_v24 = vrot.slane %v6426_v9, 4  ;;  %v4002_v52 = vcombine.low %v5147_v39, %v1486_v10  ;;  %v6427_v23 = vshll.u32 %v5082_v45, 16  ;;  %v845_v55 = vshll.u32 %v5090_v60, 16 }
  0x3d   : > { %4505 = vmatprep.subr.bf16.mxu1 %v5262_v63  ;;  %4375 = vmatprep.mubr.msk.bf16.mxu1 %vm438_vm0, %v5274_v4  ;;  %v824_v5 = vsel %vm5068_vm5, %v819_v50, %v823_v21  ;;  %v810_v22 = vsel %vm5068_vm5, %v805_v2, %v809_v47  ;;  %v829_v29 = vrot.slane %v828_v17, 4  ;;  %v6428_v38 = vshrl.u32 %v5090_v60, 16 }
  0x3e   : > { %v841_v11 = vrot.slane %v6427_v23, 5  ;;  %v855_v34 = vshll.u32 %v5280_v59, 16  ;;  %v5304_v14 = vcombine.low %v800_v15, %v810_v22  ;;  %v847_v39 = vrot.slane %v845_v55, 5 }
  0x3f   : > { %v851_v61 = vrot.slane %v6428_v38, 4  ;;  %v1492_v16 = vrot.slane %v5177_v36, 5  ;;  %v834_v2 = vsel %vm5068_vm5, %v829_v29, %v833_v49  ;;  %v6429_v47 = vshrl.u32 %v5127_v31, 16 }
  0x40   : > { %v842_v21 = vor.u32 %v841_v11, %v838_v24  ;;  %v857_v17 = vrot.slane %v855_v34, 5  ;;  %v6430_v10 = vshll.u32 %v5127_v31, 16  ;;  %v5315_v23 = vcombine.low %v824_v5, %v834_v2 }
  0x41   : > { %4354 = vmatmul.mubr.msk.bf16.gmra.mxu0 %vm438_vm0, %v5228_v18  ;;  %v862_v50 = vrot.slane %v6429_v47, 4  ;;  %v852_v24 = vor.u32 %v851_v61, %v847_v39  ;;  %v1493_v36 = vsel %vm5095_vm6, %v4995_v58, %v1492_v16  ;;  %v869_v55 = vshll.u32 %v5130_v28, 16  ;;  %v5340_v47 = vld [vmem:[%s4882_s15 + $0x5c] sm:$0x1] }
  0x42   : > { %v865_v9 = vrot.slane %v6430_v10, 5  ;;  %4405 = vmatprep.mubr.msk.bf16.mxu0 %vm438_vm0, %v4002_v52  ;;  %v843_v15 = vrot.slane %v842_v21, 4  ;;  %v5324_v49 = vcombine.low %v5167_v3, %v1493_v36  ;;  %v6431_v5 = vshrl.u32 %v5130_v28, 16 }
  0x43   : > { %4376 = vmatmul.mubr.msk.bf16.gmra.mxu1 %vm438_vm0, %v5304_v14  ;;  %v853_v58 = vrot.slane %v852_v24, 4  ;;  %v879_v29 = vshll.u32 %v5302_v53, 16  ;;  %v3986_v38 = vrot.slane %v4943_v35, 9  ;;  %v871_v3 = vrot.slane %v869_v55, 5 }
  0x44   : > { %v866_v11 = vor.u32 %v865_v9, %v862_v50  ;;  %v875_v22 = vrot.slane %v6431_v5, 4  ;;  %4379 = vmatprep.mubr.msk.bf16.mxu1 %vm438_vm0, %v5315_v23  ;;  %v848_v52 = vsel %vm5068_vm5, %v843_v15, %v847_v39  ;;  %v1496_v34 = vrot.slane %v4955_v40, 5 }
  0x45   : > { %v1499_v21 = vrot.slane %v5200_v43, 5  ;;  %v858_v16 = vsel %vm5068_vm5, %v853_v58, %v857_v17  ;;  %v881_v2 = vrot.slane %v879_v29, 5  ;;  %v6432_v50 = vshrl.u32 %v5156_v6, 16  ;;  %v5355_v17 = vld [vmem:[%s6349_s1 + $0x30] sm:$0xff]  }
  0x46   : > { %v867_v61 = vrot.slane %v866_v11, 4  ;;  %v6433_v10 = vshll.u32 %v5156_v6, 16  ;;  %v5346_v15 = vcombine.low %v848_v52, %v858_v16  ;;  %v876_v40 = vor.u32 %v875_v22, %v871_v3 }
  0x47   : > { %v886_v39 = vrot.slane %v6432_v50, 4  ;;  %v1497_v43 = vsel %vm5095_vm6, %v3986_v38, %v1496_v34  ;;  %v1498_v24 = vrot.slane %v1496_v34, 4  ;;  %v893_v11 = vshll.u32 %v5159_v54, 16 }
  0x48   : > { %v889_v9 = vrot.slane %v6433_v10, 5  ;;  %v872_v35 = vsel %vm5068_vm5, %v867_v61, %v871_v3  ;;  %v6434_v55 = vshrl.u32 %v5159_v54, 16  ;;  %v877_v22 = vrot.slane %v876_v40, 4 }
  0x49   : > { %4406 = vmatmul.mubr.msk.bf16.vlgmr.msra.gmra.mxu0 %vm438_vm0, %v5324_v49  ;;  %v903_v52 = vshll.u32 %v5340_v47, 16  ;;  %v3987_v58 = vrot.slane %v4991_v57, 9  ;;  %v1503_v29 = vrot.slane %v5006_v62, 5  ;;  %v1500_v38 = vsel %vm5095_vm6, %v1498_v24, %v1499_v21 }
  0x4a   : > { %v890_v36 = vor.u32 %v889_v9, %v886_v39  ;;  %v899_v5 = vrot.slane %v6434_v55, 4  ;;  %4472 = vmatpush3.bf16.msra.mxu0 %v4960_v41  ;;  %v895_v3 = vrot.slane %v893_v11, 5  ;;  %v1506_v34 = vrot.slane %v5232_v12, 5  ;;  %v5378_v41 = vld [vmem:[%s4882_s15 + $0x68] sm:$0x1] }
  0x4b   : > { %4380 = vmatmul.mubr.msk.bf16.gmra.mxu1 %vm438_vm0, %v5346_v15  ;;  %v882_v16 = vsel %vm5068_vm5, %v877_v22, %v881_v2  ;;  %v5373_v50 = vcombine.low %v1497_v43, %v1500_v38  ;;  %v905_v57 = vrot.slane %v903_v52, 5  ;;  %v1504_v62 = vsel %vm5095_vm6, %v3987_v58, %v1503_v29  ;;  %4539 = vmatprep.subr.bf16.mxu0 %v5355_v17 }
  0x4c   : > { %v891_v61 = vrot.slane %v890_v36, 4  ;;  %v5381_v21 = vcombine.low %v872_v35, %v882_v16  ;;  %v900_v39 = vor.u32 %v899_v5, %v895_v3  ;;  %v1505_v10 = vrot.slane %v1503_v29, 4 }
  0x4d   : > { %4409 = vmatprep.mubr.msk.bf16.mxu0 %vm438_vm0, %v5373_v50  ;;  %v6435_v2 = vshrl.u32 %v5181_v1, 16  ;;  %v6436_v40 = vshll.u32 %v5181_v1, 16  ;;  %v917_v24 = vshll.u32 %v5184_v48, 16  ;;  %v6437_v35 = vshrl.u32 %v5184_v48, 16 }
  0x4e   : > { %v896_v12 = vsel %vm5068_vm5, %v891_v61, %v895_v3  ;;  %4383 = vmatprep.mubr.msk.bf16.mxu1 %vm438_vm0, %v5381_v21  ;;  %v901_v11 = vrot.slane %v900_v39, 4  ;;  %v1507_v55 = vsel %vm5095_vm6, %v1505_v10, %v1506_v34  ;;  %v927_v5 = vshll.u32 %v5378_v41, 16  ;;  %v5407_v39 = vld [vmem:[%s4882_s15 + $0x74] sm:$0x1] }
  0x4f   : > { %v910_v9 = vrot.slane %v6435_v2, 4  ;;  %v913_v43 = vrot.slane %v6436_v40, 5  ;;  %v923_v36 = vrot.slane %v6437_v35, 4  ;;  %v3988_v22 = vrot.slane %v5029_v19, 9 }
  0x50   : > { %v5400_v52 = vcombine.low %v1504_v62, %v1507_v55  ;;  %v919_v29 = vrot.slane %v917_v24, 5  ;;  %v1510_v38 = vrot.slane %v5042_v26, 5  ;;  %v906_v61 = vsel %vm5068_vm5, %v901_v11, %v905_v57 }
  0x51   : > { %v914_v58 = vor.u32 %v913_v43, %v910_v9  ;;  %v929_v3 = vrot.slane %v927_v5, 5  ;;  %v1513_v16 = vrot.slane %v5248_v42, 5  ;;  %v6438_v34 = vshrl.u32 %v5212_v13, 16 }
  0x52   : > { %v5411_v2 = vcombine.low %v896_v12, %v906_v61  ;;  %4410 = vmatmul.mubr.msk.bf16.gmra.mxu0 %vm438_vm0, %v5400_v52  ;;  %v924_v62 = vor.u32 %v923_v36, %v919_v29  ;;  %v1511_v26 = vsel %vm5095_vm6, %v3988_v22, %v1510_v38  ;;  %v1512_v57 = vrot.slane %v1510_v38, 4  ;;  %v5432_v38 = vld [vmem:[%s4882_s15 + $0x80] sm:$0x1] }
  0x53   : > { %v934_v10 = vrot.slane %v6438_v34, 4  ;;  %v915_v19 = vrot.slane %v914_v58, 4  ;;  %v6439_v9 = vshll.u32 %v5212_v13, 16  ;;  %v941_v40 = vshll.u32 %v5221_v20, 16 }
  0x54   : > { %v6440_v43 = vshrl.u32 %v5221_v20, 16  ;;  %4384 = vmatmul.mubr.msk.bf16.gmra.mxu1 %vm438_vm0, %v5411_v2  ;;  %v925_v35 = vrot.slane %v924_v62, 4  ;;  %v951_v36 = vshll.u32 %v5407_v39, 16  ;;  %v3989_v11 = vrot.slane %v5082_v45, 9 }
  0x55   : > { %v937_v42 = vrot.slane %v6439_v9, 5  ;;  %v920_v12 = vsel %vm5068_vm5, %v915_v19, %v919_v29  ;;  %v1514_v55 = vsel %vm5095_vm6, %v1512_v57, %v1513_v16  ;;  %v943_v22 = vrot.slane %v941_v40, 5 }
  0x56   : > { %v947_v24 = vrot.slane %v6440_v43, 4  ;;  %v1517_v58 = vrot.slane %v5090_v60, 5  ;;  %v930_v61 = vsel %vm5068_vm5, %v925_v35, %v929_v3  ;;  %v5436_v34 = vcombine.low %v1511_v26, %v1514_v55 }
  0x57   : > { %v938_v5 = vor.u32 %v937_v42, %v934_v10  ;;  %v953_v29 = vrot.slane %v951_v36, 5  ;;  %v1520_v19 = vrot.slane %v5280_v59, 5  ;;  %v5439_v62 = vcombine.low %v920_v12, %v930_v61 }
  0x58   : > { %v948_v9 = vor.u32 %v947_v24, %v943_v22  ;;  %v1518_v16 = vsel %vm5095_vm6, %v3989_v11, %v1517_v58  ;;  %4413 = vmatprep.mubr.msk.bf16.mxu0 %vm438_vm0, %v5436_v34  ;;  %v1519_v60 = vrot.slane %v1517_v58, 4  ;;  %v6441_v10 = vor.u32 %v4937_v32, %v4929_v27 }
  0x59   : > { %v939_v45 = vrot.slane %v938_v5, 4  ;;  %v6442_v26 = vor.u32 %v4947_v37, %v4939_v33  ;;  %v975_v57 = vshll.u32 %v5432_v38, 16  ;;  %4387 = vmatprep.mubr.msk.bf16.mxu1 %vm438_vm0, %v5439_v62  ;;  %v3990_v43 = vrot.slane %v5127_v31, 9 }
  0x5a   : > { %v963_v3 = vrot.slane %v6441_v10, 4  ;;  %v949_v40 = vrot.slane %v948_v9, 4  ;;  %v1524_v24 = vrot.slane %v5130_v28, 5  ;;  %v1521_v27 = vsel %vm5095_vm6, %v1519_v60, %v1520_v19  ;;  %v5471_v28 = vld [vmem:[%s4882_s15 + $0x8c] sm:$0x1] }
  0x5b   : > { %v973_v59 = vrot.slane %v6442_v26, 4  ;;  %v944_v42 = vsel %vm5068_vm5, %v939_v45, %v943_v22  ;;  %v977_v37 = vrot.slane %v975_v57, 5  ;;  %v1527_v12 = vrot.slane %v5302_v53, 5 }
  0x5c   : > { %v968_v32 = vsel %vm5068_vm5, %v963_v3, %v4939_v33  ;;  %v954_v35 = vsel %vm5068_vm5, %v949_v40, %v953_v29  ;;  %v5466_v36 = vcombine.low %v1518_v16, %v1521_v27  ;;  %v1525_v31 = vsel %vm5095_vm6, %v3990_v43, %v1524_v24 }
  0x5d   : > { %v1526_v11 = vrot.slane %v1524_v24, 4  ;;  %v5473_v55 = vcombine.low %v944_v42, %v954_v35  ;;  %v978_v5 = vsel %vm5068_vm5, %v973_v59, %v977_v37  ;;  %v6443_v33 = vshrl.u32 %v4927_v25, 16  ;;  %v5501_v42 = vld [vmem:[%s4882_s15 + $0x98] sm:$0x1] }
  0x5e   : > { %v6444_v53 = vshll.u32 %v4927_v25, 16  ;;  %4414 = vmatmul.mubr.msk.bf16.gmra.mxu0 %vm438_vm0, %v5466_v36  ;;  %v5483_v61 = vcombine.low %v968_v32, %v978_v5  ;;  %v989_v19 = vshll.u32 %v4934_v30, 16  ;;  %v6445_v45 = vshrl.u32 %v4934_v30, 16 }
  0x5f   : > { %v982_v22 = vrot.slane %v6443_v33, 4  ;;  %v1528_v29 = vsel %vm5095_vm6, %v1526_v11, %v1527_v12  ;;  %4388 = vmatmul.mubr.msk.bf16.gmra.mxu1 %vm438_vm0, %v5473_v55  ;;  %v999_v10 = vshll.u32 %v5471_v28, 16  ;;  %v3991_v3 = vrot.slane %v5156_v6, 9 }
  0x60   : > { %v985_v58 = vrot.slane %v6444_v53, 5  ;;  %v995_v9 = vrot.slane %v6445_v45, 4  ;;  %v5492_v16 = vcombine.low %v1525_v31, %v1528_v29  ;;  %4391 = vmatprep.mubr.msk.bf16.mxu1 %vm438_vm0, %v5483_v61  ;;  %v991_v26 = vrot.slane %v989_v19, 5 }
  0x61   : > { %v1531_v59 = vrot.slane %v5159_v54, 5  ;;  %v1534_v57 = vrot.slane %v5340_v47, 5  ;;  %v6446_v40 = vshrl.u32 %v4968_v46, 16  ;;  %v1001_v27 = vrot.slane %v999_v10, 5 }
  0x62   : > { %v986_v60 = vor.u32 %v985_v58, %v982_v22  ;;  %4417 = vmatprep.mubr.msk.bf16.mxu0 %vm438_vm0, %v5492_v16  ;;  %v6447_v6 = vshll.u32 %v4968_v46, 16  ;;  %v1013_v37 = vshll.u32 %v4979_v51, 16  ;;  %v996_v12 = vor.u32 %v995_v9, %v991_v26 }
  0x63   : > { %v1006_v43 = vrot.slane %v6446_v40, 4  ;;  %v1532_v54 = vsel %vm5095_vm6, %v3991_v3, %v1531_v59  ;;  %v1533_v47 = vrot.slane %v1531_v59, 4  ;;  %v6448_v35 = vshrl.u32 %v4979_v51, 16 }
  0x64   : > { %v987_v24 = vrot.slane %v986_v60, 4  ;;  %v1009_v32 = vrot.slane %v6447_v6, 5  ;;  %v1015_v33 = vrot.slane %v1013_v37, 5  ;;  %v1023_v22 = vshll.u32 %v5501_v42, 16 }
  0x65   : > { %v1019_v31 = vrot.slane %v6448_v35, 4  ;;  %v997_v53 = vrot.slane %v996_v12, 4  ;;  %v1535_v58 = vsel %vm5095_vm6, %v1533_v47, %v1534_v57  ;;  %v3992_v29 = vrot.slane %v5181_v1, 9 }
  0x66   : > { %v992_v11 = vsel %vm5068_vm5, %v987_v24, %v991_v26  ;;  %v1010_v5 = vor.u32 %v1009_v32, %v1006_v43  ;;  %v1538_v19 = vrot.slane %v5184_v48, 5  ;;  %v5521_v45 = vcombine.low %v1532_v54, %v1535_v58  ;;  %v5529_v43 = vld [vmem:[%s4882_s15 + $0xa4] sm:$0x1]  ;;  %v5558_v58 = vld [vmem:[%s4882_s15 + $0xb0] sm:$0x1] }
  0x67   : > { %v1020_v60 = vor.u32 %v1019_v31, %v1015_v33  ;;  %v1025_v10 = vrot.slane %v1023_v22, 5  ;;  %v1002_v3 = vsel %vm5068_vm5, %v997_v53, %v1001_v27  ;;  %v1541_v40 = vrot.slane %v5378_v41, 5 }
  0x68   : > { %v1011_v9 = vrot.slane %v1010_v5, 4  ;;  %v1539_v26 = vsel %vm5095_vm6, %v3992_v29, %v1538_v19  ;;  %v1540_v59 = vrot.slane %v1538_v19, 4  ;;  %v5531_v57 = vcombine.low %v992_v11, %v1002_v3  ;;  %4418 = vmatmul.mubr.msk.bf16.gmra.mxu0 %vm438_vm0, %v5521_v45 }
  0x69   : > { %v1021_v48 = vrot.slane %v1020_v60, 4  ;;  %v6449_v24 = vshrl.u32 %v5014_v7, 16  ;;  %v6450_v41 = vshll.u32 %v5014_v7, 16  ;;  %v1037_v37 = vshll.u32 %v5017_v8, 16 }
  0x6a   : > { %v1016_v1 = vsel %vm5068_vm5, %v1011_v9, %v1015_v33  ;;  %v1542_v6 = vsel %vm5095_vm6, %v1540_v59, %v1541_v40  ;;  %v6451_v12 = vshrl.u32 %v5017_v8, 16  ;;  %4392 = vmatmul.mubr.msk.bf16.gmra.mxu1 %vm438_vm0, %v5531_v57  ;;  %v1047_v31 = vshll.u32 %v5529_v43, 16 }
  0x6b   : > { %v1030_v27 = vrot.slane %v6449_v24, 4  ;;  %v1033_v32 = vrot.slane %v6450_v41, 5  ;;  %v1026_v47 = vsel %vm5068_vm5, %v1021_v48, %v1025_v10  ;;  %v5550_v35 = vcombine.low %v1539_v26, %v1542_v6 }
  0x6c   : > { %v1043_v54 = vrot.slane %v6451_v12, 4  ;;  %v3993_v11 = vrot.slane %v5212_v13, 9  ;;  %v5554_v5 = vcombine.low %v1016_v1, %v1026_v47  ;;  %v1039_v22 = vrot.slane %v1037_v37, 5  ;;  %v6454_v1 = vld [vmem:[#allocation16_spill] sm:$0xff]  ;;  %v6456_v37 = vld [vmem:[#allocation7_spill] sm:$0xff] }
  0x6d   : > { %v1034_v33 = vor.u32 %v1033_v32, %v1030_v27  ;;  %v1545_v53 = vrot.slane %v5221_v20, 5  ;;  %4421 = vmatprep.mubr.msk.bf16.mxu0 %vm438_vm0, %v5550_v35  ;;  %v1049_v29 = vrot.slane %v1047_v31, 5  ;;  %v1548_v19 = vrot.slane %v5407_v39, 5 }
  0x6e   : > { %v6452_v9 = vshrl.u32 %v5054_v44, 16  ;;  %v6453_v10 = vshll.u32 %v5054_v44, 16  ;;  %4395 = vmatprep.mubr.msk.bf16.mxu1 %vm438_vm0, %v5554_v5  ;;  %v1044_v20 = vor.u32 %v1043_v54, %v1039_v22  ;;  %v1061_v48 = vshll.u32 %v6454_v1, 16  ;;  %v6458_v54 = vld [vmem:[#allocation6_spill] sm:$0xff] }
  0x6f   : > { %v1035_v3 = vrot.slane %v1034_v33, 4  ;;  %v1546_v26 = vsel %vm5095_vm6, %v3993_v11, %v1545_v53  ;;  %v1547_v59 = vrot.slane %v1545_v53, 4  ;;  %v6455_v39 = vshrl.u32 %v6454_v1, 16 }
  0x70   : > { %v1054_v60 = vrot.slane %v6452_v9, 4  ;;  %v1057_v13 = vrot.slane %v6453_v10, 5  ;;  %v1071_v27 = vshll.u32 %v5558_v58, 16  ;;  %v1045_v41 = vrot.slane %v1044_v20, 4 }
  0x71   : > { %v1067_v24 = vrot.slane %v6455_v39, 4  ;;  %v1040_v6 = vsel %vm5068_vm5, %v1035_v3, %v1039_v22  ;;  %v1549_v32 = vsel %vm5095_vm6, %v1547_v59, %v1548_v19  ;;  %v6457_v12 = vrot.slane %v6456_v37, 5  ;;  %v6461_v3 = vld [vmem:[#allocation19_spill] sm:$0xff] }
  0x72   : > { %v1058_v40 = vor.u32 %v1057_v13, %v1054_v60  ;;  %v6459_v47 = vrot.slane %v6458_v54, 9  ;;  %v5585_v11 = vcombine.low %v1546_v26, %v1549_v32  ;;  %v1063_v53 = vrot.slane %v1061_v48, 5  ;;  %v5588_v60 = vld [vmem:[%s4882_s15 + $0xbc] sm:$0x1] }
  0x73   : > { %v1073_v9 = vrot.slane %v1071_v27, 5  ;;  %v1050_v22 = vsel %vm5068_vm5, %v1045_v41, %v1049_v29  ;;  %v6460_v10 = vmov %v6457_v12  ;;  %v1555_v13 = vrot.slane %v5432_v38, 5  ;;  %v6464_v41 = vld [vmem:[#allocation20_spill] sm:$0xff] }
  0x74   : > { %v1553_v31 = vsel %vm5095_vm6, %v6459_v47, %v6457_v12  ;;  %v1059_v33 = vrot.slane %v1058_v40, 4  ;;  %v1554_v19 = vrot.slane %v6460_v10, 4  ;;  %v6462_v20 = vshrl.u32 %v6461_v3, 16  ;;  %4422 = vmatmul.mubr.msk.bf16.gmra.mxu0 %vm438_vm0, %v5585_v11 }
  0x75   : > { %v5597_v39 = vcombine.low %v1040_v6, %v1050_v22  ;;  %v1068_v40 = vor.u32 %v1067_v24, %v1063_v53  ;;  %v6463_v48 = vshll.u32 %v6461_v3, 16  ;;  %v1085_v38 = vshll.u32 %v6464_v41, 16 }
  0x76   : > { %v1078_v59 = vrot.slane %v6462_v20, 4  ;;  %v1064_v26 = vsel %vm5068_vm5, %v1059_v33, %v1063_v53  ;;  %v1556_v27 = vsel %vm5095_vm6, %v1554_v19, %v1555_v13  ;;  %v6465_v32 = vshrl.u32 %v6464_v41, 16 }
  0x77   : > { %v1081_v29 = vrot.slane %v6463_v48, 5  ;;  %v1095_v6 = vshll.u32 %v5588_v60, 16  ;;  %4396 = vmatmul.mubr.msk.bf16.gmra.mxu1 %vm438_vm0, %v5597_v39  ;;  %v1069_v12 = vrot.slane %v1068_v40, 4  ;;  %v5613_v54 = vcombine.low %v1553_v31, %v1556_v27 }
  0x78   : > { %v1091_v37 = vrot.slane %v6465_v32, 4  ;;  %v3995_v47 = vrot.slane %v4927_v25, 9  ;;  %v1087_v33 = vrot.slane %v1085_v38, 5  ;;  %v1559_v22 = vrot.slane %v4934_v30, 5 }
  0x79   : > { %v1082_v24 = vor.u32 %v1081_v29, %v1078_v59  ;;  %v1097_v53 = vrot.slane %v1095_v6, 5  ;;  %v1562_v10 = vrot.slane %v5471_v28, 5  ;;  %v1074_v19 = vsel %vm5068_vm5, %v1069_v12, %v1073_v9  ;;  %4425 = vmatprep.mubr.msk.bf16.mxu0 %vm438_vm0, %v5613_v54 }
  0x7a   : > { %v3996_v20 = vrot.slane %v4968_v46, 9  ;;  %v1566_v31 = vrot.slane %v4979_v51, 5  ;;  %v5624_v59 = vcombine.low %v1064_v26, %v1074_v19  ;;  %v1092_v25 = vor.u32 %v1091_v37, %v1087_v33  ;;  %v3915_v19 = vld [vmem:[%s6350_s2] ss:$0 sm:$0xff] }
  0x7b   : > { %v1083_v13 = vrot.slane %v1082_v24, 4  ;;  %v1560_v40 = vsel %vm5095_vm6, %v3995_v47, %v1559_v22  ;;  %v1561_v30 = vrot.slane %v1559_v22, 4  ;;  %v1569_v29 = vrot.slane %v5501_v42, 5  ;;  %v6466_v22 = vld [vmem:[#allocation9_spill] sm:$0xff]  ;;  %288 = vst.msk [vmem:[#allocation2 + $0x10] sm:$0xff] %vm285_vm7, %v3915_v19  ;;  %286 = vst.msk [vmem:[#allocation2] sm:$0xff] %vm285_vm7, %v3915_v19 }
  0x7c   : > { %v1567_v9 = vsel %vm5095_vm6, %v3996_v20, %v1566_v31  ;;  %v1568_v48 = vrot.slane %v1566_v31, 4  ;;  %4399 = vmatprep.mubr.msk.bf16.mxu1 %vm438_vm0, %v5624_v59  ;;  %v1093_v46 = vrot.slane %v1092_v25, 4  ;;  %v3997_v26 = vrot.slane %v5014_v7, 9  ;;  %287 = vst.msk [vmem:[#allocation2 + $0x8] sm:$0xff] %vm285_vm7, %v3915_v19  ;;  %289 = vst.msk [vmem:[#allocation2 + $0x18] sm:$0xff] %vm285_vm7, %v3915_v19 }
  0x7d   : > { %v1088_v28 = vsel %vm5068_vm5, %v1083_v13, %v1087_v33  ;;  %v1563_v51 = vsel %vm5095_vm6, %v1561_v30, %v1562_v10  ;;  %v1573_v27 = vrot.slane %v5017_v8, 5  ;;  %v1576_v37 = vrot.slane %v5529_v43, 5  ;;  %290 = vst.msk [vmem:[#allocation2 + $0x20] sm:$0xff] %vm285_vm7, %v3915_v19  ;;  %291 = vst.msk [vmem:[#allocation2 + $0x28] sm:$0xff] %vm285_vm7, %v3915_v19  ;;  %v6468_v30 = vld [vmem:[#allocation13_spill] sm:$0xff] }
  0x7e   : > { %v5639_v38 = vcombine.low %v1560_v40, %v1563_v51  ;;  %v1570_v32 = vsel %vm5095_vm6, %v1568_v48, %v1569_v29  ;;  %v3998_v42 = vrot.slane %v5054_v44, 9  ;;  %v1098_v6 = vsel %vm5068_vm5, %v1093_v46, %v1097_v53  ;;  %292 = vst.msk [vmem:[#allocation2 + $0x30] sm:$0xff] %vm285_vm7, %v3915_v19  ;;  %293 = vst.msk [vmem:[#allocation2 + $0x38] sm:$0xff] %vm285_vm7, %v3915_v19  ;;  %v6467_v40 = vld [vmem:[#allocation11_spill] sm:$0xff]  ;;  %v6471_v29 = vld [vmem:[#allocation18_spill] sm:$0xff] }
  0x7f   : > { %v5647_v12 = vcombine.low %v1567_v9, %v1570_v32  ;;  %v1575_v24 = vrot.slane %v1573_v27, 4  ;;  %v5649_v47 = vcombine.low %v1088_v28, %v1098_v6  ;;  %v1580_v7 = vrot.slane %v6454_v1, 5  ;;  %294 = vst.msk [vmem:[#allocation2 + $0x40] sm:$0xff] %vm285_vm7, %v3915_v19  ;;  %295 = vst.msk [vmem:[#allocation2 + $0x48] sm:$0xff] %vm285_vm7, %v3915_v19  ;;  %v6469_v9 = vld [vmem:[#allocation25_spill] sm:$0xff]  ;;  %v6470_v48 = vld [vmem:[#allocation15_spill] sm:$0xff] }
  0x80   : > { %4426 = vmatmul.mubr.msk.bf16.gmra.mxu0 %vm438_vm0, %v5639_v38  ;;  %v1583_v8 = vrot.slane %v5558_v58, 5  ;;  %v1574_v44 = vsel %vm5095_vm6, %v3997_v26, %v1573_v27  ;;  %v1587_v33 = vrot.slane %v6464_v41, 5  ;;  %v3999_v13 = vrot.slane %v6461_v3, 9  ;;  %296 = vst.msk [vmem:[#allocation2 + $0x50] sm:$0xff] %vm285_vm7, %v3915_v19  ;;  %297 = vst.msk [vmem:[#allocation2 + $0x58] sm:$0xff] %vm285_vm7, %v3915_v19  ;;  %v6472_v46 = vld [vmem:[#allocation22_spill] sm:$0xff] }
  0x81   : > { %4429 = vmatprep.mubr.msk.bf16.mxu0 %vm438_vm0, %v5647_v12  ;;  %v1577_v43 = vsel %vm5095_vm6, %v1575_v24, %v1576_v37  ;;  %4400 = vmatmul.mubr.msk.bf16.gmra.mxu1 %vm438_vm0, %v5649_v47  ;;  %v1581_v53 = vsel %vm5095_vm6, %v3998_v42, %v1580_v7  ;;  %v1582_v1 = vrot.slane %v1580_v7, 4  ;;  %v1590_v31 = vrot.slane %v5588_v60, 5  ;;  %298 = vst.msk [vmem:[#allocation2 + $0x60] sm:$0xff] %vm285_vm7, %v3915_v19  ;;  %v5716_v60 = vld [vmem:[%s6349_s1 + $0x38] sm:$0xff]   ;;  %v6473_v51 = vld [vmem:[#allocation23_spill] sm:$0xff]  ;;  %v6474_v26 = vld [vmem:[#allocation24_spill] sm:$0xff] }
  0x82   : > { %4439 = vmatprep.mubr.msk.bf16.mxu1 %vm438_vm0, %v6466_v22  ;;  %v5668_v58 = vcombine.low %v1574_v44, %v1577_v43  ;;  %v1589_v20 = vrot.slane %v1587_v33, 4  ;;  %299 = vst.msk [vmem:[#allocation2 + $0x68] sm:$0xff] %vm285_vm7, %v3915_v19  ;;  %300 = vst.msk [vmem:[#allocation2 + $0x70] sm:$0xff] %vm285_vm7, %v3915_v19  ;;  %v1588_v3 = vsel %vm5095_vm6, %v3999_v13, %v1587_v33  ;;  %v6476_v27 = vld [vmem:[#allocation10_spill] sm:$0xff]  ;;  %v6477_v32 = vld [vmem:[#allocation12_spill] sm:$0xff] }
  0x83   : > { %v1584_v10 = vsel %vm5095_vm6, %v1582_v1, %v1583_v8  ;;  %301 = vst.msk [vmem:[#allocation2 + $0x78] sm:$0xff] %vm285_vm7, %v3915_v19  ;;  %302 = vst.msk [vmem:[#allocation2 + $0x80] sm:$0xff] %vm285_vm7, %v3915_v19  ;;  %v6478_v37 = vld [vmem:[#allocation14_spill] sm:$0xff]  ;;  %v6479_v43 = vld [vmem:[#allocation17_spill] sm:$0xff] }
  0x84   : > { %v5675_v41 = vcombine.low %v1581_v53, %v1584_v10  ;;  %303 = vst.msk [vmem:[#allocation2 + $0x88] sm:$0xff] %vm285_vm7, %v3915_v19  ;;  %304 = vst.msk [vmem:[#allocation2 + $0x90] sm:$0xff] %vm285_vm7, %v3915_v19  ;;  %v1591_v25 = vsel %vm5095_vm6, %v1589_v20, %v1590_v31  ;;  %v5779_v42 = vld [vmem:[%s4882_s15 + $0xc0] sm:$0xf]  ;;  %v5782_v6 = vld [vmem:[%s4882_s15 + $0xc4] sm:$0xf] }
  0x85   : > { %305 = vst.msk [vmem:[#allocation2 + $0x98] sm:$0xff] %vm285_vm7, %v3915_v19  ;;  %306 = vst.msk [vmem:[#allocation2 + $0xa0] sm:$0xff] %vm285_vm7, %v3915_v19  ;;  %v5729_v28 = vcombine.low %v1588_v3, %v1591_v25  ;;  %v2229_v24 = vshrl.u32 %v5779_v42, 16  ;;  %v2232_v7 = vshll.u32 %v5779_v42, 16  ;;  %v2242_v8 = vshrl.u32 %v5782_v6, 16  ;;  %v6480_v33 = vld [vmem:[#allocation21_spill] sm:$0xff] }
  0x86   : > { %307 = vst.msk [vmem:[#allocation2 + $0xa8] sm:$0xff] %vm285_vm7, %v3915_v19  ;;  %308 = vst.msk [vmem:[#allocation2 + $0xb0] sm:$0xff] %vm285_vm7, %v3915_v19  ;;  %v2238_v44 = vshll.u32 %v5782_v6, 16  ;;  %v5799_v13 = vld [vmem:[%s4882_s15 + $0xc8] sm:$0x1] }
  0x87   : > { %309 = vst.msk [vmem:[#allocation2 + $0xb8] sm:$0xff] %vm285_vm7, %v3915_v19  ;;  %310 = vst.msk [vmem:[#allocation2 + $0xc0] sm:$0xff] %vm285_vm7, %v3915_v19  ;;  %v2231_v53 = vrot.slane %v2229_v24, 4  ;;  %v2234_v1 = vrot.slane %v2232_v7, 5  ;;  %v2244_v10 = vrot.slane %v2242_v8, 4  ;;  %v2248_v3 = vshll.u32 %v5799_v13, 16 }
  0x88   : > { %311 = vst.msk [vmem:[#allocation2 + $0xc8] sm:$0xff] %vm285_vm7, %v3915_v19  ;;  %312 = vst.msk [vmem:[#allocation2 + $0xd0] sm:$0xff] %vm285_vm7, %v3915_v19  ;;  %4430 = vmatmul.mubr.msk.bf16.gmra.mxu0 %vm438_vm0, %v5668_v58  ;;  %v2240_v22 = vrot.slane %v2238_v44, 5 }
  0x89   : > { %313 = vst.msk [vmem:[#allocation2 + $0xd8] sm:$0xff] %vm285_vm7, %v3915_v19  ;;  %314 = vst.msk [vmem:[#allocation2 + $0xe0] sm:$0xff] %vm285_vm7, %v3915_v19  ;;  %4433 = vmatprep.mubr.msk.bf16.mxu0 %vm438_vm0, %v5675_v41  ;;  %4440 = vmatmul.mubr.msk.bf16.vlgmr.msra.gmra.mxu1 %vm438_vm0, %v6467_v40  ;;  %v2235_v20 = vor.u32 %v2234_v1, %v2231_v53  ;;  %v2250_v24 = vrot.slane %v2248_v3, 5  ;;  %v321_v53 = vld [vmem:[#allocation2 + $0x18] sm:$0xff] }
  0x8a   : > { %315 = vst.msk [vmem:[#allocation2 + $0xe8] sm:$0xff] %vm285_vm7, %v3915_v19  ;;  %316 = vst.msk [vmem:[#allocation2 + $0xf0] sm:$0xff] %vm285_vm7, %v3915_v19  ;;  %4443 = vmatprep.mubr.msk.bf16.mxu1 %vm438_vm0, %v6468_v30  ;;  %4506 = vmatpush3.bf16.msra.mxu1 %v5262_v63  ;;  %v4718_v63 = vld [vmem:[%s6349_s1 + $0x40] sm:$0xff]   ;;  %v2245_v31 = vor.u32 %v2244_v10, %v2240_v22 }
  0x8b   : > { %317 = vst.msk [vmem:[#allocation2 + $0xf8] sm:$0xff] %vm285_vm7, %v3915_v19  ;;  %4573 = vmatprep.subr.bf16.mxu1 %v5716_v60  ;;  %v5796_v19 = vcombine.low %v5779_v42, %v5782_v6  ;;  %v2236_v25 = vrot.slane %v2235_v20, 4 }
  0x8c   : > { %v338_v44 = vld [vmem:[#allocation2 + $0xa0] sm:$0xff] }
  0x8d   : > { %v2241_v7 = vsel %vm5068_vm5, %v2236_v25, %v2240_v22 }
  0x8e   : > { %v341_v20 = vld [vmem:[#allocation2 + $0xb8] sm:$0xff] }
  0x90   : > { %4434 = vmatmul.mubr.msk.bf16.gmra.mxu0 %vm438_vm0, %v5729_v28 }
  0x91   : > { %4473 = vmatprep.mubr.msk.bf16.mxu0 %vm438_vm0, %v6469_v9  ;;  %4444 = vmatmul.mubr.msk.bf16.gmra.mxu1 %vm438_vm0, %v6470_v48  ;;  %v2246_v9 = vrot.slane %v2245_v31, 4  ;;  %v319_v31 = vld [vmem:[#allocation2 + $0x8] sm:$0xff] }
  0x92   : > { %4447 = vmatprep.mubr.msk.bf16.mxu1 %vm438_vm0, %v6471_v29 }
  0x93   : > { %v2251_v8 = vsel %vm5068_vm5, %v2246_v9, %v2250_v24  ;;  %v339_v24 = vld [vmem:[#allocation2 + $0xa8] sm:$0xff] }
  0x98   : > { %4474 = vmatmul.mubr.msk.bf16.vlgmr.msra.gmra.mxu0 %vm438_vm0, %v5274_v4 }
  0x99   : > { %4540 = vmatpush3.bf16.msra.mxu0 %v5355_v17  ;;  %4477 = vmatprep.mubr.msk.bf16.mxu0 %vm438_vm0, %v5304_v14  ;;  %v6475_v17 = vld [vmem:[#allocation8_spill] sm:$0xff] }
  0x9a   : > { %4448 = vmatmul.mubr.msk.bf16.gmra.mxu1 %vm438_vm0, %v6472_v46  ;;  %4607 = vmatprep.subr.bf16.mxu0 %v4718_v63 }
  0x9b   : > { %4451 = vmatprep.mubr.msk.bf16.mxu1 %vm438_vm0, %v6473_v51 }
  0xa0   : > { %4478 = vmatmul.mubr.msk.bf16.gmra.mxu0 %vm438_vm0, %v5315_v23 }
  0xa1   : > { %4481 = vmatprep.mubr.msk.bf16.mxu0 %vm438_vm0, %v5346_v15 }
  0xa2   : > { %4452 = vmatmul.mubr.msk.bf16.gmra.mxu1 %vm438_vm0, %v6474_v26 }
  0xa3   : > { %4455 = vmatprep.mubr.msk.bf16.mxu1 %vm438_vm0, %v5228_v18 }
  0xa8   : > { %4482 = vmatmul.mubr.msk.bf16.gmra.mxu0 %vm438_vm0, %v5381_v21 }
  0xa9   : > { %4485 = vmatprep.mubr.msk.bf16.mxu0 %vm438_vm0, %v5411_v2 }
  0xaa   : > { %4456 = vmatmul.mubr.msk.bf16.gmra.mxu1 %vm438_vm0, %v6475_v17 }
  0xab   : > { %4459 = vmatprep.mubr.msk.bf16.mxu1 %vm438_vm0, %v6476_v27 }
  0xb0   : > { %4486 = vmatmul.mubr.msk.bf16.gmra.mxu0 %vm438_vm0, %v5439_v62 }
  0xb1   : > { %4489 = vmatprep.mubr.msk.bf16.mxu0 %vm438_vm0, %v5473_v55 }
  0xb2   : > { %4460 = vmatmul.mubr.msk.bf16.gmra.mxu1 %vm438_vm0, %v6477_v32 }
  0xb3   : > { %4463 = vmatprep.mubr.msk.bf16.mxu1 %vm438_vm0, %v6478_v37 }
  0xb8   : > { %4490 = vmatmul.mubr.msk.bf16.gmra.mxu0 %vm438_vm0, %v5483_v61 }
  0xb9   : > { %4493 = vmatprep.mubr.msk.bf16.mxu0 %vm438_vm0, %v5531_v57 }
  0xba   : > { %4464 = vmatmul.mubr.msk.bf16.gmra.mxu1 %vm438_vm0, %v6479_v43 }
  0xbb   : > { %4467 = vmatprep.mubr.msk.bf16.mxu1 %vm438_vm0, %v6480_v33 }
  0xc0   : > { %4494 = vmatmul.mubr.msk.bf16.gmra.mxu0 %vm438_vm0, %v5554_v5 }
  0xc1   : > { %4497 = vmatprep.mubr.msk.bf16.mxu0 %vm438_vm0, %v5597_v39 }
  0xc2   : > { %4468 = vmatmul.mubr.msk.bf16.gmra.mxu1 %vm438_vm0, %v5796_v19 }
  0xc3   : > { %4507 = vmatprep.mubr.msk.bf16.mxu1 %vm438_vm0, %v5324_v49  ;;  %v5823_v49 = vcombine.low %v2241_v7, %v2251_v8  ;;  %v324_v7 = vld [vmem:[#allocation2 + $0x30] sm:$0xff] }
  0xc8   : > { %4498 = vmatmul.mubr.msk.bf16.gmra.mxu0 %vm438_vm0, %v5624_v59 }
  0xc9   : > { %4501 = vmatprep.mubr.msk.bf16.mxu0 %vm438_vm0, %v5649_v47 }
  0xca   : > { %4508 = vmatmul.mubr.msk.bf16.vlgmr.msra.gmra.mxu1 %vm438_vm0, %v5373_v50 }
  0xcb   : > { %4511 = vmatprep.mubr.msk.bf16.mxu1 %vm438_vm0, %v5400_v52  ;;  %4574 = vmatpush3.bf16.msra.mxu1 %v5716_v60  ;;  %v320_v60 = vld [vmem:[#allocation2 + $0x10] sm:$0xff] }
  0xd0   : > { %4502 = vmatmul.mubr.msk.bf16.gmra.mxu0 %vm438_vm0, %v5823_v49 }
  0xd1   : > { %4541 = vmatprep.mubr.msk.bf16.mxu0 %vm438_vm0, %v6467_v40 }
  0xd2   : > { %4512 = vmatmul.mubr.msk.bf16.gmra.mxu1 %vm438_vm0, %v5436_v34 }
  0xd3   : > { %4515 = vmatprep.mubr.msk.bf16.mxu1 %vm438_vm0, %v5466_v36 }
  0xd8   : > { %4542 = vmatmul.mubr.msk.bf16.vlgmr.msra.gmra.mxu0 %vm438_vm0, %v6468_v30  ;;  %v340_v30 = vld [vmem:[#allocation2 + $0xb0] sm:$0xff] }
  0xd9   : > { %4608 = vmatpush3.bf16.msra.mxu0 %v4718_v63  ;;  %4545 = vmatprep.mubr.msk.bf16.mxu0 %vm438_vm0, %v6470_v48  ;;  %v318_v48 = vld [vmem:[#allocation2] sm:$0xff] }
  0xda   : > { %4516 = vmatmul.mubr.msk.bf16.gmra.mxu1 %vm438_vm0, %v5492_v16 }
  0xdb   : > { %4519 = vmatprep.mubr.msk.bf16.mxu1 %vm438_vm0, %v5521_v45 }
  0xe0   : > { %4546 = vmatmul.mubr.msk.bf16.gmra.mxu0 %vm438_vm0, %v6471_v29 }
  0xe1   : > { %4549 = vmatprep.mubr.msk.bf16.mxu0 %vm438_vm0, %v6472_v46  ;;  %v4339_v40 = vpop.f32.mrf.mxu0 }
  0xe2   : > { %4520 = vmatmul.mubr.msk.bf16.gmra.mxu1 %vm438_vm0, %v5550_v35  ;;  %v650_v29 = vadd.f32 %v4339_v40, %v320_v60 }
  0xe3   : > { %4523 = vmatprep.mubr.msk.bf16.mxu1 %vm438_vm0, %v5585_v11  ;;  %v4359_v63 = vpop.f32.mrf.mxu1  ;;  %v521_v46 = vpop.f32.mrf.mxu0 }
  0xe4   : > { %682 = vst.msk [vmem:[#allocation2 + $0x10] sm:$0xff] %vm285_vm7, %v650_v29  ;;  %v648_v1 = vadd.f32 %v521_v46, %v318_v48  ;;  %v344_v48 = vld [vmem:[#allocation2 + $0xd0] sm:$0xff]  ;;  %v322_v29 = vld [vmem:[#allocation2 + $0x20] sm:$0xff] }
  0xe5   : > { %v601_v22 = vpop.f32.mrf.mxu1  ;;  %v4340_v10 = vpop.f32.mrf.mxu0 }
  0xe6   : > { %680 = vst.msk [vmem:[#allocation2] sm:$0xff] %vm285_vm7, %v648_v1  ;;  %v651_v3 = vadd.f32 %v4340_v10, %v321_v53  ;;  %v2527_v10 = vrot.slane %v5782_v6, 5 }
  0xe7   : > { %v4360_v25 = vpop.f32.mrf.mxu1  ;;  %v524_v9 = vpop.f32.mrf.mxu0 }
  0xe8   : > { %4550 = vmatmul.mubr.msk.bf16.gmra.mxu0 %vm438_vm0, %v6473_v51  ;;  %v670_v51 = vadd.f32 %v4359_v63, %v340_v30  ;;  %683 = vst.msk [vmem:[#allocation2 + $0x18] sm:$0xff] %vm285_vm7, %v651_v3  ;;  %v671_v8 = vadd.f32 %v4360_v25, %v341_v20  ;;  %v649_v60 = vadd.f32 %v524_v9, %v319_v31  ;;  %v345_v31 = vld [vmem:[#allocation2 + $0xd8] sm:$0xff] }
  0xe9   : > { %4553 = vmatprep.mubr.msk.bf16.mxu0 %vm438_vm0, %v6474_v26  ;;  %v668_v26 = vadd.f32 %v601_v22, %v338_v44  ;;  %v604_v40 = vpop.f32.mrf.mxu1  ;;  %v4343_v30 = vpop.f32.mrf.mxu0 }
  0xea   : > { %4524 = vmatmul.mubr.msk.bf16.gmra.mxu1 %vm438_vm0, %v5613_v54  ;;  %702 = vst.msk [vmem:[#allocation2 + $0xb0] sm:$0xff] %vm285_vm7, %v670_v51  ;;  %703 = vst.msk [vmem:[#allocation2 + $0xb8] sm:$0xff] %vm285_vm7, %v671_v8  ;;  %v669_v63 = vadd.f32 %v604_v40, %v339_v24  ;;  %v654_v46 = vadd.f32 %v4343_v30, %v324_v7  ;;  %v342_v51 = vld [vmem:[#allocation2 + $0xc0] sm:$0xff]  ;;  %v343_v7 = vld [vmem:[#allocation2 + $0xc8] sm:$0xff]  ;;  %v2529_v30 = vrot.slane %v2527_v10, 4 }
  0xeb   : > { %4527 = vmatprep.mubr.msk.bf16.mxu1 %vm438_vm0, %v5639_v38  ;;  %700 = vst.msk [vmem:[#allocation2 + $0xa0] sm:$0xff] %vm285_vm7, %v668_v26  ;;  %681 = vst.msk [vmem:[#allocation2 + $0x8] sm:$0xff] %vm285_vm7, %v649_v60  ;;  %v4363_v44 = vpop.f32.mrf.mxu1  ;;  %v537_v53 = vpop.f32.mrf.mxu0  ;;  %v323_v26 = vld [vmem:[#allocation2 + $0x28] sm:$0xff]  ;;  %v328_v8 = vld [vmem:[#allocation2 + $0x50] sm:$0xff]  ;;  %v4075_v60 = vrot.slane %v5779_v42, 9 }
  0xec   : > { %701 = vst.msk [vmem:[#allocation2 + $0xa8] sm:$0xff] %vm285_vm7, %v669_v63  ;;  %686 = vst.msk [vmem:[#allocation2 + $0x30] sm:$0xff] %vm285_vm7, %v654_v46  ;;  %v674_v1 = vadd.f32 %v4363_v44, %v344_v48  ;;  %v652_v22 = vadd.f32 %v537_v53, %v322_v29  ;;  %v2530_v48 = vrot.slane %v5799_v13, 5  ;;  %v348_v46 = vld [vmem:[#allocation2 + $0xf0] sm:$0xff]  ;;  %v326_v44 = vld [vmem:[#allocation2 + $0x40] sm:$0xff] }
  0xed   : > { %v4344_v20 = vpop.f32.mrf.mxu0 }
  0xee   : > { %706 = vst.msk [vmem:[#allocation2 + $0xd0] sm:$0xff] %vm285_vm7, %v674_v1  ;;  %684 = vst.msk [vmem:[#allocation2 + $0x20] sm:$0xff] %vm285_vm7, %v652_v22  ;;  %v2528_v22 = vsel %vm5095_vm6, %v4075_v60, %v2527_v10  ;;  %v332_v10 = vld [vmem:[#allocation2 + $0x70] sm:$0xff] }
  0xef   : > { %v540_v24 = vpop.f32.mrf.mxu0 }
  0xf0   : > { %4554 = vmatmul.mubr.msk.bf16.gmra.mxu0 %vm438_vm0, %v5228_v18  ;;  %v325_v18 = vld [vmem:[#allocation2 + $0x38] sm:$0xff]  ;;  %v653_v40 = vadd.f32 %v540_v24, %v323_v26 }
  0xf1   : > { %4557 = vmatprep.mubr.msk.bf16.mxu0 %vm438_vm0, %v6475_v17  ;;  %v617_v17 = vpop.f32.mrf.mxu1  ;;  %v655_v25 = vadd.f32 %v4344_v20, %v325_v18  ;;  %v4347_v63 = vpop.f32.mrf.mxu0  ;;  %v346_v18 = vld [vmem:[#allocation2 + $0xe0] sm:$0xff]  ;;  %v349_v26 = vld [vmem:[#allocation2 + $0xf8] sm:$0xff] }
  0xf2   : > { %4528 = vmatmul.mubr.msk.bf16.gmra.mxu1 %vm438_vm0, %v5647_v12  ;;  %v672_v3 = vadd.f32 %v617_v17, %v342_v51  ;;  %685 = vst.msk [vmem:[#allocation2 + $0x28] sm:$0xff] %vm285_vm7, %v653_v40  ;;  %v658_v53 = vadd.f32 %v4347_v63, %v328_v8 }
  0xf3   : > { %4531 = vmatprep.mubr.msk.bf16.mxu1 %vm438_vm0, %v5668_v58  ;;  %v4364_v9 = vpop.f32.mrf.mxu1  ;;  %687 = vst.msk [vmem:[#allocation2 + $0x38] sm:$0xff] %vm285_vm7, %v655_v25  ;;  %v553_v51 = vpop.f32.mrf.mxu0 }
  0xf4   : > { %704 = vst.msk [vmem:[#allocation2 + $0xc0] sm:$0xff] %vm285_vm7, %v672_v3  ;;  %v675_v6 = vadd.f32 %v4364_v9, %v345_v31  ;;  %690 = vst.msk [vmem:[#allocation2 + $0x50] sm:$0xff] %vm285_vm7, %v658_v53  ;;  %v656_v17 = vadd.f32 %v553_v51, %v326_v44  ;;  %v327_v3 = vld [vmem:[#allocation2 + $0x48] sm:$0xff]  ;;  %v1101_v44 = vld [vmem:[#allocation2 + $0x10] sm:$0xff] }
  0xf5   : > { %v620_v29 = vpop.f32.mrf.mxu1  ;;  %v4348_v31 = vpop.f32.mrf.mxu0 }
  0xf6   : > { %707 = vst.msk [vmem:[#allocation2 + $0xd8] sm:$0xff] %vm285_vm7, %v675_v6  ;;  %v673_v42 = vadd.f32 %v620_v29, %v343_v7  ;;  %688 = vst.msk [vmem:[#allocation2 + $0x40] sm:$0xff] %vm285_vm7, %v656_v17  ;;  %v347_v6 = vld [vmem:[#allocation2 + $0xe8] sm:$0xff]  ;;  %v330_v29 = vld [vmem:[#allocation2 + $0x60] sm:$0xff] }
  0xf7   : > { %v4367_v13 = vpop.f32.mrf.mxu1  ;;  %v556_v8 = vpop.f32.mrf.mxu0  ;;  %v1102_v17 = vld [vmem:[#allocation2 + $0x18] sm:$0xff] }
  0xf8   : > { %4558 = vmatmul.mubr.msk.bf16.gmra.mxu0 %vm438_vm0, %v6476_v27  ;;  %v329_v27 = vld [vmem:[#allocation2 + $0x58] sm:$0xff]  ;;  %705 = vst.msk [vmem:[#allocation2 + $0xc8] sm:$0xff] %vm285_vm7, %v673_v42  ;;  %v678_v1 = vadd.f32 %v4367_v13, %v348_v46  ;;  %v657_v40 = vadd.f32 %v556_v8, %v327_v3  ;;  %v334_v8 = vld [vmem:[#allocation2 + $0x80] sm:$0xff] }
  0xf9   : > { %4561 = vmatprep.mubr.msk.bf16.mxu0 %vm438_vm0, %v6477_v32  ;;  %v2531_v32 = vsel %vm5095_vm6, %v2529_v30, %v2530_v48  ;;  %v633_v20 = vpop.f32.mrf.mxu1  ;;  %v659_v9 = vadd.f32 %v4348_v31, %v329_v27  ;;  %v4351_v48 = vpop.f32.mrf.mxu0  ;;  %v333_v13 = vld [vmem:[#allocation2 + $0x78] sm:$0xff] }
  0xfa   : > { %4532 = vmatmul.mubr.msk.bf16.gmra.mxu1 %vm438_vm0, %v5675_v41  ;;  %710 = vst.msk [vmem:[#allocation2 + $0xf0] sm:$0xff] %vm285_vm7, %v678_v1  ;;  %v676_v25 = vadd.f32 %v633_v20, %v346_v18  ;;  %v5899_v24 = vcombine.low %v2528_v22, %v2531_v32  ;;  %689 = vst.msk [vmem:[#allocation2 + $0x48] sm:$0xff] %vm285_vm7, %v657_v40  ;;  %v662_v46 = vadd.f32 %v4351_v48, %v332_v10  ;;  %v1099_v18 = vld [vmem:[#allocation2] sm:$0xff]  ;;  %v331_v1 = vld [vmem:[#allocation2 + $0x68] sm:$0xff] }
  0xfb   : > { %4535 = vmatprep.mubr.msk.bf16.mxu1 %vm438_vm0, %v5729_v28  ;;  %v4368_v7 = vpop.f32.mrf.mxu1  ;;  %691 = vst.msk [vmem:[#allocation2 + $0x58] sm:$0xff] %vm285_vm7, %v659_v9  ;;  %v569_v53 = vpop.f32.mrf.mxu0  ;;  %v5929_v40 = vld [vmem:[%s4882_s15 + $0xd0] sm:$0xf] }
  0xfc   : > { %708 = vst.msk [vmem:[#allocation2 + $0xe0] sm:$0xff] %vm285_vm7, %v676_v25  ;;  %v679_v60 = vadd.f32 %v4368_v7, %v349_v26  ;;  %694 = vst.msk [vmem:[#allocation2 + $0x70] sm:$0xff] %vm285_vm7, %v662_v46  ;;  %v660_v51 = vadd.f32 %v569_v53, %v330_v29  ;;  %v336_v26 = vld [vmem:[#allocation2 + $0x90] sm:$0xff]  ;;  %v1100_v25 = vld [vmem:[#allocation2 + $0x8] sm:$0xff] }
  0xfd   : > { %v636_v30 = vpop.f32.mrf.mxu1  ;;  %v337_v29 = vld [vmem:[#allocation2 + $0x98] sm:$0xff] }
  0xfe   : > { %711 = vst.msk [vmem:[#allocation2 + $0xf8] sm:$0xff] %vm285_vm7, %v679_v60  ;;  %v677_v63 = vadd.f32 %v636_v30, %v347_v6  ;;  %692 = vst.msk [vmem:[#allocation2 + $0x60] sm:$0xff] %vm285_vm7, %v660_v51  ;;  %v5926_v60 = vld [vmem:[%s4882_s15 + $0xcc] sm:$0xf]  ;;  %v1106_v51 = vld [vmem:[#allocation2 + $0x38] sm:$0xff] }
  0xff   : > { %v4373_v42 = vpop.f32.mrf.mxu1  ;;  %v4098_v46 = vcombine.low %v5926_v60, %v5929_v40 }
 0x100   : > { %4562 = vmatmul.mubr.msk.bf16.gmra.mxu0 %vm438_vm0, %v6478_v37  ;;  %709 = vst.msk [vmem:[#allocation2 + $0xe8] sm:$0xff] %vm285_vm7, %v677_v63  ;;  %v1399_v37 = vadd.f32 %v4373_v42, %v1101_v44  ;;  %v1103_v44 = vld [vmem:[#allocation2 + $0x20] sm:$0xff] }
 0x101   : > { %4565 = vmatprep.mubr.msk.bf16.mxu0 %vm438_vm0, %v6479_v43  ;;  %v1270_v27 = vpop.f32.mrf.mxu1  ;;  %v4352_v43 = vpop.f32.mrf.mxu0 }
 0x102   : > { %4536 = vmatmul.mubr.msk.bf16.gmra.mxu1 %vm438_vm0, %v5899_v24  ;;  %1431 = vst.msk [vmem:[#allocation2 + $0x10] sm:$0xff] %vm285_vm7, %v1399_v37  ;;  %v1397_v22 = vadd.f32 %v1270_v27, %v1099_v18  ;;  %v663_v32 = vadd.f32 %v4352_v43, %v333_v13 }
 0x103   : > { %4575 = vmatprep.mubr.msk.bf16.mxu1 %vm438_vm0, %v5274_v4  ;;  %v4374_v20 = vpop.f32.mrf.mxu1  ;;  %v572_v31 = vpop.f32.mrf.mxu0 }
 0x104   : > { %1429 = vst.msk [vmem:[#allocation2] sm:$0xff] %vm285_vm7, %v1397_v22  ;;  %695 = vst.msk [vmem:[#allocation2 + $0x78] sm:$0xff] %vm285_vm7, %v663_v32  ;;  %v1400_v4 = vadd.f32 %v4374_v20, %v1102_v17  ;;  %v661_v3 = vadd.f32 %v572_v31, %v331_v1  ;;  %v1104_v1 = vld [vmem:[#allocation2 + $0x28] sm:$0xff] }
 0x105   : > { %v1273_v9 = vpop.f32.mrf.mxu1  ;;  %v4355_v7 = vpop.f32.mrf.mxu0 }
 0x106   : > { %1432 = vst.msk [vmem:[#allocation2 + $0x18] sm:$0xff] %vm285_vm7, %v1400_v4  ;;  %693 = vst.msk [vmem:[#allocation2 + $0x68] sm:$0xff] %vm285_vm7, %v661_v3  ;;  %v1398_v6 = vadd.f32 %v1273_v9, %v1100_v25  ;;  %v666_v10 = vadd.f32 %v4355_v7, %v336_v26  ;;  %v1109_v26 = vld [vmem:[#allocation2 + $0x50] sm:$0xff] }
 0x107   : > { %v4377_v30 = vpop.f32.mrf.mxu1  ;;  %v585_v48 = vpop.f32.mrf.mxu0 }
 0x108   : > { %4566 = vmatmul.mubr.msk.bf16.gmra.mxu0 %vm438_vm0, %v6480_v33  ;;  %v1105_v33 = vld [vmem:[#allocation2 + $0x30] sm:$0xff]  ;;  %1430 = vst.msk [vmem:[#allocation2 + $0x8] sm:$0xff] %vm285_vm7, %v1398_v6  ;;  %698 = vst.msk [vmem:[#allocation2 + $0x90] sm:$0xff] %vm285_vm7, %v666_v10  ;;  %v664_v63 = vadd.f32 %v585_v48, %v334_v8  ;;  %v1107_v8 = vld [vmem:[#allocation2 + $0x40] sm:$0xff] }
 0x109   : > { %4569 = vmatprep.mubr.msk.bf16.mxu0 %vm438_vm0, %v5796_v19  ;;  %v1403_v19 = vadd.f32 %v4377_v30, %v1105_v33  ;;  %v1286_v42 = vpop.f32.mrf.mxu1  ;;  %v4356_v53 = vpop.f32.mrf.mxu0  ;;  %v1594_v32 = vld [vmem:[#allocation2 + $0x10] sm:$0xff]  ;;  %v1110_v30 = vld [vmem:[#allocation2 + $0x58] sm:$0xff] }
 0x10a   : > { %4576 = vmatmul.mubr.msk.bf16.vlgmr.msra.gmra.mxu1 %vm438_vm0, %v5304_v14  ;;  %v335_v14 = vld [vmem:[#allocation2 + $0x88] sm:$0xff]  ;;  %696 = vst.msk [vmem:[#allocation2 + $0x80] sm:$0xff] %vm285_vm7, %v664_v63  ;;  %v1401_v13 = vadd.f32 %v1286_v42, %v1103_v44  ;;  %v667_v37 = vadd.f32 %v4356_v53, %v337_v29 }
 0x10b   : > { %4579 = vmatprep.mubr.msk.bf16.mxu1 %vm438_vm0, %v5315_v23  ;;  %1435 = vst.msk [vmem:[#allocation2 + $0x30] sm:$0xff] %vm285_vm7, %v1403_v19  ;;  %v4378_v18 = vpop.f32.mrf.mxu1  ;;  %v588_v23 = vpop.f32.mrf.mxu0  ;;  %v1592_v3 = vld [vmem:[#allocation2] sm:$0xff] }
 0x10c   : > { %1433 = vst.msk [vmem:[#allocation2 + $0x20] sm:$0xff] %vm285_vm7, %v1401_v13  ;;  %699 = vst.msk [vmem:[#allocation2 + $0x98] sm:$0xff] %vm285_vm7, %v667_v37  ;;  %v1404_v27 = vadd.f32 %v4378_v18, %v1106_v51  ;;  %v665_v43 = vadd.f32 %v588_v23, %v335_v14  ;;  %v1113_v37 = vld [vmem:[#allocation2 + $0x70] sm:$0xff] }
 0x10d   : > { %v1289_v22 = vpop.f32.mrf.mxu1  ;;  %v4407_v17 = vpop.f32.mrf.mxu0 }
 0x10e   : > { %1436 = vst.msk [vmem:[#allocation2 + $0x38] sm:$0xff] %vm285_vm7, %v1404_v27  ;;  %697 = vst.msk [vmem:[#allocation2 + $0x88] sm:$0xff] %vm285_vm7, %v665_v43  ;;  %v1402_v20 = vadd.f32 %v1289_v22, %v1104_v1  ;;  %v1892_v31 = vadd.f32 %v4407_v17, %v1594_v32  ;;  %v1111_v43 = vld [vmem:[#allocation2 + $0x60] sm:$0xff]  ;;  %v1114_v17 = vld [vmem:[#allocation2 + $0x78] sm:$0xff] }
 0x10f   : > { %v4381_v4 = vpop.f32.mrf.mxu1  ;;  %v1763_v25 = vpop.f32.mrf.mxu0  ;;  %v1593_v29 = vld [vmem:[#allocation2 + $0x8] sm:$0xff] }
 0x110   : > { %4570 = vmatmul.mubr.msk.bf16.gmra.mxu0 %vm438_vm0, %v4098_v46  ;;  %1434 = vst.msk [vmem:[#allocation2 + $0x28] sm:$0xff] %vm285_vm7, %v1402_v20  ;;  %v1407_v9 = vadd.f32 %v4381_v4, %v1109_v26  ;;  %1924 = vst.msk [vmem:[#allocation2 + $0x10] sm:$0xff] %vm285_vm7, %v1892_v31  ;;  %v1890_v7 = vadd.f32 %v1763_v25, %v1592_v3  ;;  %v1108_v46 = vld [vmem:[#allocation2 + $0x48] sm:$0xff] }
 0x111   : > { %4609 = vmatprep.mubr.msk.bf16.mxu0 %vm438_vm0, %v5373_v50  ;;  %v1302_v6 = vpop.f32.mrf.mxu1  ;;  %v1595_v50 = vld [vmem:[#allocation2 + $0x18] sm:$0xff]  ;;  %v4408_v10 = vpop.f32.mrf.mxu0  ;;  %v1112_v3 = vld [vmem:[#allocation2 + $0x68] sm:$0xff] }
 0x112   : > { %4580 = vmatmul.mubr.msk.bf16.gmra.mxu1 %vm438_vm0, %v5346_v15  ;;  %1439 = vst.msk [vmem:[#allocation2 + $0x50] sm:$0xff] %vm285_vm7, %v1407_v9  ;;  %v1405_v15 = vadd.f32 %v1302_v6, %v1107_v8  ;;  %1922 = vst.msk [vmem:[#allocation2] sm:$0xff] %vm285_vm7, %v1890_v7  ;;  %v1893_v33 = vadd.f32 %v4408_v10, %v1595_v50  ;;  %v1598_v42 = vld [vmem:[#allocation2 + $0x30] sm:$0xff] }
 0x113   : > { %4583 = vmatprep.mubr.msk.bf16.mxu1 %vm438_vm0, %v5381_v21  ;;  %v4382_v48 = vpop.f32.mrf.mxu1  ;;  %v1766_v19 = vpop.f32.mrf.mxu0  ;;  %v1596_v18 = vld [vmem:[#allocation2 + $0x20] sm:$0xff]  ;;  %v1117_v8 = vld [vmem:[#allocation2 + $0x90] sm:$0xff] }
 0x114   : > { %1437 = vst.msk [vmem:[#allocation2 + $0x40] sm:$0xff] %vm285_vm7, %v1405_v15  ;;  %v1408_v21 = vadd.f32 %v4382_v48, %v1110_v30  ;;  %1925 = vst.msk [vmem:[#allocation2 + $0x18] sm:$0xff] %vm285_vm7, %v1893_v33  ;;  %v1891_v63 = vadd.f32 %v1766_v19, %v1593_v29  ;;  %v1115_v30 = vld [vmem:[#allocation2 + $0x80] sm:$0xff] }
 0x115   : > { %v1305_v44 = vpop.f32.mrf.mxu1  ;;  %v4411_v53 = vpop.f32.mrf.mxu0 }
 0x116   : > { %1440 = vst.msk [vmem:[#allocation2 + $0x58] sm:$0xff] %vm285_vm7, %v1408_v21  ;;  %v1406_v14 = vadd.f32 %v1305_v44, %v1108_v46  ;;  %1923 = vst.msk [vmem:[#allocation2 + $0x8] sm:$0xff] %vm285_vm7, %v1891_v63  ;;  %v1896_v13 = vadd.f32 %v4411_v53, %v1598_v42  ;;  %v3079_v53 = vshrl.u32 %v5926_v60, 16 }
 0x117   : > { %v4385_v51 = vpop.f32.mrf.mxu1  ;;  %v1597_v31 = vld [vmem:[#allocation2 + $0x28] sm:$0xff] }
 0x118   : > { %4610 = vmatmul.mubr.msk.bf16.vlgmr.msra.gmra.mxu0 %vm438_vm0, %v5400_v52  ;;  %v1779_v52 = vpop.f32.mrf.mxu0  ;;  %1438 = vst.msk [vmem:[#allocation2 + $0x48] sm:$0xff] %vm285_vm7, %v1406_v14  ;;  %v1411_v23 = vadd.f32 %v4385_v51, %v1113_v37  ;;  %1928 = vst.msk [vmem:[#allocation2 + $0x30] sm:$0xff] %vm285_vm7, %v1896_v13  ;;  %v3082_v14 = vshll.u32 %v5926_v60, 16  ;;  %v3092_v51 = vshrl.u32 %v5929_v40, 16 }
 0x119   : > { %4613 = vmatprep.mubr.msk.bf16.mxu0 %vm438_vm0, %v5436_v34  ;;  %v1894_v27 = vadd.f32 %v1779_v52, %v1596_v18  ;;  %v1318_v1 = vpop.f32.mrf.mxu1  ;;  %v1599_v34 = vld [vmem:[#allocation2 + $0x38] sm:$0xff]  ;;  %v1602_v7 = vld [vmem:[#allocation2 + $0x50] sm:$0xff] }
 0x11a   : > { %4584 = vmatmul.mubr.msk.bf16.gmra.mxu1 %vm438_vm0, %v5411_v2  ;;  %v4412_v22 = vpop.f32.mrf.mxu0  ;;  %1443 = vst.msk [vmem:[#allocation2 + $0x70] sm:$0xff] %vm285_vm7, %v1411_v23  ;;  %v1409_v2 = vadd.f32 %v1318_v1, %v1111_v43 }
 0x11b   : > { %4587 = vmatprep.mubr.msk.bf16.mxu1 %vm438_vm0, %v5439_v62  ;;  %1926 = vst.msk [vmem:[#allocation2 + $0x20] sm:$0xff] %vm285_vm7, %v1894_v27  ;;  %v1897_v32 = vadd.f32 %v4412_v22, %v1599_v34  ;;  %v4386_v20 = vpop.f32.mrf.mxu1  ;;  %v1600_v15 = vld [vmem:[#allocation2 + $0x40] sm:$0xff]  ;;  %v1121_v27 = vld [vmem:[#allocation2 + $0xb0] sm:$0xff]  ;;  %v3081_v22 = vrot.slane %v3079_v53, 4 }
 0x11c   : > { %v1782_v26 = vpop.f32.mrf.mxu0  ;;  %1441 = vst.msk [vmem:[#allocation2 + $0x60] sm:$0xff] %vm285_vm7, %v1409_v2  ;;  %v1412_v62 = vadd.f32 %v4386_v20, %v1114_v17  ;;  %v3084_v2 = vrot.slane %v3082_v14, 5  ;;  %v3094_v20 = vrot.slane %v3092_v51, 4  ;;  %v1123_v53 = vld [vmem:[#allocation2 + $0xc0] sm:$0xff]  ;;  %v1126_v51 = vld [vmem:[#allocation2 + $0xd8] sm:$0xff] }
 0x11d   : > { %1929 = vst.msk [vmem:[#allocation2 + $0x38] sm:$0xff] %vm285_vm7, %v1897_v32  ;;  %v1895_v4 = vadd.f32 %v1782_v26, %v1597_v31  ;;  %v1321_v25 = vpop.f32.mrf.mxu1  ;;  %v1603_v29 = vld [vmem:[#allocation2 + $0x58] sm:$0xff]  ;;  %v1119_v31 = vld [vmem:[#allocation2 + $0xa0] sm:$0xff] }
 0x11e   : > { %1444 = vst.msk [vmem:[#allocation2 + $0x78] sm:$0xff] %vm285_vm7, %v1412_v62  ;;  %v1410_v9 = vadd.f32 %v1321_v25, %v1112_v3  ;;  %v6011_v3 = vld [vmem:[%s4882_s15 + $0xd4] sm:$0x1] }
 0x11f   : > { %1927 = vst.msk [vmem:[#allocation2 + $0x28] sm:$0xff] %vm285_vm7, %v1895_v4  ;;  %v4389_v6 = vpop.f32.mrf.mxu1  ;;  %v1601_v44 = vld [vmem:[#allocation2 + $0x48] sm:$0xff] }
 0x120   : > { %4614 = vmatmul.mubr.msk.bf16.gmra.mxu0 %vm438_vm0, %v5466_v36  ;;  %1442 = vst.msk [vmem:[#allocation2 + $0x68] sm:$0xff] %vm285_vm7, %v1410_v9  ;;  %v4415_v36 = vpop.f32.mrf.mxu0  ;;  %v1415_v10 = vadd.f32 %v4389_v6, %v1117_v8  ;;  %v3085_v6 = vor.u32 %v3084_v2, %v3081_v22  ;;  %v3377_v2 = vrot.slane %v5929_v40, 5 }
 0x121   : > { %4617 = vmatprep.mubr.msk.bf16.mxu0 %vm438_vm0, %v5492_v16  ;;  %v1900_v50 = vadd.f32 %v4415_v36, %v1602_v7  ;;  %v1334_v16 = vpop.f32.mrf.mxu1  ;;  %v1606_v52 = vld [vmem:[#allocation2 + $0x70] sm:$0xff]  ;;  %v1122_v7 = vld [vmem:[#allocation2 + $0xb8] sm:$0xff] }
 0x122   : > { %4588 = vmatmul.mubr.msk.bf16.gmra.mxu1 %vm438_vm0, %v5473_v55  ;;  %v1795_v33 = vpop.f32.mrf.mxu0  ;;  %1447 = vst.msk [vmem:[#allocation2 + $0x90] sm:$0xff] %vm285_vm7, %v1415_v10  ;;  %v1413_v55 = vadd.f32 %v1334_v16, %v1115_v30 }
 0x123   : > { %4591 = vmatprep.mubr.msk.bf16.mxu1 %vm438_vm0, %v5483_v61  ;;  %1932 = vst.msk [vmem:[#allocation2 + $0x50] sm:$0xff] %vm285_vm7, %v1900_v50  ;;  %v1898_v48 = vadd.f32 %v1795_v33, %v1600_v15  ;;  %v1118_v61 = vld [vmem:[#allocation2 + $0x98] sm:$0xff]  ;;  %v4390_v21 = vpop.f32.mrf.mxu1  ;;  %v1604_v1 = vld [vmem:[#allocation2 + $0x60] sm:$0xff]  ;;  %v1120_v33 = vld [vmem:[#allocation2 + $0xa8] sm:$0xff] }
 0x124   : > { %v4416_v19 = vpop.f32.mrf.mxu0  ;;  %1445 = vst.msk [vmem:[#allocation2 + $0x80] sm:$0xff] %vm285_vm7, %v1413_v55  ;;  %v1416_v46 = vadd.f32 %v4390_v21, %v1118_v61 }
 0x125   : > { %1930 = vst.msk [vmem:[#allocation2 + $0x40] sm:$0xff] %vm285_vm7, %v1898_v48  ;;  %v1901_v63 = vadd.f32 %v4416_v19, %v1603_v29  ;;  %v1337_v13 = vpop.f32.mrf.mxu1  ;;  %v1607_v62 = vld [vmem:[#allocation2 + $0x78] sm:$0xff]  ;;  %v3086_v29 = vrot.slane %v3085_v6, 4 }
 0x126   : > { %v1798_v42 = vpop.f32.mrf.mxu0  ;;  %1448 = vst.msk [vmem:[#allocation2 + $0x98] sm:$0xff] %vm285_vm7, %v1416_v46 }
 0x127   : > { %1933 = vst.msk [vmem:[#allocation2 + $0x58] sm:$0xff] %vm285_vm7, %v1901_v63  ;;  %v1899_v37 = vadd.f32 %v1798_v42, %v1601_v44  ;;  %v1605_v36 = vld [vmem:[#allocation2 + $0x68] sm:$0xff] }
 0x128   : > { %4618 = vmatmul.mubr.msk.bf16.gmra.mxu0 %vm438_vm0, %v5521_v45  ;;  %v1116_v45 = vld [vmem:[#allocation2 + $0x88] sm:$0xff]  ;;  %v4419_v23 = vpop.f32.mrf.mxu0 }
 0x129   : > { %4621 = vmatprep.mubr.msk.bf16.mxu0 %vm438_vm0, %v5550_v35  ;;  %v1414_v18 = vadd.f32 %v1337_v13, %v1116_v45  ;;  %v3088_v35 = vshll.u32 %v5929_v40, 16  ;;  %1931 = vst.msk [vmem:[#allocation2 + $0x48] sm:$0xff] %vm285_vm7, %v1899_v37  ;;  %v1610_v16 = vld [vmem:[#allocation2 + $0x90] sm:$0xff] }
 0x12a   : > { %4592 = vmatmul.mubr.msk.bf16.gmra.mxu1 %vm438_vm0, %v5531_v57  ;;  %v1904_v57 = vadd.f32 %v4419_v23, %v1606_v52  ;;  %v4393_v43 = vpop.f32.mrf.mxu1  ;;  %v1811_v34 = vpop.f32.mrf.mxu0 }
 0x12b   : > { %4595 = vmatprep.mubr.msk.bf16.mxu1 %vm438_vm0, %v5554_v5  ;;  %1446 = vst.msk [vmem:[#allocation2 + $0x88] sm:$0xff] %vm285_vm7, %v1414_v18  ;;  %v1419_v32 = vadd.f32 %v4393_v43, %v1121_v27  ;;  %v1902_v5 = vadd.f32 %v1811_v34, %v1604_v1  ;;  %v6006_v17 = vrot.slane %v3088_v35, 5  ;;  %v1608_v63 = vld [vmem:[#allocation2 + $0x80] sm:$0xff]  ;;  %v1124_v27 = vld [vmem:[#allocation2 + $0xc8] sm:$0xff] }
 0x12c   : > { %1936 = vst.msk [vmem:[#allocation2 + $0x70] sm:$0xff] %vm285_vm7, %v1904_v57  ;;  %v1350_v26 = vpop.f32.mrf.mxu1  ;;  %v4420_v4 = vpop.f32.mrf.mxu0 }
 0x12d   : > { %1451 = vst.msk [vmem:[#allocation2 + $0xb0] sm:$0xff] %vm285_vm7, %v1419_v32  ;;  %v1417_v25 = vadd.f32 %v1350_v26, %v1119_v31  ;;  %1934 = vst.msk [vmem:[#allocation2 + $0x60] sm:$0xff] %vm285_vm7, %v1902_v5  ;;  %v1905_v9 = vadd.f32 %v4420_v4, %v1607_v62  ;;  %v3095_v15 = vor.u32 %v3094_v20, %v6006_v17  ;;  %v1611_v45 = vld [vmem:[#allocation2 + $0x98] sm:$0xff]  ;;  %v1129_v32 = vld [vmem:[#allocation2 + $0xf0] sm:$0xff] }
 0x12e   : > { %v1814_v8 = vpop.f32.mrf.mxu0  ;;  %v1127_v62 = vld [vmem:[#allocation2 + $0xe0] sm:$0xff] }
 0x12f   : > { %1449 = vst.msk [vmem:[#allocation2 + $0xa0] sm:$0xff] %vm285_vm7, %v1417_v25  ;;  %1937 = vst.msk [vmem:[#allocation2 + $0x78] sm:$0xff] %vm285_vm7, %v1905_v9  ;;  %v1903_v10 = vadd.f32 %v1814_v8, %v1605_v36  ;;  %v3096_v19 = vrot.slane %v3095_v15, 4  ;;  %v4136_v9 = vrot.slane %v5926_v60, 9  ;;  %v1130_v36 = vld [vmem:[#allocation2 + $0xf8] sm:$0xff]  ;;  %v1128_v60 = vld [vmem:[#allocation2 + $0xe8] sm:$0xff] }
 0x130   : > { %4622 = vmatmul.mubr.msk.bf16.gmra.mxu0 %vm438_vm0, %v5585_v11  ;;  %v4394_v11 = vpop.f32.mrf.mxu1 }
 0x131   : > { %4625 = vmatprep.mubr.msk.bf16.mxu0 %vm438_vm0, %v5613_v54  ;;  %v1420_v50 = vadd.f32 %v4394_v11, %v1122_v7  ;;  %v3098_v54 = vshll.u32 %v6011_v3, 16  ;;  %1935 = vst.msk [vmem:[#allocation2 + $0x68] sm:$0xff] %vm285_vm7, %v1903_v10  ;;  %v3379_v7 = vrot.slane %v3377_v2, 4  ;;  %v3380_v11 = vrot.slane %v6011_v3, 5 }
 0x132   : > { %4596 = vmatmul.mubr.msk.bf16.gmra.mxu1 %vm438_vm0, %v5597_v39  ;;  %v1353_v39 = vpop.f32.mrf.mxu1  ;;  %v1609_v35 = vld [vmem:[#allocation2 + $0x88] sm:$0xff] }
 0x133   : > { %4599 = vmatprep.mubr.msk.bf16.mxu1 %vm438_vm0, %v5624_v59  ;;  %1452 = vst.msk [vmem:[#allocation2 + $0xb8] sm:$0xff] %vm285_vm7, %v1420_v50  ;;  %v1418_v30 = vadd.f32 %v1353_v39, %v1120_v33  ;;  %v3100_v61 = vrot.slane %v3098_v54, 5  ;;  %v1125_v59 = vld [vmem:[#allocation2 + $0xd0] sm:$0xff] }
 0x134   : > { %v4423_v48 = vpop.f32.mrf.mxu0  ;;  %v1614_v0 = vld [vmem:[#allocation2 + $0xb0] sm:$0xff] }
 0x135   : > { %1450 = vst.msk [vmem:[#allocation2 + $0xa8] sm:$0xff] %vm285_vm7, %v1418_v30  ;;  %v1908_v55 = vadd.f32 %v4423_v48, %v1610_v16  ;;  %v3378_v16 = vsel %vm5095_vm6, %v4136_v9, %v3377_v2  ;;  %v3381_v48 = vsel %vm5095_vm6, %v3379_v7, %v3380_v11  ;;  %v1964_v11 = vld [vmem:[#allocation2 + $0x50] sm:$0xff] }
 0x136   : > { %v1827_v46 = vpop.f32.mrf.mxu0 }
 0x137   : > { %v4397_v21 = vpop.f32.mrf.mxu1  ;;  %1940 = vst.msk [vmem:[#allocation2 + $0x90] sm:$0xff] %vm285_vm7, %v1908_v55  ;;  %v1906_v42 = vadd.f32 %v1827_v46, %v1608_v63  ;;  %v1956_v55 = vld [vmem:[#allocation2 + $0x10] sm:$0xff] }
 0x138   : > { %4626 = vmatmul.mubr.msk.bf16.gmra.mxu0 %vm438_vm0, %v5639_v38  ;;  %v1423_v44 = vadd.f32 %v4397_v21, %v1125_v59  ;;  %v4424_v13 = vpop.f32.mrf.mxu0  ;;  %v1954_v21 = vld [vmem:[#allocation2] sm:$0xff] }
 0x139   : > { %4629 = vmatprep.mubr.msk.bf16.mxu0 %vm438_vm0, %v5647_v12  ;;  %v1366_v14 = vpop.f32.mrf.mxu1  ;;  %1938 = vst.msk [vmem:[#allocation2 + $0x80] sm:$0xff] %vm285_vm7, %v1906_v42  ;;  %v1909_v38 = vadd.f32 %v4424_v13, %v1611_v45  ;;  %v3091_v12 = vsel %vm5068_vm5, %v3086_v29, %v6006_v17  ;;  %v1612_v17 = vld [vmem:[#allocation2 + $0xa0] sm:$0xff] }
 0x13a   : > { %4600 = vmatmul.mubr.msk.bf16.gmra.mxu1 %vm438_vm0, %v5649_v47  ;;  %1455 = vst.msk [vmem:[#allocation2 + $0xd0] sm:$0xff] %vm285_vm7, %v1423_v44  ;;  %v1421_v37 = vadd.f32 %v1366_v14, %v1123_v53  ;;  %v3101_v47 = vsel %vm5068_vm5, %v3096_v19, %v3100_v61  ;;  %v1830_v52 = vpop.f32.mrf.mxu0  ;;  %v1615_v4 = vld [vmem:[#allocation2 + $0xb8] sm:$0xff]  ;;  %v4139_v44 = vcombine.low %v3378_v16, %v3381_v48 }
 0x13b   : > { %4603 = vmatprep.mubr.msk.bf16.mxu1 %vm438_vm0, %v5823_v49  ;;  %v4398_v18 = vpop.f32.mrf.mxu1  ;;  %1941 = vst.msk [vmem:[#allocation2 + $0x98] sm:$0xff] %vm285_vm7, %v1909_v38  ;;  %v1907_v57 = vadd.f32 %v1830_v52, %v1609_v35  ;;  %v4118_v49 = vcombine.low %v3091_v12, %v3101_v47  ;;  %v1957_v53 = vld [vmem:[#allocation2 + $0x18] sm:$0xff]  ;;  %v1955_v12 = vld [vmem:[#allocation2 + $0x8] sm:$0xff] }
 0x13c   : > { %1453 = vst.msk [vmem:[#allocation2 + $0xc0] sm:$0xff] %vm285_vm7, %v1421_v37  ;;  %v1424_v23 = vadd.f32 %v4398_v18, %v1126_v51  ;;  %v1613_v6 = vld [vmem:[#allocation2 + $0xa8] sm:$0xff] }
 0x13d   : > { %v1369_v43 = vpop.f32.mrf.mxu1  ;;  %1939 = vst.msk [vmem:[#allocation2 + $0x88] sm:$0xff] %vm285_vm7, %v1907_v57 }
 0x13e   : > { %1456 = vst.msk [vmem:[#allocation2 + $0xd8] sm:$0xff] %vm285_vm7, %v1424_v23  ;;  %v1422_v1 = vadd.f32 %v1369_v43, %v1124_v27  ;;  %v1960_v23 = vld [vmem:[#allocation2 + $0x30] sm:$0xff] }
 0x140   : > { %v4427_v34 = vpop.f32.mrf.mxu0  ;;  %4630 = vmatmul.mubr.msk.bf16.gmra.mxu0 %vm438_vm0, %v5668_v58  ;;  %1454 = vst.msk [vmem:[#allocation2 + $0xc8] sm:$0xff] %vm285_vm7, %v1422_v1 }
 0x141   : > { %v1912_v22 = vadd.f32 %v4427_v34, %v1614_v0  ;;  %4633 = vmatprep.mubr.msk.bf16.mxu0 %vm438_vm0, %v5675_v41  ;;  %v4401_v5 = vpop.f32.mrf.mxu1  ;;  %v1618_v33 = vld [vmem:[#allocation2 + $0xd0] sm:$0xff]  ;;  %v1958_v0 = vld [vmem:[#allocation2 + $0x20] sm:$0xff] }
 0x142   : > { %4604 = vmatmul.mubr.msk.bf16.gmra.mxu1 %vm438_vm0, %v4118_v49  ;;  %v1843_v20 = vpop.f32.mrf.mxu0  ;;  %v1427_v31 = vadd.f32 %v4401_v5, %v1129_v32 }
 0x143   : > { %1944 = vst.msk [vmem:[#allocation2 + $0xb0] sm:$0xff] %vm285_vm7, %v1912_v22  ;;  %v1910_v26 = vadd.f32 %v1843_v20, %v1612_v17  ;;  %v1382_v58 = vpop.f32.mrf.mxu1  ;;  %v1616_v19 = vld [vmem:[#allocation2 + $0xc0] sm:$0xff]  ;;  %v1961_v17 = vld [vmem:[#allocation2 + $0x38] sm:$0xff] }
 0x144   : > { %v4428_v25 = vpop.f32.mrf.mxu0  ;;  %1459 = vst.msk [vmem:[#allocation2 + $0xf0] sm:$0xff] %vm285_vm7, %v1427_v31  ;;  %v1425_v41 = vadd.f32 %v1382_v58, %v1127_v62 }
 0x145   : > { %1942 = vst.msk [vmem:[#allocation2 + $0xa0] sm:$0xff] %vm285_vm7, %v1910_v26  ;;  %v1913_v40 = vadd.f32 %v4428_v25, %v1615_v4  ;;  %v4402_v8 = vpop.f32.mrf.mxu1  ;;  %v1619_v46 = vld [vmem:[#allocation2 + $0xd8] sm:$0xff]  ;;  %v1959_v4 = vld [vmem:[#allocation2 + $0x28] sm:$0xff] }
 0x146   : > { %v1846_v50 = vpop.f32.mrf.mxu0  ;;  %1457 = vst.msk [vmem:[#allocation2 + $0xe0] sm:$0xff] %vm285_vm7, %v1425_v41  ;;  %v1428_v10 = vadd.f32 %v4402_v8, %v1130_v36 }
 0x147   : > { %1945 = vst.msk [vmem:[#allocation2 + $0xb8] sm:$0xff] %vm285_vm7, %v1913_v40  ;;  %v1911_v15 = vadd.f32 %v1846_v50, %v1613_v6  ;;  %v1385_v54 = vpop.f32.mrf.mxu1  ;;  %v1617_v45 = vld [vmem:[#allocation2 + $0xc8] sm:$0xff] }
 0x148   : > { %v4431_v39 = vpop.f32.mrf.mxu0  ;;  %4634 = vmatmul.mubr.msk.bf16.gmra.mxu0 %vm438_vm0, %v5729_v28  ;;  %1460 = vst.msk [vmem:[#allocation2 + $0xf8] sm:$0xff] %vm285_vm7, %v1428_v10  ;;  %v1426_v3 = vadd.f32 %v1385_v54, %v1128_v60 }
 0x149   : > { %1943 = vst.msk [vmem:[#allocation2 + $0xa8] sm:$0xff] %vm285_vm7, %v1911_v15  ;;  %v1916_v30 = vadd.f32 %v4431_v39, %v1618_v33  ;;  %4637 = vmatprep.mubr.msk.bf16.mxu0 %vm438_vm0, %v5899_v24  ;;  %v4441_v29 = vpop.f32.mrf.mxu1  ;;  %v1962_v15 = vld [vmem:[#allocation2 + $0x40] sm:$0xff] }
 0x14a   : > { %v1859_v61 = vpop.f32.mrf.mxu0  ;;  %1458 = vst.msk [vmem:[#allocation2 + $0xe8] sm:$0xff] %vm285_vm7, %v1426_v3  ;;  %v2166_v28 = vadd.f32 %v4441_v29, %v1956_v55 }
 0x14b   : > { %1948 = vst.msk [vmem:[#allocation2 + $0xd0] sm:$0xff] %vm285_vm7, %v1916_v30  ;;  %v1914_v59 = vadd.f32 %v1859_v61, %v1616_v19  ;;  %v2037_v63 = vpop.f32.mrf.mxu1  ;;  %v1622_v51 = vld [vmem:[#allocation2 + $0xf0] sm:$0xff]  ;;  %v1965_v30 = vld [vmem:[#allocation2 + $0x58] sm:$0xff]  ;;  %v1963_v61 = vld [vmem:[#allocation2 + $0x48] sm:$0xff] }
 0x14c   : > { %v4432_v24 = vpop.f32.mrf.mxu0  ;;  %2198 = vst.msk [vmem:[#allocation2 + $0x10] sm:$0xff] %vm285_vm7, %v2166_v28  ;;  %v2164_v56 = vadd.f32 %v2037_v63, %v1954_v21 }
 0x14d   : > { %1946 = vst.msk [vmem:[#allocation2 + $0xc0] sm:$0xff] %vm285_vm7, %v1914_v59  ;;  %v1917_v42 = vadd.f32 %v4432_v24, %v1619_v46  ;;  %v4442_v14 = vpop.f32.mrf.mxu1  ;;  %v1620_v27 = vld [vmem:[#allocation2 + $0xe0] sm:$0xff]  ;;  %v1968_v24 = vld [vmem:[#allocation2 + $0x70] sm:$0xff] }
 0x14e   : > { %v1862_v13 = vpop.f32.mrf.mxu0  ;;  %2196 = vst.msk [vmem:[#allocation2] sm:$0xff] %vm285_vm7, %v2164_v56  ;;  %v2167_v37 = vadd.f32 %v4442_v14, %v1957_v53 }
 0x14f   : > { %1949 = vst.msk [vmem:[#allocation2 + $0xd8] sm:$0xff] %vm285_vm7, %v1917_v42  ;;  %v1915_v38 = vadd.f32 %v1862_v13, %v1617_v45  ;;  %v2040_v47 = vpop.f32.mrf.mxu1  ;;  %v1623_v22 = vld [vmem:[#allocation2 + $0xf8] sm:$0xff]  ;;  %v1966_v45 = vld [vmem:[#allocation2 + $0x60] sm:$0xff] }
 0x150   : > { %v4435_v18 = vpop.f32.mrf.mxu0  ;;  %4638 = vmatmul.mubr.msk.bf16.gmra.mxu0 %vm438_vm0, %v4139_v44  ;;  %2199 = vst.msk [vmem:[#allocation2 + $0x18] sm:$0xff] %vm285_vm7, %v2167_v37  ;;  %v2165_v35 = vadd.f32 %v2040_v47, %v1955_v12 }
 0x151   : > { %1947 = vst.msk [vmem:[#allocation2 + $0xc8] sm:$0xff] %vm285_vm7, %v1915_v38  ;;  %v1920_v52 = vadd.f32 %v4435_v18, %v1622_v51  ;;  %v4445_v57 = vpop.f32.mrf.mxu1  ;;  %v1621_v31 = vld [vmem:[#allocation2 + $0xe8] sm:$0xff]  ;;  %v1969_v51 = vld [vmem:[#allocation2 + $0x78] sm:$0xff] }
 0x152   : > { %v1875_v43 = vpop.f32.mrf.mxu0  ;;  %2197 = vst.msk [vmem:[#allocation2 + $0x8] sm:$0xff] %vm285_vm7, %v2165_v35  ;;  %v2170_v49 = vadd.f32 %v4445_v57, %v1960_v23 }
 0x153   : > { %1952 = vst.msk [vmem:[#allocation2 + $0xf0] sm:$0xff] %vm285_vm7, %v1920_v52  ;;  %v1918_v1 = vadd.f32 %v1875_v43, %v1620_v27  ;;  %v2053_v34 = vpop.f32.mrf.mxu1  ;;  %v2254_v9 = vld [vmem:[#allocation2 + $0x10] sm:$0xff]  ;;  %v1967_v27 = vld [vmem:[#allocation2 + $0x68] sm:$0xff] }
 0x154   : > { %v4436_v2 = vpop.f32.mrf.mxu0  ;;  %2202 = vst.msk [vmem:[#allocation2 + $0x30] sm:$0xff] %vm285_vm7, %v2170_v49  ;;  %v2168_v32 = vadd.f32 %v2053_v34, %v1958_v0 }
 0x155   : > { %1950 = vst.msk [vmem:[#allocation2 + $0xe0] sm:$0xff] %vm285_vm7, %v1918_v1  ;;  %v1921_v5 = vadd.f32 %v4436_v2, %v1623_v22  ;;  %v4446_v20 = vpop.f32.mrf.mxu1  ;;  %v2252_v8 = vld [vmem:[#allocation2] sm:$0xff]  ;;  %v1972_v22 = vld [vmem:[#allocation2 + $0x90] sm:$0xff] }
 0x156   : > { %v1878_v26 = vpop.f32.mrf.mxu0  ;;  %2200 = vst.msk [vmem:[#allocation2 + $0x20] sm:$0xff] %vm285_vm7, %v2168_v32  ;;  %v2171_v62 = vadd.f32 %v4446_v20, %v1961_v17 }
 0x157   : > { %1953 = vst.msk [vmem:[#allocation2 + $0xf8] sm:$0xff] %vm285_vm7, %v1921_v5  ;;  %v1919_v58 = vadd.f32 %v1878_v26, %v1621_v31  ;;  %v2056_v25 = vpop.f32.mrf.mxu1  ;;  %v2255_v54 = vld [vmem:[#allocation2 + $0x18] sm:$0xff]  ;;  %v1970_v31 = vld [vmem:[#allocation2 + $0x80] sm:$0xff] }
 0x158   : > { %v4475_v41 = vpop.f32.mrf.mxu0  ;;  %2203 = vst.msk [vmem:[#allocation2 + $0x38] sm:$0xff] %vm285_vm7, %v2171_v62  ;;  %v2169_v40 = vadd.f32 %v2056_v25, %v1959_v4 }
 0x159   : > { %1951 = vst.msk [vmem:[#allocation2 + $0xe8] sm:$0xff] %vm285_vm7, %v1919_v58  ;;  %v2462_v7 = vadd.f32 %v4475_v41, %v2254_v9  ;;  %v2253_v48 = vld [vmem:[#allocation2 + $0x8] sm:$0xff]  ;;  %v1973_v9 = vld [vmem:[#allocation2 + $0x98] sm:$0xff] }
 0x15a   : > { %v4449_v36 = vpop.f32.mrf.mxu1  ;;  %v2333_v6 = vpop.f32.mrf.mxu0  ;;  %2201 = vst.msk [vmem:[#allocation2 + $0x28] sm:$0xff] %vm285_vm7, %v2169_v40 }
 0x15b   : > { %v2174_v50 = vadd.f32 %v4449_v36, %v1964_v11  ;;  %2494 = vst.msk [vmem:[#allocation2 + $0x10] sm:$0xff] %vm285_vm7, %v2462_v7  ;;  %v2460_v10 = vadd.f32 %v2333_v6, %v2252_v8  ;;  %v2258_v59 = vld [vmem:[#allocation2 + $0x30] sm:$0xff]  ;;  %v1971_v8 = vld [vmem:[#allocation2 + $0x88] sm:$0xff] }
 0x15c   : > { %v2069_v60 = vpop.f32.mrf.mxu1  ;;  %v4476_v33 = vpop.f32.mrf.mxu0 }
 0x15d   : > { %2206 = vst.msk [vmem:[#allocation2 + $0x50] sm:$0xff] %vm285_vm7, %v2174_v50  ;;  %v2172_v39 = vadd.f32 %v2069_v60, %v1962_v15  ;;  %2492 = vst.msk [vmem:[#allocation2] sm:$0xff] %vm285_vm7, %v2460_v10  ;;  %v2463_v3 = vadd.f32 %v4476_v33, %v2255_v54  ;;  %v2256_v56 = vld [vmem:[#allocation2 + $0x20] sm:$0xff]  ;;  %v1976_v54 = vld [vmem:[#allocation2 + $0xb0] sm:$0xff] }
 0x15e   : > { %v4450_v16 = vpop.f32.mrf.mxu1  ;;  %v2336_v55 = vpop.f32.mrf.mxu0 }
 0x15f   : > { %2204 = vst.msk [vmem:[#allocation2 + $0x40] sm:$0xff] %vm285_vm7, %v2172_v39  ;;  %v2175_v29 = vadd.f32 %v4450_v16, %v1965_v30  ;;  %2495 = vst.msk [vmem:[#allocation2 + $0x18] sm:$0xff] %vm285_vm7, %v2463_v3  ;;  %v2461_v19 = vadd.f32 %v2336_v55, %v2253_v48  ;;  %v2259_v37 = vld [vmem:[#allocation2 + $0x38] sm:$0xff]  ;;  %v1974_v48 = vld [vmem:[#allocation2 + $0xa0] sm:$0xff] }
 0x160   : > { %v2072_v28 = vpop.f32.mrf.mxu1  ;;  %v4479_v21 = vpop.f32.mrf.mxu0 }
 0x161   : > { %2207 = vst.msk [vmem:[#allocation2 + $0x58] sm:$0xff] %vm285_vm7, %v2175_v29  ;;  %v2173_v63 = vadd.f32 %v2072_v28, %v1963_v61  ;;  %2493 = vst.msk [vmem:[#allocation2 + $0x8] sm:$0xff] %vm285_vm7, %v2461_v19  ;;  %v2466_v46 = vadd.f32 %v4479_v21, %v2258_v59  ;;  %v2257_v35 = vld [vmem:[#allocation2 + $0x28] sm:$0xff]  ;;  %v1977_v59 = vld [vmem:[#allocation2 + $0xb8] sm:$0xff] }
 0x162   : > { %v4453_v44 = vpop.f32.mrf.mxu1  ;;  %v2349_v42 = vpop.f32.mrf.mxu0 }
 0x163   : > { %2205 = vst.msk [vmem:[#allocation2 + $0x48] sm:$0xff] %vm285_vm7, %v2173_v63  ;;  %v2178_v53 = vadd.f32 %v4453_v44, %v1968_v24  ;;  %2498 = vst.msk [vmem:[#allocation2 + $0x30] sm:$0xff] %vm285_vm7, %v2466_v46  ;;  %v2464_v14 = vadd.f32 %v2349_v42, %v2256_v56  ;;  %v1975_v56 = vld [vmem:[#allocation2 + $0xa8] sm:$0xff] }
 0x164   : > { %v2085_v13 = vpop.f32.mrf.mxu1  ;;  %v4480_v38 = vpop.f32.mrf.mxu0  ;;  %v2262_v49 = vld [vmem:[#allocation2 + $0x50] sm:$0xff] }
 0x165   : > { %2210 = vst.msk [vmem:[#allocation2 + $0x70] sm:$0xff] %vm285_vm7, %v2178_v53  ;;  %v2176_v12 = vadd.f32 %v2085_v13, %v1966_v45  ;;  %2496 = vst.msk [vmem:[#allocation2 + $0x20] sm:$0xff] %vm285_vm7, %v2464_v14  ;;  %v2467_v47 = vadd.f32 %v4480_v38, %v2259_v37  ;;  %v1980_v37 = vld [vmem:[#allocation2 + $0xd0] sm:$0xff] }
 0x166   : > { %v4454_v18 = vpop.f32.mrf.mxu1  ;;  %v2352_v52 = vpop.f32.mrf.mxu0  ;;  %v2260_v32 = vld [vmem:[#allocation2 + $0x40] sm:$0xff] }
 0x167   : > { %2208 = vst.msk [vmem:[#allocation2 + $0x60] sm:$0xff] %vm285_vm7, %v2176_v12  ;;  %v2179_v23 = vadd.f32 %v4454_v18, %v1969_v51  ;;  %2499 = vst.msk [vmem:[#allocation2 + $0x38] sm:$0xff] %vm285_vm7, %v2467_v47  ;;  %v2465_v57 = vadd.f32 %v2352_v52, %v2257_v35  ;;  %v1978_v35 = vld [vmem:[#allocation2 + $0xc0] sm:$0xff] }
 0x168   : > { %v2088_v43 = vpop.f32.mrf.mxu1  ;;  %v4483_v1 = vpop.f32.mrf.mxu0  ;;  %v2263_v62 = vld [vmem:[#allocation2 + $0x58] sm:$0xff] }
 0x169   : > { %2211 = vst.msk [vmem:[#allocation2 + $0x78] sm:$0xff] %vm285_vm7, %v2179_v23  ;;  %v2177_v0 = vadd.f32 %v2088_v43, %v1967_v27  ;;  %2497 = vst.msk [vmem:[#allocation2 + $0x28] sm:$0xff] %vm285_vm7, %v2465_v57  ;;  %v2470_v34 = vadd.f32 %v4483_v1, %v2262_v49  ;;  %v1981_v49 = vld [vmem:[#allocation2 + $0xd8] sm:$0xff] }
 0x16a   : > { %v4457_v2 = vpop.f32.mrf.mxu1  ;;  %v2365_v5 = vpop.f32.mrf.mxu0  ;;  %v2261_v40 = vld [vmem:[#allocation2 + $0x48] sm:$0xff] }
 0x16b   : > { %2209 = vst.msk [vmem:[#allocation2 + $0x68] sm:$0xff] %vm285_vm7, %v2177_v0  ;;  %v2182_v17 = vadd.f32 %v4457_v2, %v1972_v22  ;;  %2502 = vst.msk [vmem:[#allocation2 + $0x50] sm:$0xff] %vm285_vm7, %v2470_v34  ;;  %v2468_v20 = vadd.f32 %v2365_v5, %v2260_v32  ;;  %v1979_v32 = vld [vmem:[#allocation2 + $0xc8] sm:$0xff] }
 0x16c   : > { %v2101_v26 = vpop.f32.mrf.mxu1  ;;  %v4484_v58 = vpop.f32.mrf.mxu0  ;;  %v2266_v50 = vld [vmem:[#allocation2 + $0x70] sm:$0xff] }
 0x16d   : > { %2214 = vst.msk [vmem:[#allocation2 + $0x90] sm:$0xff] %vm285_vm7, %v2182_v17  ;;  %v2180_v4 = vadd.f32 %v2101_v26, %v1970_v31  ;;  %2500 = vst.msk [vmem:[#allocation2 + $0x40] sm:$0xff] %vm285_vm7, %v2468_v20  ;;  %v2471_v25 = vadd.f32 %v4484_v58, %v2263_v62  ;;  %v1984_v62 = vld [vmem:[#allocation2 + $0xf0] sm:$0xff] }
 0x16e   : > { %v4458_v41 = vpop.f32.mrf.mxu1  ;;  %v2368_v7 = vpop.f32.mrf.mxu0  ;;  %v2264_v39 = vld [vmem:[#allocation2 + $0x60] sm:$0xff] }
 0x16f   : > { %2212 = vst.msk [vmem:[#allocation2 + $0x80] sm:$0xff] %vm285_vm7, %v2180_v4  ;;  %v2183_v11 = vadd.f32 %v4458_v41, %v1973_v9  ;;  %2503 = vst.msk [vmem:[#allocation2 + $0x58] sm:$0xff] %vm285_vm7, %v2471_v25  ;;  %v2469_v36 = vadd.f32 %v2368_v7, %v2261_v40  ;;  %v1982_v40 = vld [vmem:[#allocation2 + $0xe0] sm:$0xff] }
 0x170   : > { %v2104_v6 = vpop.f32.mrf.mxu1  ;;  %v4487_v10 = vpop.f32.mrf.mxu0  ;;  %v2267_v29 = vld [vmem:[#allocation2 + $0x78] sm:$0xff] }
 0x171   : > { %2215 = vst.msk [vmem:[#allocation2 + $0x98] sm:$0xff] %vm285_vm7, %v2183_v11  ;;  %v2181_v15 = vadd.f32 %v2104_v6, %v1971_v8  ;;  %2501 = vst.msk [vmem:[#allocation2 + $0x48] sm:$0xff] %vm285_vm7, %v2469_v36  ;;  %v2474_v60 = vadd.f32 %v4487_v10, %v2266_v50  ;;  %v1985_v50 = vld [vmem:[#allocation2 + $0xf8] sm:$0xff] }
 0x172   : > { %v4461_v33 = vpop.f32.mrf.mxu1  ;;  %v2381_v3 = vpop.f32.mrf.mxu0  ;;  %v2265_v63 = vld [vmem:[#allocation2 + $0x68] sm:$0xff] }
 0x173   : > { %2213 = vst.msk [vmem:[#allocation2 + $0x88] sm:$0xff] %vm285_vm7, %v2181_v15  ;;  %v2186_v30 = vadd.f32 %v4461_v33, %v1976_v54  ;;  %2506 = vst.msk [vmem:[#allocation2 + $0x70] sm:$0xff] %vm285_vm7, %v2474_v60  ;;  %v2472_v16 = vadd.f32 %v2381_v3, %v2264_v39  ;;  %v1983_v39 = vld [vmem:[#allocation2 + $0xe8] sm:$0xff] }
 0x174   : > { %v2117_v55 = vpop.f32.mrf.mxu1  ;;  %v4488_v19 = vpop.f32.mrf.mxu0  ;;  %v2270_v53 = vld [vmem:[#allocation2 + $0x90] sm:$0xff] }
 0x175   : > { %2218 = vst.msk [vmem:[#allocation2 + $0xb0] sm:$0xff] %vm285_vm7, %v2186_v30  ;;  %v2184_v61 = vadd.f32 %v2117_v55, %v1974_v48  ;;  %2504 = vst.msk [vmem:[#allocation2 + $0x60] sm:$0xff] %vm285_vm7, %v2472_v16  ;;  %v2475_v28 = vadd.f32 %v4488_v19, %v2267_v29  ;;  %v2534_v29 = vld [vmem:[#allocation2 + $0x10] sm:$0xff] }
 0x176   : > { %v4462_v21 = vpop.f32.mrf.mxu1  ;;  %v2384_v46 = vpop.f32.mrf.mxu0  ;;  %v2268_v12 = vld [vmem:[#allocation2 + $0x80] sm:$0xff] }
 0x177   : > { %2216 = vst.msk [vmem:[#allocation2 + $0xa0] sm:$0xff] %vm285_vm7, %v2184_v61  ;;  %v2187_v24 = vadd.f32 %v4462_v21, %v1977_v59  ;;  %2507 = vst.msk [vmem:[#allocation2 + $0x78] sm:$0xff] %vm285_vm7, %v2475_v28  ;;  %v2473_v44 = vadd.f32 %v2384_v46, %v2265_v63  ;;  %v2532_v63 = vld [vmem:[#allocation2] sm:$0xff] }
 0x178   : > { %v2120_v42 = vpop.f32.mrf.mxu1  ;;  %v4491_v14 = vpop.f32.mrf.mxu0  ;;  %v2271_v23 = vld [vmem:[#allocation2 + $0x98] sm:$0xff] }
 0x179   : > { %2219 = vst.msk [vmem:[#allocation2 + $0xb8] sm:$0xff] %vm285_vm7, %v2187_v24  ;;  %v2185_v45 = vadd.f32 %v2120_v42, %v1975_v56  ;;  %2505 = vst.msk [vmem:[#allocation2 + $0x68] sm:$0xff] %vm285_vm7, %v2473_v44  ;;  %v2478_v13 = vadd.f32 %v4491_v14, %v2270_v53  ;;  %v2535_v53 = vld [vmem:[#allocation2 + $0x18] sm:$0xff] }
 0x17a   : > { %v4465_v38 = vpop.f32.mrf.mxu1  ;;  %v2397_v47 = vpop.f32.mrf.mxu0  ;;  %v2269_v0 = vld [vmem:[#allocation2 + $0x88] sm:$0xff] }
 0x17b   : > { %2217 = vst.msk [vmem:[#allocation2 + $0xa8] sm:$0xff] %vm285_vm7, %v2185_v45  ;;  %v2190_v51 = vadd.f32 %v4465_v38, %v1980_v37  ;;  %2510 = vst.msk [vmem:[#allocation2 + $0x90] sm:$0xff] %vm285_vm7, %v2478_v13  ;;  %v2476_v18 = vadd.f32 %v2397_v47, %v2268_v12  ;;  %v2533_v12 = vld [vmem:[#allocation2 + $0x8] sm:$0xff] }
 0x17c   : > { %v2133_v52 = vpop.f32.mrf.mxu1  ;;  %v4492_v57 = vpop.f32.mrf.mxu0  ;;  %v2274_v17 = vld [vmem:[#allocation2 + $0xb0] sm:$0xff] }
 0x17d   : > { %2222 = vst.msk [vmem:[#allocation2 + $0xd0] sm:$0xff] %vm285_vm7, %v2190_v51  ;;  %v2188_v27 = vadd.f32 %v2133_v52, %v1978_v35  ;;  %2508 = vst.msk [vmem:[#allocation2 + $0x80] sm:$0xff] %vm285_vm7, %v2476_v18  ;;  %v2479_v43 = vadd.f32 %v4492_v57, %v2271_v23  ;;  %v2538_v23 = vld [vmem:[#allocation2 + $0x30] sm:$0xff] }
 0x17e   : > { %v4466_v1 = vpop.f32.mrf.mxu1  ;;  %v2400_v34 = vpop.f32.mrf.mxu0  ;;  %v2272_v4 = vld [vmem:[#allocation2 + $0xa0] sm:$0xff] }
 0x17f   : > { %2220 = vst.msk [vmem:[#allocation2 + $0xc0] sm:$0xff] %vm285_vm7, %v2188_v27  ;;  %v2191_v22 = vadd.f32 %v4466_v1, %v1981_v49  ;;  %2511 = vst.msk [vmem:[#allocation2 + $0x98] sm:$0xff] %vm285_vm7, %v2479_v43  ;;  %v2477_v2 = vadd.f32 %v2400_v34, %v2269_v0  ;;  %v2536_v0 = vld [vmem:[#allocation2 + $0x20] sm:$0xff] }
 0x180   : > { %v2136_v5 = vpop.f32.mrf.mxu1  ;;  %v4495_v20 = vpop.f32.mrf.mxu0  ;;  %v2275_v11 = vld [vmem:[#allocation2 + $0xb8] sm:$0xff] }
 0x181   : > { %2223 = vst.msk [vmem:[#allocation2 + $0xd8] sm:$0xff] %vm285_vm7, %v2191_v22  ;;  %v2189_v31 = vadd.f32 %v2136_v5, %v1979_v32  ;;  %2509 = vst.msk [vmem:[#allocation2 + $0x88] sm:$0xff] %vm285_vm7, %v2477_v2  ;;  %v2482_v26 = vadd.f32 %v4495_v20, %v2274_v17  ;;  %v2539_v17 = vld [vmem:[#allocation2 + $0x38] sm:$0xff] }
 0x182   : > { %v4469_v58 = vpop.f32.mrf.mxu1  ;;  %v2413_v25 = vpop.f32.mrf.mxu0  ;;  %v2273_v15 = vld [vmem:[#allocation2 + $0xa8] sm:$0xff] }
 0x183   : > { %2221 = vst.msk [vmem:[#allocation2 + $0xc8] sm:$0xff] %vm285_vm7, %v2189_v31  ;;  %v2194_v9 = vadd.f32 %v4469_v58, %v1984_v62  ;;  %2514 = vst.msk [vmem:[#allocation2 + $0xb0] sm:$0xff] %vm285_vm7, %v2482_v26  ;;  %v2480_v41 = vadd.f32 %v2413_v25, %v2272_v4  ;;  %v2537_v4 = vld [vmem:[#allocation2 + $0x28] sm:$0xff] }
 0x184   : > { %v2149_v7 = vpop.f32.mrf.mxu1  ;;  %v4496_v36 = vpop.f32.mrf.mxu0  ;;  %v2278_v30 = vld [vmem:[#allocation2 + $0xd0] sm:$0xff] }
 0x185   : > { %2226 = vst.msk [vmem:[#allocation2 + $0xf0] sm:$0xff] %vm285_vm7, %v2194_v9  ;;  %v2192_v8 = vadd.f32 %v2149_v7, %v1982_v40  ;;  %2512 = vst.msk [vmem:[#allocation2 + $0xa0] sm:$0xff] %vm285_vm7, %v2480_v41  ;;  %v2483_v6 = vadd.f32 %v4496_v36, %v2275_v11  ;;  %v2542_v11 = vld [vmem:[#allocation2 + $0x50] sm:$0xff] }
 0x186   : > { %v4470_v10 = vpop.f32.mrf.mxu1  ;;  %v2416_v60 = vpop.f32.mrf.mxu0  ;;  %v2276_v61 = vld [vmem:[#allocation2 + $0xc0] sm:$0xff] }
 0x187   : > { %2224 = vst.msk [vmem:[#allocation2 + $0xe0] sm:$0xff] %vm285_vm7, %v2192_v8  ;;  %v2195_v54 = vadd.f32 %v4470_v10, %v1985_v50  ;;  %2515 = vst.msk [vmem:[#allocation2 + $0xb8] sm:$0xff] %vm285_vm7, %v2483_v6  ;;  %v2481_v33 = vadd.f32 %v2416_v60, %v2273_v15  ;;  %v2540_v15 = vld [vmem:[#allocation2 + $0x40] sm:$0xff] }
 0x188   : > { %v2152_v3 = vpop.f32.mrf.mxu1  ;;  %v4499_v16 = vpop.f32.mrf.mxu0  ;;  %v2279_v24 = vld [vmem:[#allocation2 + $0xd8] sm:$0xff] }
 0x189   : > { %2227 = vst.msk [vmem:[#allocation2 + $0xf8] sm:$0xff] %vm285_vm7, %v2195_v54  ;;  %v2193_v48 = vadd.f32 %v2152_v3, %v1983_v39  ;;  %2513 = vst.msk [vmem:[#allocation2 + $0xa8] sm:$0xff] %vm285_vm7, %v2481_v33  ;;  %v2486_v55 = vadd.f32 %v4499_v16, %v2278_v30  ;;  %v2543_v30 = vld [vmem:[#allocation2 + $0x58] sm:$0xff] }
 0x18a   : > { %v4509_v19 = vpop.f32.mrf.mxu1  ;;  %v2429_v28 = vpop.f32.mrf.mxu0  ;;  %v2277_v45 = vld [vmem:[#allocation2 + $0xc8] sm:$0xff] }
 0x18b   : > { %2225 = vst.msk [vmem:[#allocation2 + $0xe8] sm:$0xff] %vm285_vm7, %v2193_v48  ;;  %2518 = vst.msk [vmem:[#allocation2 + $0xd0] sm:$0xff] %vm285_vm7, %v2486_v55  ;;  %v2742_v59 = vadd.f32 %v4509_v19, %v2534_v29  ;;  %v2484_v21 = vadd.f32 %v2429_v28, %v2276_v61  ;;  %v2541_v61 = vld [vmem:[#allocation2 + $0x48] sm:$0xff] }
 0x18c   : > { %v2613_v46 = vpop.f32.mrf.mxu1  ;;  %v4500_v44 = vpop.f32.mrf.mxu0  ;;  %v2282_v51 = vld [vmem:[#allocation2 + $0xf0] sm:$0xff] }
 0x18d   : > { %2774 = vst.msk [vmem:[#allocation2 + $0x10] sm:$0xff] %vm285_vm7, %v2742_v59  ;;  %2516 = vst.msk [vmem:[#allocation2 + $0xc0] sm:$0xff] %vm285_vm7, %v2484_v21  ;;  %v2740_v56 = vadd.f32 %v2613_v46, %v2532_v63  ;;  %v2487_v42 = vadd.f32 %v4500_v44, %v2279_v24  ;;  %v2546_v24 = vld [vmem:[#allocation2 + $0x70] sm:$0xff] }
 0x18e   : > { %v4510_v14 = vpop.f32.mrf.mxu1  ;;  %v2432_v13 = vpop.f32.mrf.mxu0  ;;  %v2280_v27 = vld [vmem:[#allocation2 + $0xe0] sm:$0xff] }
 0x18f   : > { %2772 = vst.msk [vmem:[#allocation2] sm:$0xff] %vm285_vm7, %v2740_v56  ;;  %2519 = vst.msk [vmem:[#allocation2 + $0xd8] sm:$0xff] %vm285_vm7, %v2487_v42  ;;  %v2743_v37 = vadd.f32 %v4510_v14, %v2535_v53  ;;  %v2485_v38 = vadd.f32 %v2432_v13, %v2277_v45  ;;  %v2544_v45 = vld [vmem:[#allocation2 + $0x60] sm:$0xff] }
 0x190   : > { %v2616_v47 = vpop.f32.mrf.mxu1  ;;  %v4503_v18 = vpop.f32.mrf.mxu0  ;;  %v2283_v22 = vld [vmem:[#allocation2 + $0xf8] sm:$0xff] }
 0x191   : > { %2775 = vst.msk [vmem:[#allocation2 + $0x18] sm:$0xff] %vm285_vm7, %v2743_v37  ;;  %2517 = vst.msk [vmem:[#allocation2 + $0xc8] sm:$0xff] %vm285_vm7, %v2485_v38  ;;  %v2741_v35 = vadd.f32 %v2616_v47, %v2533_v12  ;;  %v2490_v52 = vadd.f32 %v4503_v18, %v2282_v51  ;;  %v2547_v51 = vld [vmem:[#allocation2 + $0x78] sm:$0xff] }
 0x192   : > { %v4513_v57 = vpop.f32.mrf.mxu1  ;;  %v2445_v43 = vpop.f32.mrf.mxu0  ;;  %v2281_v31 = vld [vmem:[#allocation2 + $0xe8] sm:$0xff] }
 0x193   : > { %2773 = vst.msk [vmem:[#allocation2 + $0x8] sm:$0xff] %vm285_vm7, %v2741_v35  ;;  %2522 = vst.msk [vmem:[#allocation2 + $0xf0] sm:$0xff] %vm285_vm7, %v2490_v52  ;;  %v2746_v49 = vadd.f32 %v4513_v57, %v2538_v23  ;;  %v2488_v1 = vadd.f32 %v2445_v43, %v2280_v27  ;;  %v2545_v27 = vld [vmem:[#allocation2 + $0x68] sm:$0xff] }
 0x194   : > { %v2629_v34 = vpop.f32.mrf.mxu1  ;;  %v4504_v2 = vpop.f32.mrf.mxu0  ;;  %v2806_v9 = vld [vmem:[#allocation2 + $0x10] sm:$0xff] }
 0x195   : > { %2778 = vst.msk [vmem:[#allocation2 + $0x30] sm:$0xff] %vm285_vm7, %v2746_v49  ;;  %2520 = vst.msk [vmem:[#allocation2 + $0xe0] sm:$0xff] %vm285_vm7, %v2488_v1  ;;  %v2744_v32 = vadd.f32 %v2629_v34, %v2536_v0  ;;  %v2491_v5 = vadd.f32 %v4504_v2, %v2283_v22  ;;  %v2550_v22 = vld [vmem:[#allocation2 + $0x90] sm:$0xff] }
 0x196   : > { %v4514_v20 = vpop.f32.mrf.mxu1  ;;  %v2448_v26 = vpop.f32.mrf.mxu0  ;;  %v2804_v8 = vld [vmem:[#allocation2] sm:$0xff] }
 0x197   : > { %2776 = vst.msk [vmem:[#allocation2 + $0x20] sm:$0xff] %vm285_vm7, %v2744_v32  ;;  %2523 = vst.msk [vmem:[#allocation2 + $0xf8] sm:$0xff] %vm285_vm7, %v2491_v5  ;;  %v2747_v62 = vadd.f32 %v4514_v20, %v2539_v17  ;;  %v2489_v58 = vadd.f32 %v2448_v26, %v2281_v31  ;;  %v2548_v31 = vld [vmem:[#allocation2 + $0x80] sm:$0xff] }
 0x198   : > { %v2632_v25 = vpop.f32.mrf.mxu1  ;;  %v4543_v41 = vpop.f32.mrf.mxu0  ;;  %v2807_v54 = vld [vmem:[#allocation2 + $0x18] sm:$0xff] }
 0x199   : > { %2779 = vst.msk [vmem:[#allocation2 + $0x38] sm:$0xff] %vm285_vm7, %v2747_v62  ;;  %2521 = vst.msk [vmem:[#allocation2 + $0xe8] sm:$0xff] %vm285_vm7, %v2489_v58  ;;  %v2745_v40 = vadd.f32 %v2632_v25, %v2537_v4  ;;  %v3016_v7 = vadd.f32 %v4543_v41, %v2806_v9  ;;  %v2551_v9 = vld [vmem:[#allocation2 + $0x98] sm:$0xff] }
 0x19a   : > { %v4517_v36 = vpop.f32.mrf.mxu1  ;;  %v2887_v6 = vpop.f32.mrf.mxu0  ;;  %v2805_v48 = vld [vmem:[#allocation2 + $0x8] sm:$0xff] }
 0x19b   : > { %2777 = vst.msk [vmem:[#allocation2 + $0x28] sm:$0xff] %vm285_vm7, %v2745_v40  ;;  %v2750_v50 = vadd.f32 %v4517_v36, %v2542_v11  ;;  %3048 = vst.msk [vmem:[#allocation2 + $0x10] sm:$0xff] %vm285_vm7, %v3016_v7  ;;  %v3014_v10 = vadd.f32 %v2887_v6, %v2804_v8  ;;  %v2549_v8 = vld [vmem:[#allocation2 + $0x88] sm:$0xff] }
 0x19c   : > { %v2645_v60 = vpop.f32.mrf.mxu1  ;;  %v4544_v33 = vpop.f32.mrf.mxu0  ;;  %v2810_v59 = vld [vmem:[#allocation2 + $0x30] sm:$0xff] }
 0x19d   : > { %2782 = vst.msk [vmem:[#allocation2 + $0x50] sm:$0xff] %vm285_vm7, %v2750_v50  ;;  %v2748_v39 = vadd.f32 %v2645_v60, %v2540_v15  ;;  %3046 = vst.msk [vmem:[#allocation2] sm:$0xff] %vm285_vm7, %v3014_v10  ;;  %v3017_v3 = vadd.f32 %v4544_v33, %v2807_v54  ;;  %v2554_v54 = vld [vmem:[#allocation2 + $0xb0] sm:$0xff] }
 0x19e   : > { %v4518_v16 = vpop.f32.mrf.mxu1  ;;  %v2890_v55 = vpop.f32.mrf.mxu0  ;;  %v2808_v56 = vld [vmem:[#allocation2 + $0x20] sm:$0xff] }
 0x19f   : > { %2780 = vst.msk [vmem:[#allocation2 + $0x40] sm:$0xff] %vm285_vm7, %v2748_v39  ;;  %v2751_v29 = vadd.f32 %v4518_v16, %v2543_v30  ;;  %3049 = vst.msk [vmem:[#allocation2 + $0x18] sm:$0xff] %vm285_vm7, %v3017_v3  ;;  %v3015_v19 = vadd.f32 %v2890_v55, %v2805_v48  ;;  %v2552_v48 = vld [vmem:[#allocation2 + $0xa0] sm:$0xff] }
 0x1a0   : > { %v2648_v28 = vpop.f32.mrf.mxu1  ;;  %v4547_v21 = vpop.f32.mrf.mxu0  ;;  %v2811_v37 = vld [vmem:[#allocation2 + $0x38] sm:$0xff] }
 0x1a1   : > { %2783 = vst.msk [vmem:[#allocation2 + $0x58] sm:$0xff] %vm285_vm7, %v2751_v29  ;;  %v2749_v63 = vadd.f32 %v2648_v28, %v2541_v61  ;;  %3047 = vst.msk [vmem:[#allocation2 + $0x8] sm:$0xff] %vm285_vm7, %v3015_v19  ;;  %v3020_v46 = vadd.f32 %v4547_v21, %v2810_v59  ;;  %v2555_v59 = vld [vmem:[#allocation2 + $0xb8] sm:$0xff] }
 0x1a2   : > { %v4521_v44 = vpop.f32.mrf.mxu1  ;;  %v2903_v42 = vpop.f32.mrf.mxu0  ;;  %v2809_v35 = vld [vmem:[#allocation2 + $0x28] sm:$0xff] }
 0x1a3   : > { %2781 = vst.msk [vmem:[#allocation2 + $0x48] sm:$0xff] %vm285_vm7, %v2749_v63  ;;  %v2754_v53 = vadd.f32 %v4521_v44, %v2546_v24  ;;  %3052 = vst.msk [vmem:[#allocation2 + $0x30] sm:$0xff] %vm285_vm7, %v3020_v46  ;;  %v3018_v14 = vadd.f32 %v2903_v42, %v2808_v56  ;;  %v2553_v56 = vld [vmem:[#allocation2 + $0xa8] sm:$0xff] }
 0x1a4   : > { %v2661_v13 = vpop.f32.mrf.mxu1  ;;  %v4548_v38 = vpop.f32.mrf.mxu0  ;;  %v2814_v49 = vld [vmem:[#allocation2 + $0x50] sm:$0xff] }
 0x1a5   : > { %2786 = vst.msk [vmem:[#allocation2 + $0x70] sm:$0xff] %vm285_vm7, %v2754_v53  ;;  %v2752_v12 = vadd.f32 %v2661_v13, %v2544_v45  ;;  %3050 = vst.msk [vmem:[#allocation2 + $0x20] sm:$0xff] %vm285_vm7, %v3018_v14  ;;  %v3021_v47 = vadd.f32 %v4548_v38, %v2811_v37  ;;  %v2558_v37 = vld [vmem:[#allocation2 + $0xd0] sm:$0xff] }
 0x1a6   : > { %v4522_v18 = vpop.f32.mrf.mxu1  ;;  %v2906_v52 = vpop.f32.mrf.mxu0  ;;  %v2812_v32 = vld [vmem:[#allocation2 + $0x40] sm:$0xff] }
 0x1a7   : > { %2784 = vst.msk [vmem:[#allocation2 + $0x60] sm:$0xff] %vm285_vm7, %v2752_v12  ;;  %v2755_v23 = vadd.f32 %v4522_v18, %v2547_v51  ;;  %3053 = vst.msk [vmem:[#allocation2 + $0x38] sm:$0xff] %vm285_vm7, %v3021_v47  ;;  %v3019_v57 = vadd.f32 %v2906_v52, %v2809_v35  ;;  %v2556_v35 = vld [vmem:[#allocation2 + $0xc0] sm:$0xff] }
 0x1a8   : > { %v2664_v43 = vpop.f32.mrf.mxu1  ;;  %v4551_v1 = vpop.f32.mrf.mxu0  ;;  %v2815_v62 = vld [vmem:[#allocation2 + $0x58] sm:$0xff] }
 0x1a9   : > { %2787 = vst.msk [vmem:[#allocation2 + $0x78] sm:$0xff] %vm285_vm7, %v2755_v23  ;;  %v2753_v0 = vadd.f32 %v2664_v43, %v2545_v27  ;;  %3051 = vst.msk [vmem:[#allocation2 + $0x28] sm:$0xff] %vm285_vm7, %v3019_v57  ;;  %v3024_v34 = vadd.f32 %v4551_v1, %v2814_v49  ;;  %v2559_v49 = vld [vmem:[#allocation2 + $0xd8] sm:$0xff] }
 0x1aa   : > { %v4525_v2 = vpop.f32.mrf.mxu1  ;;  %v2919_v5 = vpop.f32.mrf.mxu0  ;;  %v2813_v40 = vld [vmem:[#allocation2 + $0x48] sm:$0xff] }
 0x1ab   : > { %2785 = vst.msk [vmem:[#allocation2 + $0x68] sm:$0xff] %vm285_vm7, %v2753_v0  ;;  %v2758_v17 = vadd.f32 %v4525_v2, %v2550_v22  ;;  %3056 = vst.msk [vmem:[#allocation2 + $0x50] sm:$0xff] %vm285_vm7, %v3024_v34  ;;  %v3022_v20 = vadd.f32 %v2919_v5, %v2812_v32  ;;  %v2557_v32 = vld [vmem:[#allocation2 + $0xc8] sm:$0xff] }
 0x1ac   : > { %v2677_v26 = vpop.f32.mrf.mxu1  ;;  %v4552_v58 = vpop.f32.mrf.mxu0  ;;  %v2818_v50 = vld [vmem:[#allocation2 + $0x70] sm:$0xff] }
 0x1ad   : > { %2790 = vst.msk [vmem:[#allocation2 + $0x90] sm:$0xff] %vm285_vm7, %v2758_v17  ;;  %v2756_v4 = vadd.f32 %v2677_v26, %v2548_v31  ;;  %3054 = vst.msk [vmem:[#allocation2 + $0x40] sm:$0xff] %vm285_vm7, %v3022_v20  ;;  %v3025_v25 = vadd.f32 %v4552_v58, %v2815_v62  ;;  %v2562_v62 = vld [vmem:[#allocation2 + $0xf0] sm:$0xff] }
 0x1ae   : > { %v4526_v41 = vpop.f32.mrf.mxu1  ;;  %v2922_v7 = vpop.f32.mrf.mxu0  ;;  %v2816_v39 = vld [vmem:[#allocation2 + $0x60] sm:$0xff] }
 0x1af   : > { %2788 = vst.msk [vmem:[#allocation2 + $0x80] sm:$0xff] %vm285_vm7, %v2756_v4  ;;  %v2759_v11 = vadd.f32 %v4526_v41, %v2551_v9  ;;  %3057 = vst.msk [vmem:[#allocation2 + $0x58] sm:$0xff] %vm285_vm7, %v3025_v25  ;;  %v3023_v36 = vadd.f32 %v2922_v7, %v2813_v40  ;;  %v2560_v40 = vld [vmem:[#allocation2 + $0xe0] sm:$0xff] }
 0x1b0   : > { %v2680_v6 = vpop.f32.mrf.mxu1  ;;  %v4555_v10 = vpop.f32.mrf.mxu0  ;;  %v2819_v29 = vld [vmem:[#allocation2 + $0x78] sm:$0xff] }
 0x1b1   : > { %2791 = vst.msk [vmem:[#allocation2 + $0x98] sm:$0xff] %vm285_vm7, %v2759_v11  ;;  %v2757_v15 = vadd.f32 %v2680_v6, %v2549_v8  ;;  %3055 = vst.msk [vmem:[#allocation2 + $0x48] sm:$0xff] %vm285_vm7, %v3023_v36  ;;  %v3028_v60 = vadd.f32 %v4555_v10, %v2818_v50  ;;  %v2563_v50 = vld [vmem:[#allocation2 + $0xf8] sm:$0xff] }
 0x1b2   : > { %v4529_v33 = vpop.f32.mrf.mxu1  ;;  %v2935_v3 = vpop.f32.mrf.mxu0  ;;  %v2817_v63 = vld [vmem:[#allocation2 + $0x68] sm:$0xff] }
 0x1b3   : > { %2789 = vst.msk [vmem:[#allocation2 + $0x88] sm:$0xff] %vm285_vm7, %v2757_v15  ;;  %v2762_v30 = vadd.f32 %v4529_v33, %v2554_v54  ;;  %3060 = vst.msk [vmem:[#allocation2 + $0x70] sm:$0xff] %vm285_vm7, %v3028_v60  ;;  %v3026_v16 = vadd.f32 %v2935_v3, %v2816_v39  ;;  %v2561_v39 = vld [vmem:[#allocation2 + $0xe8] sm:$0xff] }
 0x1b4   : > { %v2693_v55 = vpop.f32.mrf.mxu1  ;;  %v4556_v19 = vpop.f32.mrf.mxu0  ;;  %v2822_v53 = vld [vmem:[#allocation2 + $0x90] sm:$0xff] }
 0x1b5   : > { %2794 = vst.msk [vmem:[#allocation2 + $0xb0] sm:$0xff] %vm285_vm7, %v2762_v30  ;;  %v2760_v61 = vadd.f32 %v2693_v55, %v2552_v48  ;;  %3058 = vst.msk [vmem:[#allocation2 + $0x60] sm:$0xff] %vm285_vm7, %v3026_v16  ;;  %v3029_v28 = vadd.f32 %v4556_v19, %v2819_v29  ;;  %v3104_v29 = vld [vmem:[#allocation2 + $0x10] sm:$0xff] }
 0x1b6   : > { %v4530_v21 = vpop.f32.mrf.mxu1  ;;  %v2938_v46 = vpop.f32.mrf.mxu0  ;;  %v2820_v12 = vld [vmem:[#allocation2 + $0x80] sm:$0xff] }
 0x1b7   : > { %2792 = vst.msk [vmem:[#allocation2 + $0xa0] sm:$0xff] %vm285_vm7, %v2760_v61  ;;  %v2763_v24 = vadd.f32 %v4530_v21, %v2555_v59  ;;  %3061 = vst.msk [vmem:[#allocation2 + $0x78] sm:$0xff] %vm285_vm7, %v3029_v28  ;;  %v3027_v44 = vadd.f32 %v2938_v46, %v2817_v63  ;;  %v3102_v63 = vld [vmem:[#allocation2] sm:$0xff] }
 0x1b8   : > { %v2696_v42 = vpop.f32.mrf.mxu1  ;;  %v4559_v14 = vpop.f32.mrf.mxu0  ;;  %v2823_v23 = vld [vmem:[#allocation2 + $0x98] sm:$0xff] }
 0x1b9   : > { %2795 = vst.msk [vmem:[#allocation2 + $0xb8] sm:$0xff] %vm285_vm7, %v2763_v24  ;;  %v2761_v45 = vadd.f32 %v2696_v42, %v2553_v56  ;;  %3059 = vst.msk [vmem:[#allocation2 + $0x68] sm:$0xff] %vm285_vm7, %v3027_v44  ;;  %v3032_v13 = vadd.f32 %v4559_v14, %v2822_v53  ;;  %v3105_v53 = vld [vmem:[#allocation2 + $0x18] sm:$0xff] }
 0x1ba   : > { %v4533_v38 = vpop.f32.mrf.mxu1  ;;  %v2951_v47 = vpop.f32.mrf.mxu0  ;;  %v2821_v0 = vld [vmem:[#allocation2 + $0x88] sm:$0xff] }
 0x1bb   : > { %2793 = vst.msk [vmem:[#allocation2 + $0xa8] sm:$0xff] %vm285_vm7, %v2761_v45  ;;  %v2766_v51 = vadd.f32 %v4533_v38, %v2558_v37  ;;  %3064 = vst.msk [vmem:[#allocation2 + $0x90] sm:$0xff] %vm285_vm7, %v3032_v13  ;;  %v3030_v18 = vadd.f32 %v2951_v47, %v2820_v12  ;;  %v3103_v12 = vld [vmem:[#allocation2 + $0x8] sm:$0xff] }
 0x1bc   : > { %v2709_v52 = vpop.f32.mrf.mxu1  ;;  %v4560_v57 = vpop.f32.mrf.mxu0  ;;  %v2826_v17 = vld [vmem:[#allocation2 + $0xb0] sm:$0xff] }
 0x1bd   : > { %2798 = vst.msk [vmem:[#allocation2 + $0xd0] sm:$0xff] %vm285_vm7, %v2766_v51  ;;  %v2764_v27 = vadd.f32 %v2709_v52, %v2556_v35  ;;  %3062 = vst.msk [vmem:[#allocation2 + $0x80] sm:$0xff] %vm285_vm7, %v3030_v18  ;;  %v3033_v43 = vadd.f32 %v4560_v57, %v2823_v23  ;;  %v3108_v23 = vld [vmem:[#allocation2 + $0x30] sm:$0xff] }
 0x1be   : > { %v4534_v1 = vpop.f32.mrf.mxu1  ;;  %v2954_v34 = vpop.f32.mrf.mxu0  ;;  %v2824_v4 = vld [vmem:[#allocation2 + $0xa0] sm:$0xff] }
 0x1bf   : > { %2796 = vst.msk [vmem:[#allocation2 + $0xc0] sm:$0xff] %vm285_vm7, %v2764_v27  ;;  %v2767_v22 = vadd.f32 %v4534_v1, %v2559_v49  ;;  %3065 = vst.msk [vmem:[#allocation2 + $0x98] sm:$0xff] %vm285_vm7, %v3033_v43  ;;  %v3031_v2 = vadd.f32 %v2954_v34, %v2821_v0  ;;  %v3106_v0 = vld [vmem:[#allocation2 + $0x20] sm:$0xff] }
 0x1c0   : > { %v2712_v5 = vpop.f32.mrf.mxu1  ;;  %v4563_v20 = vpop.f32.mrf.mxu0  ;;  %v2827_v11 = vld [vmem:[#allocation2 + $0xb8] sm:$0xff] }
 0x1c1   : > { %2799 = vst.msk [vmem:[#allocation2 + $0xd8] sm:$0xff] %vm285_vm7, %v2767_v22  ;;  %v2765_v31 = vadd.f32 %v2712_v5, %v2557_v32  ;;  %3063 = vst.msk [vmem:[#allocation2 + $0x88] sm:$0xff] %vm285_vm7, %v3031_v2  ;;  %v3036_v26 = vadd.f32 %v4563_v20, %v2826_v17  ;;  %v3109_v17 = vld [vmem:[#allocation2 + $0x38] sm:$0xff] }
 0x1c2   : > { %v4537_v58 = vpop.f32.mrf.mxu1  ;;  %v2967_v25 = vpop.f32.mrf.mxu0  ;;  %v2825_v15 = vld [vmem:[#allocation2 + $0xa8] sm:$0xff] }
 0x1c3   : > { %2797 = vst.msk [vmem:[#allocation2 + $0xc8] sm:$0xff] %vm285_vm7, %v2765_v31  ;;  %v2770_v9 = vadd.f32 %v4537_v58, %v2562_v62  ;;  %3068 = vst.msk [vmem:[#allocation2 + $0xb0] sm:$0xff] %vm285_vm7, %v3036_v26  ;;  %v3034_v41 = vadd.f32 %v2967_v25, %v2824_v4  ;;  %v3107_v4 = vld [vmem:[#allocation2 + $0x28] sm:$0xff] }
 0x1c4   : > { %v2725_v7 = vpop.f32.mrf.mxu1  ;;  %v4564_v36 = vpop.f32.mrf.mxu0  ;;  %v2830_v30 = vld [vmem:[#allocation2 + $0xd0] sm:$0xff] }
 0x1c5   : > { %2802 = vst.msk [vmem:[#allocation2 + $0xf0] sm:$0xff] %vm285_vm7, %v2770_v9  ;;  %v2768_v8 = vadd.f32 %v2725_v7, %v2560_v40  ;;  %3066 = vst.msk [vmem:[#allocation2 + $0xa0] sm:$0xff] %vm285_vm7, %v3034_v41  ;;  %v3037_v6 = vadd.f32 %v4564_v36, %v2827_v11  ;;  %v3112_v11 = vld [vmem:[#allocation2 + $0x50] sm:$0xff] }
 0x1c6   : > { %v4538_v10 = vpop.f32.mrf.mxu1  ;;  %v2970_v60 = vpop.f32.mrf.mxu0  ;;  %v2828_v61 = vld [vmem:[#allocation2 + $0xc0] sm:$0xff] }
 0x1c7   : > { %2800 = vst.msk [vmem:[#allocation2 + $0xe0] sm:$0xff] %vm285_vm7, %v2768_v8  ;;  %v2771_v54 = vadd.f32 %v4538_v10, %v2563_v50  ;;  %3069 = vst.msk [vmem:[#allocation2 + $0xb8] sm:$0xff] %vm285_vm7, %v3037_v6  ;;  %v3035_v33 = vadd.f32 %v2970_v60, %v2825_v15  ;;  %v3110_v15 = vld [vmem:[#allocation2 + $0x40] sm:$0xff] }
 0x1c8   : > { %v2728_v3 = vpop.f32.mrf.mxu1  ;;  %v4567_v16 = vpop.f32.mrf.mxu0  ;;  %v2831_v24 = vld [vmem:[#allocation2 + $0xd8] sm:$0xff] }
 0x1c9   : > { %2803 = vst.msk [vmem:[#allocation2 + $0xf8] sm:$0xff] %vm285_vm7, %v2771_v54  ;;  %v2769_v48 = vadd.f32 %v2728_v3, %v2561_v39  ;;  %3067 = vst.msk [vmem:[#allocation2 + $0xa8] sm:$0xff] %vm285_vm7, %v3035_v33  ;;  %v3040_v55 = vadd.f32 %v4567_v16, %v2830_v30  ;;  %v6222_v39 = vld [vmem:[%s6351_s3] sm:$0xf]  ;;  %v3113_v16 = vld [vmem:[#allocation2 + $0x58] sm:$0xff] }
 0x1ca   : > { %v4577_v19 = vpop.f32.mrf.mxu1  ;;  %v2983_v28 = vpop.f32.mrf.mxu0  ;;  %v2829_v45 = vld [vmem:[#allocation2 + $0xc8] sm:$0xff]  ;;  %4333 = vmatprep.mubr.msk.bf16.mxu1 %vm285_vm7, %v6222_v39 }
 0x1cb   : > { %2801 = vst.msk [vmem:[#allocation2 + $0xe8] sm:$0xff] %vm285_vm7, %v2769_v48  ;;  %3072 = vst.msk [vmem:[#allocation2 + $0xd0] sm:$0xff] %vm285_vm7, %v3040_v55  ;;  %v3312_v59 = vadd.f32 %v4577_v19, %v3104_v29  ;;  %v3038_v21 = vadd.f32 %v2983_v28, %v2828_v61  ;;  %v3111_v28 = vld [vmem:[#allocation2 + $0x48] sm:$0xff] }
 0x1cc   : > { %v3183_v46 = vpop.f32.mrf.mxu1  ;;  %v4568_v44 = vpop.f32.mrf.mxu0  ;;  %v2834_v51 = vld [vmem:[#allocation2 + $0xf0] sm:$0xff] }
 0x1cd   : > { %3344 = vst.msk [vmem:[#allocation2 + $0x10] sm:$0xff] %vm285_vm7, %v3312_v59  ;;  %3070 = vst.msk [vmem:[#allocation2 + $0xc0] sm:$0xff] %vm285_vm7, %v3038_v21  ;;  %v3310_v56 = vadd.f32 %v3183_v46, %v3102_v63  ;;  %v3041_v42 = vadd.f32 %v4568_v44, %v2831_v24  ;;  %v3116_v44 = vld [vmem:[#allocation2 + $0x70] sm:$0xff] }
 0x1ce   : > { %v4578_v14 = vpop.f32.mrf.mxu1  ;;  %v2986_v13 = vpop.f32.mrf.mxu0  ;;  %v2832_v27 = vld [vmem:[#allocation2 + $0xe0] sm:$0xff] }
 0x1cf   : > { %3342 = vst.msk [vmem:[#allocation2] sm:$0xff] %vm285_vm7, %v3310_v56  ;;  %3073 = vst.msk [vmem:[#allocation2 + $0xd8] sm:$0xff] %vm285_vm7, %v3041_v42  ;;  %v3313_v37 = vadd.f32 %v4578_v14, %v3105_v53  ;;  %v3039_v38 = vadd.f32 %v2986_v13, %v2829_v45  ;;  %v3735_v13 = vld [vmem:[%s6352_s4] sm:$0xff] }
 0x1d0   : > { %v3186_v47 = vpop.f32.mrf.mxu1  ;;  %v4571_v18 = vpop.f32.mrf.mxu0  ;;  %v2835_v22 = vld [vmem:[#allocation2 + $0xf8] sm:$0xff] }
 0x1d1   : > { %3345 = vst.msk [vmem:[#allocation2 + $0x18] sm:$0xff] %vm285_vm7, %v3313_v37  ;;  %3071 = vst.msk [vmem:[#allocation2 + $0xc8] sm:$0xff] %vm285_vm7, %v3039_v38  ;;  %v3311_v35 = vadd.f32 %v3186_v47, %v3103_v12  ;;  %v3044_v52 = vadd.f32 %v4571_v18, %v2834_v51  ;;  %v3114_v37 = vld [vmem:[#allocation2 + $0x60] sm:$0xff]  ;;  %v4782_v51 = vmov 0  }
 0x1d2   : > { %v4581_v57 = vpop.f32.mrf.mxu1  ;;  %v2999_v43 = vpop.f32.mrf.mxu0  ;;  %v2833_v31 = vld [vmem:[#allocation2 + $0xe8] sm:$0xff]  ;;  %4692 = vset.pattern.permute.xlu0 %v4782_v51  ;;  %v3128_v51 = vld [vmem:[#allocation2 + $0xd0] sm:$0xff] }
 0x1d3   : > { %3343 = vst.msk [vmem:[#allocation2 + $0x8] sm:$0xff] %vm285_vm7, %v3311_v35  ;;  %3076 = vst.msk [vmem:[#allocation2 + $0xf0] sm:$0xff] %vm285_vm7, %v3044_v52  ;;  %v3316_v49 = vadd.f32 %v4581_v57, %v3108_v23  ;;  %v3042_v1 = vadd.f32 %v2999_v43, %v2832_v27  ;;  %3738 = vperm.xlu0 %4692, %v3735_v13   ;;  %v3117_v52 = vld [vmem:[#allocation2 + $0x78] sm:$0xff] }
 0x1d4   : > { %v3199_v34 = vpop.f32.mrf.mxu1  ;;  %v4572_v2 = vpop.f32.mrf.mxu0  ;;  %v3384_v9 = vld [vmem:[#allocation2 + $0x10] sm:$0xff] }
 0x1d5   : > { %3348 = vst.msk [vmem:[#allocation2 + $0x30] sm:$0xff] %vm285_vm7, %v3316_v49  ;;  %3074 = vst.msk [vmem:[#allocation2 + $0xe0] sm:$0xff] %vm285_vm7, %v3042_v1  ;;  %v3314_v32 = vadd.f32 %v3199_v34, %v3106_v0  ;;  %v3045_v5 = vadd.f32 %v4572_v2, %v2835_v22  ;;  %v3115_v1 = vld [vmem:[#allocation2 + $0x68] sm:$0xff] }
 0x1d6   : > { %v4582_v20 = vpop.f32.mrf.mxu1  ;;  %v3002_v26 = vpop.f32.mrf.mxu0  ;;  %v3382_v8 = vld [vmem:[#allocation2] sm:$0xff] }
 0x1d7   : > { %3346 = vst.msk [vmem:[#allocation2 + $0x20] sm:$0xff] %vm285_vm7, %v3314_v32  ;;  %3077 = vst.msk [vmem:[#allocation2 + $0xf8] sm:$0xff] %vm285_vm7, %v3045_v5  ;;  %v3317_v62 = vadd.f32 %v4582_v20, %v3109_v17  ;;  %v3043_v58 = vadd.f32 %v3002_v26, %v2833_v31  ;;  %v3120_v5 = vld [vmem:[#allocation2 + $0x90] sm:$0xff] }
 0x1d8   : > { %v3202_v25 = vpop.f32.mrf.mxu1  ;;  %v4611_v41 = vpop.f32.mrf.mxu0  ;;  %v3385_v54 = vld [vmem:[#allocation2 + $0x18] sm:$0xff] }
 0x1d9   : > { %3349 = vst.msk [vmem:[#allocation2 + $0x38] sm:$0xff] %vm285_vm7, %v3317_v62  ;;  %3075 = vst.msk [vmem:[#allocation2 + $0xe8] sm:$0xff] %vm285_vm7, %v3043_v58  ;;  %v3315_v40 = vadd.f32 %v3202_v25, %v3107_v4  ;;  %v3592_v7 = vadd.f32 %v4611_v41, %v3384_v9  ;;  %v3118_v58 = vld [vmem:[#allocation2 + $0x80] sm:$0xff] }
 0x1da   : > { %v4585_v36 = vpop.f32.mrf.mxu1  ;;  %v3463_v6 = vpop.f32.mrf.mxu0  ;;  %v3383_v55 = vld [vmem:[#allocation2 + $0x8] sm:$0xff] }
 0x1db   : > { %3347 = vst.msk [vmem:[#allocation2 + $0x28] sm:$0xff] %vm285_vm7, %v3315_v40  ;;  %v3320_v50 = vadd.f32 %v4585_v36, %v3112_v11  ;;  %3624 = vst.msk [vmem:[#allocation2 + $0x10] sm:$0xff] %vm285_vm7, %v3592_v7  ;;  %v3590_v10 = vadd.f32 %v3463_v6, %v3382_v8  ;;  %v3121_v7 = vld [vmem:[#allocation2 + $0x98] sm:$0xff] }
 0x1dc   : > { %v3215_v60 = vpop.f32.mrf.mxu1  ;;  %v4612_v33 = vpop.f32.mrf.mxu0  ;;  %v3388_v21 = vld [vmem:[#allocation2 + $0x30] sm:$0xff] }
 0x1dd   : > { %3352 = vst.msk [vmem:[#allocation2 + $0x50] sm:$0xff] %vm285_vm7, %v3320_v50  ;;  %v3318_v3 = vadd.f32 %v3215_v60, %v3110_v15  ;;  %3622 = vst.msk [vmem:[#allocation2] sm:$0xff] %vm285_vm7, %v3590_v10  ;;  %v3593_v30 = vadd.f32 %v4612_v33, %v3385_v54  ;;  %v3119_v10 = vld [vmem:[#allocation2 + $0x88] sm:$0xff] }
 0x1de   : > { %v4586_v48 = vpop.f32.mrf.mxu1  ;;  %v3466_v29 = vpop.f32.mrf.mxu0  ;;  %v3386_v42 = vld [vmem:[#allocation2 + $0x20] sm:$0xff] }
 0x1df   : > { %3350 = vst.msk [vmem:[#allocation2 + $0x40] sm:$0xff] %vm285_vm7, %v3318_v3  ;;  %v3321_v19 = vadd.f32 %v4586_v48, %v3113_v16  ;;  %3625 = vst.msk [vmem:[#allocation2 + $0x18] sm:$0xff] %vm285_vm7, %v3593_v30  ;;  %v3591_v61 = vadd.f32 %v3466_v29, %v3383_v55  ;;  %v3124_v30 = vld [vmem:[#allocation2 + $0xb0] sm:$0xff] }
 0x1e0   : > { %v3218_v59 = vpop.f32.mrf.mxu1  ;;  %v4615_v63 = vpop.f32.mrf.mxu0  ;;  %v3389_v12 = vld [vmem:[#allocation2 + $0x38] sm:$0xff] }
 0x1e1   : > { %3353 = vst.msk [vmem:[#allocation2 + $0x58] sm:$0xff] %vm285_vm7, %v3321_v19  ;;  %v3319_v46 = vadd.f32 %v3218_v59, %v3111_v28  ;;  %3623 = vst.msk [vmem:[#allocation2 + $0x8] sm:$0xff] %vm285_vm7, %v3591_v61  ;;  %v3596_v24 = vadd.f32 %v4615_v63, %v3388_v21  ;;  %v3122_v61 = vld [vmem:[#allocation2 + $0xa0] sm:$0xff] }
 0x1e2   : > { %v4589_v56 = vpop.f32.mrf.mxu1  ;;  %v3479_v53 = vpop.f32.mrf.mxu0  ;;  %v3387_v57 = vld [vmem:[#allocation2 + $0x28] sm:$0xff] }
 0x1e3   : > { %3351 = vst.msk [vmem:[#allocation2 + $0x48] sm:$0xff] %vm285_vm7, %v3319_v46  ;;  %v3324_v14 = vadd.f32 %v4589_v56, %v3116_v44  ;;  %3628 = vst.msk [vmem:[#allocation2 + $0x30] sm:$0xff] %vm285_vm7, %v3596_v24  ;;  %v3594_v45 = vadd.f32 %v3479_v53, %v3386_v42  ;;  %v3125_v24 = vld [vmem:[#allocation2 + $0xb8] sm:$0xff] }
 0x1e4   : > { %v3231_v38 = vpop.f32.mrf.mxu1  ;;  %v4616_v47 = vpop.f32.mrf.mxu0  ;;  %v3392_v34 = vld [vmem:[#allocation2 + $0x50] sm:$0xff] }
 0x1e5   : > { %3356 = vst.msk [vmem:[#allocation2 + $0x70] sm:$0xff] %vm285_vm7, %v3324_v14  ;;  %v3322_v18 = vadd.f32 %v3231_v38, %v3114_v37  ;;  %3626 = vst.msk [vmem:[#allocation2 + $0x20] sm:$0xff] %vm285_vm7, %v3594_v45  ;;  %v3597_v35 = vadd.f32 %v4616_v47, %v3389_v12  ;;  %v3123_v45 = vld [vmem:[#allocation2 + $0xa8] sm:$0xff] }
 0x1e6   : > { %v4590_v23 = vpop.f32.mrf.mxu1  ;;  %v3482_v27 = vpop.f32.mrf.mxu0  ;;  %v3390_v20 = vld [vmem:[#allocation2 + $0x40] sm:$0xff] }
 0x1e7   : > { %3354 = vst.msk [vmem:[#allocation2 + $0x60] sm:$0xff] %vm285_vm7, %v3322_v18  ;;  %v3325_v43 = vadd.f32 %v4590_v23, %v3117_v52  ;;  %3629 = vst.msk [vmem:[#allocation2 + $0x38] sm:$0xff] %vm285_vm7, %v3597_v35  ;;  %v3595_v49 = vadd.f32 %v3482_v27, %v3387_v57  ;;  %v3126_v27 = vld [vmem:[#allocation2 + $0xc0] sm:$0xff] }
 0x1e8   : > { %v3234_v0 = vpop.f32.mrf.mxu1  ;;  %v4619_v22 = vpop.f32.mrf.mxu0  ;;  %v3393_v25 = vld [vmem:[#allocation2 + $0x58] sm:$0xff] }
 0x1e9   : > { %3357 = vst.msk [vmem:[#allocation2 + $0x78] sm:$0xff] %vm285_vm7, %v3325_v43  ;;  %v3323_v2 = vadd.f32 %v3234_v0, %v3115_v1  ;;  %3627 = vst.msk [vmem:[#allocation2 + $0x28] sm:$0xff] %vm285_vm7, %v3595_v49  ;;  %v3600_v32 = vadd.f32 %v4619_v22, %v3392_v34  ;;  %v3129_v22 = vld [vmem:[#allocation2 + $0xd8] sm:$0xff] }
 0x1ea   : > { %v4593_v17 = vpop.f32.mrf.mxu1  ;;  %v3495_v31 = vpop.f32.mrf.mxu0  ;;  %v3391_v36 = vld [vmem:[#allocation2 + $0x48] sm:$0xff] }
 0x1eb   : > { %3355 = vst.msk [vmem:[#allocation2 + $0x68] sm:$0xff] %vm285_vm7, %v3323_v2  ;;  %v3328_v26 = vadd.f32 %v4593_v17, %v3120_v5  ;;  %3632 = vst.msk [vmem:[#allocation2 + $0x50] sm:$0xff] %vm285_vm7, %v3600_v32  ;;  %v3598_v62 = vadd.f32 %v3495_v31, %v3390_v20  ;;  %v3127_v31 = vld [vmem:[#allocation2 + $0xc8] sm:$0xff] }
 0x1ec   : > { %v3247_v4 = vpop.f32.mrf.mxu1  ;;  %v4620_v9 = vpop.f32.mrf.mxu0  ;;  %v3396_v60 = vld [vmem:[#allocation2 + $0x70] sm:$0xff] }
 0x1ed   : > { %3360 = vst.msk [vmem:[#allocation2 + $0x90] sm:$0xff] %vm285_vm7, %v3328_v26  ;;  %v3326_v41 = vadd.f32 %v3247_v4, %v3118_v58  ;;  %3630 = vst.msk [vmem:[#allocation2 + $0x40] sm:$0xff] %vm285_vm7, %v3598_v62  ;;  %v3601_v40 = vadd.f32 %v4620_v9, %v3393_v25  ;;  %v3132_v9 = vld [vmem:[#allocation2 + $0xf0] sm:$0xff] }
 0x1ee   : > { %v4594_v11 = vpop.f32.mrf.mxu1  ;;  %v3498_v8 = vpop.f32.mrf.mxu0  ;;  %v3394_v48 = vld [vmem:[#allocation2 + $0x60] sm:$0xff] }
 0x1ef   : > { %3358 = vst.msk [vmem:[#allocation2 + $0x80] sm:$0xff] %vm285_vm7, %v3326_v41  ;;  %v3329_v6 = vadd.f32 %v4594_v11, %v3121_v7  ;;  %3633 = vst.msk [vmem:[#allocation2 + $0x58] sm:$0xff] %vm285_vm7, %v3601_v40  ;;  %v3599_v50 = vadd.f32 %v3498_v8, %v3391_v36  ;;  %v3130_v8 = vld [vmem:[#allocation2 + $0xe0] sm:$0xff] }
 0x1f0   : > { %v3250_v15 = vpop.f32.mrf.mxu1  ;;  %v4623_v54 = vpop.f32.mrf.mxu0  ;;  %v3397_v59 = vld [vmem:[#allocation2 + $0x78] sm:$0xff] }
 0x1f1   : > { %3361 = vst.msk [vmem:[#allocation2 + $0x98] sm:$0xff] %vm285_vm7, %v3329_v6  ;;  %v3327_v33 = vadd.f32 %v3250_v15, %v3119_v10  ;;  %3631 = vst.msk [vmem:[#allocation2 + $0x48] sm:$0xff] %vm285_vm7, %v3599_v50  ;;  %v3604_v3 = vadd.f32 %v4623_v54, %v3396_v60  ;;  %v3133_v54 = vld [vmem:[#allocation2 + $0xf8] sm:$0xff] }
 0x1f2   : > { %v4597_v16 = vpop.f32.mrf.mxu1  ;;  %v3511_v55 = vpop.f32.mrf.mxu0  ;;  %v3395_v56 = vld [vmem:[#allocation2 + $0x68] sm:$0xff] }
 0x1f3   : > { %3359 = vst.msk [vmem:[#allocation2 + $0x88] sm:$0xff] %vm285_vm7, %v3327_v33  ;;  %v3332_v29 = vadd.f32 %v4597_v16, %v3124_v30  ;;  %3636 = vst.msk [vmem:[#allocation2 + $0x70] sm:$0xff] %vm285_vm7, %v3604_v3  ;;  %v3602_v19 = vadd.f32 %v3511_v55, %v3394_v48  ;;  %v3131_v55 = vld [vmem:[#allocation2 + $0xe8] sm:$0xff] }
 0x1f4   : > { %v3263_v28 = vpop.f32.mrf.mxu1  ;;  %v4624_v21 = vpop.f32.mrf.mxu0  ;;  %v3400_v37 = vld [vmem:[#allocation2 + $0x90] sm:$0xff] }
 0x1f5   : > { %3364 = vst.msk [vmem:[#allocation2 + $0xb0] sm:$0xff] %vm285_vm7, %v3332_v29  ;;  %v3330_v63 = vadd.f32 %v3263_v28, %v3122_v61  ;;  %3634 = vst.msk [vmem:[#allocation2 + $0x60] sm:$0xff] %vm285_vm7, %v3602_v19  ;;  %v3605_v46 = vadd.f32 %v4624_v21, %v3397_v59 }
 0x1f6   : > { %v4598_v44 = vpop.f32.mrf.mxu1  ;;  %v3514_v42 = vpop.f32.mrf.mxu0  ;;  %v3398_v35 = vld [vmem:[#allocation2 + $0x80] sm:$0xff] }
 0x1f7   : > { %3362 = vst.msk [vmem:[#allocation2 + $0xa0] sm:$0xff] %vm285_vm7, %v3330_v63  ;;  %v3333_v53 = vadd.f32 %v4598_v44, %v3125_v24  ;;  %3637 = vst.msk [vmem:[#allocation2 + $0x78] sm:$0xff] %vm285_vm7, %v3605_v46  ;;  %v3603_v14 = vadd.f32 %v3514_v42, %v3395_v56 }
 0x1f8   : > { %v3266_v13 = vpop.f32.mrf.mxu1  ;;  %v4627_v38 = vpop.f32.mrf.mxu0  ;;  %v3401_v49 = vld [vmem:[#allocation2 + $0x98] sm:$0xff] }
 0x1f9   : > { %3365 = vst.msk [vmem:[#allocation2 + $0xb8] sm:$0xff] %vm285_vm7, %v3333_v53  ;;  %v3331_v12 = vadd.f32 %v3266_v13, %v3123_v45  ;;  %3635 = vst.msk [vmem:[#allocation2 + $0x68] sm:$0xff] %vm285_vm7, %v3603_v14  ;;  %v3608_v47 = vadd.f32 %v4627_v38, %v3400_v37 }
 0x1fa   : > { %v4601_v18 = vpop.f32.mrf.mxu1  ;;  %v3527_v52 = vpop.f32.mrf.mxu0  ;;  %v3399_v32 = vld [vmem:[#allocation2 + $0x88] sm:$0xff] }
 0x1fb   : > { %3363 = vst.msk [vmem:[#allocation2 + $0xa8] sm:$0xff] %vm285_vm7, %v3331_v12  ;;  %v3336_v23 = vadd.f32 %v4601_v18, %v3128_v51  ;;  %3640 = vst.msk [vmem:[#allocation2 + $0x90] sm:$0xff] %vm285_vm7, %v3608_v47  ;;  %v3606_v57 = vadd.f32 %v3527_v52, %v3398_v35 }
 0x1fc   : > { %v3279_v43 = vpop.f32.mrf.mxu1  ;;  %v4628_v1 = vpop.f32.mrf.mxu0  ;;  %v3404_v62 = vld [vmem:[#allocation2 + $0xb0] sm:$0xff] }
 0x1fd   : > { %3368 = vst.msk [vmem:[#allocation2 + $0xd0] sm:$0xff] %vm285_vm7, %v3336_v23  ;;  %v3334_v0 = vadd.f32 %v3279_v43, %v3126_v27  ;;  %3638 = vst.msk [vmem:[#allocation2 + $0x80] sm:$0xff] %vm285_vm7, %v3606_v57  ;;  %v3609_v34 = vadd.f32 %v4628_v1, %v3401_v49  ;;  %v3668_v43 = vld [vmem:[#allocation2 + $0x70] sm:$0xff] }
 0x1fe   : > { %v4602_v2 = vpop.f32.mrf.mxu1  ;;  %v3530_v5 = vpop.f32.mrf.mxu0  ;;  %v3402_v40 = vld [vmem:[#allocation2 + $0xa0] sm:$0xff]  ;;  %v3669_v27 = vld [vmem:[#allocation2 + $0x78] sm:$0xff] }
 0x1ff   : > { %3366 = vst.msk [vmem:[#allocation2 + $0xc0] sm:$0xff] %vm285_vm7, %v3334_v0  ;;  %v3337_v17 = vadd.f32 %v4602_v2, %v3129_v22  ;;  %3641 = vst.msk [vmem:[#allocation2 + $0x98] sm:$0xff] %vm285_vm7, %v3609_v34  ;;  %v3607_v20 = vadd.f32 %v3530_v5, %v3399_v32  ;;  %v3701_v49 = vmax.f32 %v3669_v27, 0.0  ;;  %v3700_v0 = vmax.f32 %v3668_v43, 0.0 }
 0x200   : > { %v3282_v26 = vpop.f32.mrf.mxu1  ;;  %v4631_v58 = vpop.f32.mrf.mxu0  ;;  %v3405_v50 = vld [vmem:[#allocation2 + $0xb8] sm:$0xff] }
 0x201   : > { %3369 = vst.msk [vmem:[#allocation2 + $0xd8] sm:$0xff] %vm285_vm7, %v3337_v17  ;;  %v3335_v4 = vadd.f32 %v3282_v26, %v3127_v31  ;;  %3639 = vst.msk [vmem:[#allocation2 + $0x88] sm:$0xff] %vm285_vm7, %v3607_v20  ;;  %v3612_v25 = vadd.f32 %v4631_v58, %v3404_v62  ;;  %v3725_v5 = vpack.c.bf16 %v3701_v49, %v3700_v0  ;;  %v3667_v20 = vld [vmem:[#allocation2 + $0x68] sm:$0xff]  ;;  %v3666_v58 = vld [vmem:[#allocation2 + $0x60] sm:$0xff] }
 0x202   : > { %v4605_v41 = vpop.f32.mrf.mxu1  ;;  %v3543_v7 = vpop.f32.mrf.mxu0  ;;  %v3403_v3 = vld [vmem:[#allocation2 + $0xa8] sm:$0xff]  ;;  %v3672_v49 = vld [vmem:[#allocation2 + $0x90] sm:$0xff] }
 0x203   : > { %3367 = vst.msk [vmem:[#allocation2 + $0xc8] sm:$0xff] %vm285_vm7, %v3335_v4  ;;  %v3340_v11 = vadd.f32 %v4605_v41, %v3132_v9  ;;  %3644 = vst.msk [vmem:[#allocation2 + $0xb0] sm:$0xff] %vm285_vm7, %v3612_v25  ;;  %v3610_v36 = vadd.f32 %v3543_v7, %v3402_v40  ;;  %v3766_v4 = vsel %vm285_vm7, %v3725_v5, 0  ;;  %v3699_v9 = vmax.f32 %v3667_v20, 0.0 }
 0x204   : > { %v3295_v6 = vpop.f32.mrf.mxu1  ;;  %v4632_v10 = vpop.f32.mrf.mxu0  ;;  %v3408_v19 = vld [vmem:[#allocation2 + $0xd0] sm:$0xff]  ;;  %v3698_v40 = vmax.f32 %v3666_v58, 0.0 }
 0x205   : > { %3372 = vst.msk [vmem:[#allocation2 + $0xf0] sm:$0xff] %vm285_vm7, %v3340_v11  ;;  %v3338_v15 = vadd.f32 %v3295_v6, %v3130_v8  ;;  %3642 = vst.msk [vmem:[#allocation2 + $0xa0] sm:$0xff] %vm285_vm7, %v3610_v36  ;;  %v3613_v60 = vadd.f32 %v4632_v10, %v3405_v50  ;;  %v3665_v8 = vld [vmem:[#allocation2 + $0x58] sm:$0xff]  ;;  %v3664_v50 = vld [vmem:[#allocation2 + $0x50] sm:$0xff] }
 0x206   : > { %v4606_v33 = vpop.f32.mrf.mxu1  ;;  %v3546_v30 = vpop.f32.mrf.mxu0  ;;  %v3406_v21 = vld [vmem:[#allocation2 + $0xc0] sm:$0xff]  ;;  %v3724_v11 = vpack.c.bf16 %v3699_v9, %v3698_v40  ;;  %v3673_v27 = vld [vmem:[#allocation2 + $0x98] sm:$0xff] }
 0x207   : > { %3370 = vst.msk [vmem:[#allocation2 + $0xe0] sm:$0xff] %vm285_vm7, %v3338_v15  ;;  %v3341_v16 = vadd.f32 %v4606_v33, %v3133_v54  ;;  %3645 = vst.msk [vmem:[#allocation2 + $0xb8] sm:$0xff] %vm285_vm7, %v3613_v60  ;;  %v3611_v48 = vadd.f32 %v3546_v30, %v3403_v3  ;;  %v3697_v60 = vmax.f32 %v3665_v8, 0.0  ;;  %v3696_v33 = vmax.f32 %v3664_v50, 0.0  ;;  %v3654_v9 = vld [vmem:[#allocation2] sm:$0xff] }
 0x208   : > { %v3298_v29 = vpop.f32.mrf.mxu1  ;;  %v4635_v61 = vpop.f32.mrf.mxu0  ;;  %v3409_v24 = vld [vmem:[#allocation2 + $0xd8] sm:$0xff]  ;;  %v3763_v10 = vsel %vm285_vm7, %v3724_v11, 0  ;;  %v3705_v0 = vmax.f32 %v3673_v27, 0.0  ;;  %v3671_v20 = vld [vmem:[#allocation2 + $0x88] sm:$0xff]  ;;  %v3686_v11 = vmax.f32 %v3654_v9, 0.0 }
 0x209   : > { %3373 = vst.msk [vmem:[#allocation2 + $0xf8] sm:$0xff] %vm285_vm7, %v3341_v16  ;;  %v3339_v28 = vadd.f32 %v3298_v29, %v3131_v55  ;;  %3643 = vst.msk [vmem:[#allocation2 + $0xa8] sm:$0xff] %vm285_vm7, %v3611_v48  ;;  %v3616_v59 = vadd.f32 %v4635_v61, %v3408_v19  ;;  %v3723_v30 = vpack.c.bf16 %v3697_v60, %v3696_v33  ;;  %v3663_v48 = vld [vmem:[#allocation2 + $0x48] sm:$0xff]  ;;  %v3662_v29 = vld [vmem:[#allocation2 + $0x40] sm:$0xff]  ;;  %v3703_v58 = vmax.f32 %v3671_v20, 0.0 }
 0x20a   : > { %v3559_v63 = vpop.f32.mrf.mxu0  ;;  %v3407_v42 = vld [vmem:[#allocation2 + $0xc8] sm:$0xff] }
 0x20b   : > { %3371 = vst.msk [vmem:[#allocation2 + $0xe8] sm:$0xff] %vm285_vm7, %v3339_v28  ;;  %3648 = vst.msk [vmem:[#allocation2 + $0xd0] sm:$0xff] %vm285_vm7, %v3616_v59  ;;  %v3614_v46 = vadd.f32 %v3559_v63, %v3406_v21  ;;  %v3760_v19 = vsel %vm285_vm7, %v3723_v30, 0  ;;  %v3695_v28 = vmax.f32 %v3663_v48, 0.0  ;;  %v3694_v21 = vmax.f32 %v3662_v29, 0.0  ;;  %v3676_v63 = vld [vmem:[#allocation2 + $0xb0] sm:$0xff] }
 0x20c   : > { %v4636_v44 = vpop.f32.mrf.mxu0  ;;  %v3412_v45 = vld [vmem:[#allocation2 + $0xf0] sm:$0xff] }
 0x20d   : > { %3646 = vst.msk [vmem:[#allocation2 + $0xc0] sm:$0xff] %vm285_vm7, %v3614_v46  ;;  %v3617_v56 = vadd.f32 %v4636_v44, %v3409_v24  ;;  %v3722_v46 = vpack.c.bf16 %v3695_v28, %v3694_v21  ;;  %v3661_v44 = vld [vmem:[#allocation2 + $0x38] sm:$0xff] }
 0x20e   : > { %v3562_v53 = vpop.f32.mrf.mxu0  ;;  %v3410_v38 = vld [vmem:[#allocation2 + $0xe0] sm:$0xff]  ;;  %v3677_v59 = vld [vmem:[#allocation2 + $0xb8] sm:$0xff] }
 0x20f   : > { %3649 = vst.msk [vmem:[#allocation2 + $0xd8] sm:$0xff] %vm285_vm7, %v3617_v56  ;;  %v3615_v14 = vadd.f32 %v3562_v53, %v3407_v42  ;;  %v3709_v24 = vmax.f32 %v3677_v59, 0.0  ;;  %v3708_v56 = vmax.f32 %v3676_v63, 0.0  ;;  %v3660_v42 = vld [vmem:[#allocation2 + $0x30] sm:$0xff]  ;;  %v3757_v53 = vsel %vm285_vm7, %v3722_v46, 0 }
 0x210   : > { %v4639_v13 = vpop.f32.mrf.mxu0  ;;  %v3413_v51 = vld [vmem:[#allocation2 + $0xf8] sm:$0xff] }
 0x211   : > { %3647 = vst.msk [vmem:[#allocation2 + $0xc8] sm:$0xff] %vm285_vm7, %v3615_v14  ;;  %v3620_v37 = vadd.f32 %v4639_v13, %v3412_v45  ;;  %v3729_v14 = vpack.c.bf16 %v3709_v24, %v3708_v56  ;;  %v3693_v45 = vmax.f32 %v3661_v44, 0.0  ;;  %v3675_v13 = vld [vmem:[#allocation2 + $0xa8] sm:$0xff] }
 0x212   : > { %v3575_v12 = vpop.f32.mrf.mxu0  ;;  %v3411_v52 = vld [vmem:[#allocation2 + $0xe8] sm:$0xff]  ;;  %v3680_v7 = vld [vmem:[#allocation2 + $0xd0] sm:$0xff] }
 0x213   : > { %3652 = vst.msk [vmem:[#allocation2 + $0xf0] sm:$0xff] %vm285_vm7, %v3620_v37  ;;  %v3618_v47 = vadd.f32 %v3575_v12, %v3410_v38  ;;  %v3712_v6 = vmax.f32 %v3680_v7, 0.0  ;;  %v3692_v37 = vmax.f32 %v3660_v42, 0.0  ;;  %v3674_v38 = vld [vmem:[#allocation2 + $0xa0] sm:$0xff] }
 0x214   : > { %v4640_v18 = vpop.f32.mrf.mxu0  ;;  %v3678_v3 = vld [vmem:[#allocation2 + $0xc0] sm:$0xff] }
 0x215   : > { %3650 = vst.msk [vmem:[#allocation2 + $0xe0] sm:$0xff] %vm285_vm7, %v3618_v47  ;;  %v3621_v35 = vadd.f32 %v4640_v18, %v3413_v51  ;;  %v3710_v55 = vmax.f32 %v3678_v3, 0.0  ;;  %v3721_v12 = vpack.c.bf16 %v3693_v45, %v3692_v37  ;;  %v3707_v47 = vmax.f32 %v3675_v13, 0.0  ;;  %v3659_v51 = vld [vmem:[#allocation2 + $0x28] sm:$0xff] }
 0x216   : > { %v3578_v23 = vpop.f32.mrf.mxu0  ;;  %v3681_v41 = vld [vmem:[#allocation2 + $0xd8] sm:$0xff]  ;;  %v3706_v18 = vmax.f32 %v3674_v38, 0.0 }
 0x217   : > { %3653 = vst.msk [vmem:[#allocation2 + $0xf8] sm:$0xff] %vm285_vm7, %v3621_v35  ;;  %v3619_v57 = vadd.f32 %v3578_v23, %v3411_v52  ;;  %v3713_v36 = vmax.f32 %v3681_v41, 0.0  ;;  %v3658_v35 = vld [vmem:[#allocation2 + $0x20] sm:$0xff]  ;;  %v3754_v52 = vsel %vm285_vm7, %v3721_v12, 0 }
 0x218   : > { %v3679_v54 = vld [vmem:[#allocation2 + $0xc8] sm:$0xff]  ;;  %v3728_v23 = vpack.c.bf16 %v3707_v47, %v3706_v18  ;;  %v3690_v43 = vmax.f32 %v3658_v35, 0.0 }
 0x219   : > { %3651 = vst.msk [vmem:[#allocation2 + $0xe8] sm:$0xff] %vm285_vm7, %v3619_v57  ;;  %v3731_v15 = vpack.c.bf16 %v3713_v36, %v3712_v6  ;;  %v3711_v16 = vmax.f32 %v3679_v54, 0.0  ;;  %v3691_v57 = vmax.f32 %v3659_v51, 0.0 }
 0x21a   : > { %v3684_v1 = vld [vmem:[#allocation2 + $0xf0] sm:$0xff] }
 0x21b   : > { %v3716_v2 = vmax.f32 %v3684_v1, 0.0  ;;  %v3730_v61 = vpack.c.bf16 %v3711_v16, %v3710_v55  ;;  %v3720_v1 = vpack.c.bf16 %v3691_v57, %v3690_v43 }
 0x21c   : > { %v3682_v22 = vld [vmem:[#allocation2 + $0xe0] sm:$0xff] }
 0x21d   : > { %v3714_v26 = vmax.f32 %v3682_v22, 0.0  ;;  %v3704_v22 = vmax.f32 %v3672_v49, 0.0 }
 0x21e   : > { %v3685_v34 = vld [vmem:[#allocation2 + $0xf8] sm:$0xff] }
 0x21f   : > { %v3717_v32 = vmax.f32 %v3685_v34, 0.0  ;;  %v3657_v34 = vld [vmem:[#allocation2 + $0x18] sm:$0xff]  ;;  %v3727_v5 = vpack.c.bf16 %v3705_v0, %v3704_v22 }
 0x220   : > { %v3683_v17 = vld [vmem:[#allocation2 + $0xe8] sm:$0xff] }
 0x221   : > { %v3733_v31 = vpack.c.bf16 %v3717_v32, %v3716_v2  ;;  %v3715_v62 = vmax.f32 %v3683_v17, 0.0  ;;  %v3656_v2 = vld [vmem:[#allocation2 + $0x10] sm:$0xff]  ;;  %v3751_v32 = vsel %vm285_vm7, %v3720_v1, 0  ;;  %v3689_v17 = vmax.f32 %v3657_v34, 0.0 }
 0x223   : > { %4643 = vmatprep.subr.msk.bf16.mxu1 %vm285_vm7, %v3733_v31  ;;  %v3732_v25 = vpack.c.bf16 %v3715_v62, %v3714_v26  ;;  %v3688_v31 = vmax.f32 %v3656_v2, 0.0  ;;  %v3670_v26 = vld [vmem:[#allocation2 + $0x80] sm:$0xff] }
 0x224   : > { %4318 = vmatpush3.bf16.xpose.msra.mxu1 %v3766_v4  ;;  %v3655_v4 = vld [vmem:[#allocation2 + $0x8] sm:$0xff] }
 0x225   : > { %4644 = vmatprep.subr.msk.bf16.mxu1 %vm285_vm7, %v3732_v25  ;;  %v3719_v62 = vpack.c.bf16 %v3689_v17, %v3688_v31  ;;  %v3702_v25 = vmax.f32 %v3670_v26, 0.0  ;;  %v3687_v7 = vmax.f32 %v3655_v4, 0.0 }
 0x227   : > { %v3748_v41 = vsel %vm285_vm7, %v3719_v62, 0  ;;  %v3726_v40 = vpack.c.bf16 %v3703_v58, %v3702_v25  ;;  %v3718_v36 = vpack.c.bf16 %v3687_v7, %v3686_v11 }
 0x229   : > { %v3745_v8 = vsel %vm285_vm7, %v3718_v36, 0 }
 0x22c   : > { %4320 = vmatpush3.bf16.xpose.msra.mxu1 %v3763_v10 }
 0x22d   : > { %4645 = vmatprep.subr.msk.bf16.mxu1 %vm285_vm7, %v3731_v15 }
 0x234   : > { %4322 = vmatpush3.bf16.xpose.msra.mxu1 %v3760_v19 }
 0x235   : > { %4646 = vmatprep.subr.msk.bf16.mxu1 %vm285_vm7, %v3730_v61 }
 0x23c   : > { %4324 = vmatpush3.bf16.xpose.msra.mxu1 %v3757_v53 }
 0x23d   : > { %4647 = vmatprep.subr.msk.bf16.mxu1 %vm285_vm7, %v3729_v14 }
 0x244   : > { %4326 = vmatpush3.bf16.xpose.msra.mxu1 %v3754_v52 }
 0x245   : > { %4648 = vmatprep.subr.msk.bf16.mxu1 %vm285_vm7, %v3728_v23 }
 0x24c   : > { %4328 = vmatpush3.bf16.xpose.msra.mxu1 %v3751_v32 }
 0x24d   : > { %4649 = vmatprep.subr.msk.bf16.mxu1 %vm285_vm7, %v3727_v5 }
 0x24e   : > { %v3739_v6 = vpop.permute.xlu0 %3738 }
 0x254   : > { %4330 = vmatpush3.bf16.xpose.msra.mxu1 %v3748_v41 }
 0x255   : > { %4650 = vmatprep.subr.msk.bf16.mxu1 %vm285_vm7, %v3726_v40 }
 0x25c   : > { %4332 = vmatpush3.bf16.xpose.msra.mxu1 %v3745_v8 }
 0x263   : > { %4334 = vmatmul.mubr.msk.bf16.vlgmr.msra.gmra.mxu1 %vm285_vm7, %v6222_v39 }
 0x323   : > { %v3826_v50 = vpop.f32.mrf.mxu1 }
 0x324   : > { %v3827_v10 = vadd.f32 %v3826_v50, %v3739_v6 }
 0x325   : > { %v3828_v15 = vpop.f32.mrf.mxu1 }
 0x326   : > { %3833 = vst [vmem:[%s217_s30] sm:$0xff] %v3827_v10  ;;  %v3829_v60 = vadd.f32 %v3828_v15, %v3739_v6 }
 0x327   : > { %v3830_v39 = vpop.f32.mrf.mxu1 }
 0x328   : > { %3834 = vst [vmem:[%s217_s30 + $0x8] sm:$0xff] %v3829_v60 }
 0x329   : > { %v3831_v54 = vpop.f32.mrf.mxu1 }
 0x32a   : > { %4733 = shalt.err (!%p4730_p3)
}
 0x32b   : > { %s4734_s14 = scalar_lea.hbm %s6307_s9, 256  ;;  %s4738_s17 = scalar_lea.hbm %s6353_s5, 512 }
 0x32c   : > { %p4735_p4 = scmp.ne.s32.totalorder %s6307_s9, %s4734_s14  ;;  %p4739_p9 = scmp.lt.s32.totalorder %s6307_s9, %s6353_s5 }
 0x32d   : > { %p4740_p10 = scmp.lt.s32.totalorder %s4738_s17, %s4734_s14 }
 0x32e   : > { %p4736_p7 = pnand %p4735_p4, %p4852_p5 }
 0x32f   : > { %p4741_p11 = por %p4740_p10, %p4739_p9 }
 0x330   : > { %p4737_p8 = pneg %p4736_p7 }
 0x332   : > { %p4742_p12 = pnand %p4741_p11, %p4737_p8 }
 0x334   : > { %4745 = shalt.err (!%p4742_p12)
}
 0x335   : > { %4652 = dma.vmem_to_hbm [thread:$0]  (%p4852_p5), %s6309_s6, 256, %s6307_s9, %s3836_s22  }
 0x336 PF: > { %p4658_p13 = scmp.ge.s32.totalorder %s4780_s21, 2  ;;  %s3862_s26 = sand.u32 1, %s4768_s18  }
 0x337   : > { %s3863_s30 = scalar_lea.sflag [#allocation4], %s3862_s26 }
 0x338   : > { %p4655_p0 = pnand %p4658_p13, %p4856_p6 }
 0x33a   : > { %p4656_p1 = pneg %p4655_p0 }
 0x33c   : > { %4763 = dma.done.wait (%p4656_p1), %s3863_s30, 256  }
 0x33d   : > { %4765 = vsyncadd (%p4656_p1), %s3863_s30, 4294967040  ;;  %p15_p2 = scmp.ge.s32.totalorder %s4839_s24, 4   ;;  %s6481_s18 = smov %s4772_s19 }
 0x33e   : > { %s6482_s19 = smov %s4776_s20  ;;  %s6483_s20 = smov %s4850_s27 }
 0x33f   : > { %s6484_s21 = smov %s4839_s24  ;;  %17 = sbr.rel (!%p15_p2) target bundleno = 3 (0x3), region = 83 }
 0x344   :  { %3868 = vsyncpa [#allocation4], 1 }
 0x345   :  { %3870 = vsyncpa [#allocation4 + $0x1], 1 }

</bundles_post_ra>
